<compile_context>
chip_gen: v6e
topology: v6e:2x2x1
jax: 0.10.0
libtpu: 0.0.40
codegen_flags: <defaults>
</compile_context>

<pallas_src>
import functools

import jax
import jax.numpy as jnp
from jax.experimental import pallas as pl
from jax.experimental.pallas import tpu as pltpu


def _round_up(x, m):
    return (x + m - 1) // m * m


# ----------------------------------------------------------------------------
# Fused Pallas kernel: [conv3x3 + BN + ReLU] x2 for one (batch, H-tile) block
# ----------------------------------------------------------------------------
def _up_double_conv_kernel(x_ref, w1_ref, w2_ref, s1_ref, b1_ref, s2_ref,
                           b2_ref, o_ref, mid_ref, *, TH, H, W, P):
    """Shift-and-matmul double conv on a flattened, zero-padded row tile.

    x_ref:   (1, 1, Rt, Cin) bf16  flattened padded input tile,
                                   Rt = (TH+5)*P, pitch P >= W+3, P % 16 == 0
                                   (2 zero halo rows/cols on top/left).
    w1_ref:  (9, Cin, Cm)    bf16  conv1 taps (concat(x2, x1) channel order).
    w2_ref:  (9, Cm, Co)     bf16  conv2 taps.
    s*_ref/b*_ref: (1, C)    f32   folded conv-bias + eval-mode BatchNorm.
    o_ref:   (1, TH, W, Co)  bf16  output tile (only real columns stored).
    mid_ref: (Rs, Cm)        bf16  VMEM scratch: mid activation for TH+2 rows
                                   (one halo row on each side of the tile).
    """
    Mm = (TH + 2) * P          # flat length of mid (tile rows + row halo)
    M = TH * P                 # flat length of the output tile
    Cm = mid_ref.shape[1]
    Co = o_ref.shape[3]
    j = pl.program_id(1)       # H-tile index

    # ---- conv1: 9 shifted 2-D bf16 MXU matmuls over the flattened tile -----
    acc = jnp.zeros((Mm, Cm), jnp.float32)
    for dy in range(3):
        for dx in range(3):
            off = dy * P + dx                  # dy*P is 16-aligned
            acc = acc + jnp.dot(x_ref[0, 0, off:off + Mm, :],
                                w1_ref[3 * dy + dx],
                                preferred_element_type=jnp.float32)
    mid = jnp.maximum(acc * s1_ref[0] + b1_ref[0], 0.0)   # folded BN + ReLU

    # Flat position q = m*P + cc holds mid(global row j*TH + m - 1, col cc - 1).
    # Zero the column halo (cc == 0, cc > W) and rows outside the image so the
    # scratch doubles as conv2's zero padding (no per-step halo memsets).
    mid3 = mid.reshape(TH + 2, P, Cm)
    cc = jax.lax.broadcasted_iota(jnp.int32, (TH + 2, P, 1), 1)
    rr = jax.lax.broadcasted_iota(jnp.int32, (TH + 2, P, 1), 0)
    grow = j * TH + rr - 1
    valid = (cc >= 1) & (cc <= W) & (grow >= 0) & (grow < H)
    mid3 = jnp.where(valid, mid3, 0.0)

    # bf16 scratch, single aligned store; never touches HBM.
    mid_ref[0:Mm, :] = mid3.reshape(Mm, Cm).astype(mid_ref.dtype)

    # ---- conv2: 9 shifted matmuls over the mid scratch ----------------------
    # (Reads past Mm touch <= 2 uninitialised scratch rows; they only feed the
    #  dead columns c >= W which are sliced away before the store.)
    acc2 = jnp.zeros((M, Co), jnp.float32)
    for dy in range(3):
        for dx in range(3):
            off = dy * P + dx
            acc2 = acc2 + jnp.dot(mid_ref[off:off + M, :],
                                  w2_ref[3 * dy + dx],
                                  preferred_element_type=jnp.float32)
    y = jnp.maximum(acc2 * s2_ref[0] + b2_ref[0], 0.0)

    # Drop the dead pitch columns, store bf16 (lane-dense in Co).
    o_ref[0] = y.reshape(TH, P, Co)[:, :W, :].astype(o_ref.dtype)


# ----------------------------------------------------------------------------
# Bilinear x2 upsample (align_corners=True) via interp-matrix matmuls (bf16)
# ----------------------------------------------------------------------------
def _lerp_matrix(n_in, n_out):
    src = jnp.arange(n_out, dtype=jnp.float32) * ((n_in - 1) / max(n_out - 1, 1))
    i0 = jnp.floor(src).astype(jnp.int32)
    i1 = jnp.minimum(i0 + 1, n_in - 1)
    f = src - i0.astype(jnp.float32)
    eye = jnp.eye(n_in, dtype=jnp.float32)
    return (1.0 - f)[:, None] * eye[i0] + f[:, None] * eye[i1]


def upsample_bilinear_x2_align_corners(x_nhwc):
    _, H, W, _ = x_nhwc.shape
    Ay = _lerp_matrix(H, 2 * H).astype(x_nhwc.dtype)
    Ax = _lerp_matrix(W, 2 * W).astype(x_nhwc.dtype)
    y = jnp.einsum("oh,nhwc->nowc", Ay, x_nhwc)
    return jnp.einsum("pw,nowc->nopc", Ax, y)


# ----------------------------------------------------------------------------
# Parameters (synthetic, deterministic) with conv-bias + eval-BN folded
# ----------------------------------------------------------------------------
def make_up_params(key, in_channels, out_channels):
    mid_channels = in_channels // 2
    eps = 1e-5
    ks = jax.random.split(key, 8)

    w1 = 0.1 * jax.random.normal(ks[0], (3, 3, in_channels, mid_channels), jnp.float32)
    b1 = 0.1 * jax.random.normal(ks[1], (mid_channels,), jnp.float32)
    g1 = 1.0 + 0.1 * jax.random.normal(ks[2], (mid_channels,), jnp.float32)
    beta1 = 0.1 * jax.random.normal(ks[3], (mid_channels,), jnp.float32)

    w2 = 0.1 * jax.random.normal(ks[4], (3, 3, mid_channels, out_channels), jnp.float32)
    b2 = 0.1 * jax.random.normal(ks[5], (out_channels,), jnp.float32)
    g2 = 1.0 + 0.1 * jax.random.normal(ks[6], (out_channels,), jnp.float32)
    beta2 = 0.1 * jax.random.normal(ks[7], (out_channels,), jnp.float32)

    scale1 = g1 / jnp.sqrt(1.0 + eps)
    bias1 = beta1 + scale1 * b1
    scale2 = g2 / jnp.sqrt(1.0 + eps)
    bias2 = beta2 + scale2 * b2
    return dict(w1=w1, scale1=scale1, bias1=bias1,
                w2=w2, scale2=scale2, bias2=bias2)


# ----------------------------------------------------------------------------
# Tile / VMEM budgeting
# ----------------------------------------------------------------------------
def _choose_tile_h(H, W, P, Cin, Cmid_p, Cout_p, budget):
    """Largest H-tile dividing H whose estimated VMEM footprint fits."""
    best = 1
    for th in range(1, H + 1):
        if H % th:
            continue
        rt = (th + 5) * P
        mm = (th + 2) * P
        est = (2 * rt * Cin * 2                                 # input tile, 2 bufs, bf16
               + 2 * 9 * (Cin * Cmid_p + Cmid_p * Cout_p) * 2   # weights, 2 bufs, bf16
               + 2 * th * W * Cout_p * 2                        # output tile, 2 bufs, bf16
               + (mm + 8) * Cmid_p * 2                          # mid scratch, bf16
               + mm * Cmid_p * 4 + th * P * Cout_p * 4)         # f32 accumulators
        if est <= budget:
            best = th
    return best


# ----------------------------------------------------------------------------
# Public forward (NCHW in / NCHW out, matching PyTorch Up.forward(x1, x2))
# ----------------------------------------------------------------------------
def up_forward(params, x1_nchw, x2_nchw, *, tile_h=None):
    # NCHW -> NHWC with the bf16 cast fused in (channels on the 128-lane axis).
    x1 = jnp.transpose(x1_nchw, (0, 2, 3, 1)).astype(jnp.bfloat16)
    x2 = jnp.transpose(x2_nchw, (0, 2, 3, 1)).astype(jnp.bfloat16)

    # Upsample x1 by 2 (bilinear, align_corners=True), pad to x2's size,
    # then concat([x2, x1]) along channels (torch.cat([x2, x1], dim=1)).
    x1 = upsample_bilinear_x2_align_corners(x1)
    N, H, W, C2 = x2.shape
    C1 = x1.shape[-1]
    diffY = H - x1.shape[1]
    diffX = W - x1.shape[2]
    x1 = jnp.pad(x1, ((0, 0), (diffY // 2, diffY - diffY // 2),
                      (diffX // 2, diffX - diffX // 2), (0, 0)))
    x = jnp.concatenate([x2, x1], axis=-1)            # (N, H, W, Cin) bf16
    Cin = C2 + C1

    # Kernel-ready weights: HWIO -> (9, Cin, Cout), channel dims padded to x128.
    Cmid = params["w1"].shape[3]
    Cout = params["w2"].shape[3]
    Cmid_p = _round_up(Cmid, 128)
    Cout_p = _round_up(Cout, 128)
    w1 = jnp.pad(params["w1"], ((0, 0), (0, 0), (0, 0), (0, Cmid_p - Cmid)))
    w1 = w1.reshape(9, Cin, Cmid_p).astype(jnp.bfloat16)
    w2 = jnp.pad(params["w2"], ((0, 0), (0, 0), (0, Cmid_p - Cmid), (0, Cout_p - Cout)))
    w2 = w2.reshape(9, Cmid_p, Cout_p).astype(jnp.bfloat16)
    s1 = jnp.pad(params["scale1"], (0, Cmid_p - Cmid)).reshape(1, Cmid_p).astype(jnp.float32)
    b1 = jnp.pad(params["bias1"], (0, Cmid_p - Cmid)).reshape(1, Cmid_p).astype(jnp.float32)
    s2 = jnp.pad(params["scale2"], (0, Cout_p - Cout)).reshape(1, Cout_p).astype(jnp.float32)
    b2 = jnp.pad(params["bias2"], (0, Cout_p - Cout)).reshape(1, Cout_p).astype(jnp.float32)

    # Row pitch padded to a multiple of 16 so dy-shift slices / reshapes stay
    # aligned for bf16; needs >= W+3 (2 left halo cols + >=1 right zero col).
    P = _round_up(W + 3, 16)

    # Per-generation VMEM budget (v7x: 64 MiB physical, v5e/v6e: 128 MiB).
    try:
        vmem_cap = pltpu.get_tpu_info().vmem_capacity_bytes
    except Exception:
        vmem_cap = 128 * 1024 * 1024
    vmem_limit = min(int(0.75 * vmem_cap), 100 * 1024 * 1024)

    if tile_h is None:
        tile_h = _choose_tile_h(H, W, P, Cin, Cmid_p, Cout_p,
                                budget=int(0.6 * vmem_limit))
    assert H % tile_h == 0, f"tile_h={tile_h} must divide H={H}"
    TH = tile_h
    n_tiles = H // TH
    Rt = (TH + 5) * P          # flat rows per input tile (incl. halo + guard)
    Rs = (TH + 2) * P + 8      # mid scratch rows

    # Conv halo pad (2 zero rows/cols top/left, 3 rows bottom incl. the guard
    # row for the flattened tap slices), fused with the overlapping row-tile
    # gather: tile j holds padded rows [j*TH, j*TH + TH + 5).
    xp = jnp.pad(x, ((0, 0), (2, 3), (2, P - W - 2), (0, 0)))
    rows = (jnp.arange(n_tiles) * TH)[:, None] + jnp.arange(TH + 5)[None, :]
    x_tiles = xp[:, rows].reshape(N, n_tiles, Rt, Cin)

    out = pl.pallas_call(
        functools.partial(_up_double_conv_kernel, TH=TH, H=H, W=W, P=P),
        out_shape=jax.ShapeDtypeStruct((N, H, W, Cout_p), jnp.bfloat16),
        grid=(N, n_tiles),
        in_specs=[
            pl.BlockSpec((1, 1, Rt, Cin), lambda n, j: (n, j, 0, 0)),
            # TODO(synk): single-buffer these constant weight blocks
            # (pipeline_mode=pl.Buffered(1)) to free VMEM headroom on v7x.
            pl.BlockSpec((9, Cin, Cmid_p), lambda n, j: (0, 0, 0)),
            pl.BlockSpec((9, Cmid_p, Cout_p), lambda n, j: (0, 0, 0)),
            pl.BlockSpec((1, Cmid_p), lambda n, j: (0, 0)),
            pl.BlockSpec((1, Cmid_p), lambda n, j: (0, 0)),
            pl.BlockSpec((1, Cout_p), lambda n, j: (0, 0)),
            pl.BlockSpec((1, Cout_p), lambda n, j: (0, 0)),
        ],
        out_specs=pl.BlockSpec((1, TH, W, Cout_p), lambda n, j: (n, j, 0, 0)),
        scratch_shapes=[pltpu.VMEM((Rs, Cmid_p), jnp.bfloat16)],
        compiler_params=pltpu.CompilerParams(
            dimension_semantics=("parallel", "parallel"),
            vmem_limit_bytes=vmem_limit),
    )(x_tiles, w1, w2, s1, b1, s2, b2)

    # Drop channel padding, cast back to f32 and return NCHW (one fused copy).
    y = out[:, :, :, :Cout].astype(jnp.float32)
    return jnp.transpose(y, (0, 3, 1, 2))


# ----------------------------------------------------------------------------
# Pure-JAX (XLA) reference with identical semantics, for verification only
# ----------------------------------------------------------------------------
def up_forward_reference(params, x1_nchw, x2_nchw):
    a = jnp.transpose(x1_nchw, (0, 2, 3, 1)).astype(jnp.float32)
    b = jnp.transpose(x2_nchw, (0, 2, 3, 1)).astype(jnp.float32)
    _, hh, ww, _ = a.shape

    def coords(n_in, n_out):
        s = jnp.arange(n_out, dtype=jnp.float32) * (n_in - 1) / max(n_out - 1, 1)
        i0 = jnp.floor(s).astype(jnp.int32)
        i1 = jnp.minimum(i0 + 1, n_in - 1)
        return s - i0.astype(jnp.float32), i0, i1

    fy, y0, y1 = coords(hh, 2 * hh)
    fx, z0, z1 = coords(ww, 2 * ww)
    rows = a[:, y0] * (1 - fy)[None, :, None, None] + a[:, y1] * fy[None, :, None, None]
    up = (rows[:, :, z0] * (1 - fx)[None, None, :, None]
          + rows[:, :, z1] * fx[None, None, :, None])

    dy = b.shape[1] - up.shape[1]
    dx = b.shape[2] - up.shape[2]
    up = jnp.pad(up, ((0, 0), (dy // 2, dy - dy // 2), (dx // 2, dx - dx // 2), (0, 0)))
    x = jnp.concatenate([b, up], axis=-1)

    def conv_bn_relu(v, w, scale, bias):
        y = jax.lax.conv_general_dilated(
            v, w, window_strides=(1, 1), padding="SAME",
            dimension_numbers=("NHWC", "HWIO", "NHWC"))
        return jnp.maximum(y * scale + bias, 0.0)

    h = conv_bn_relu(x, params["w1"], params["scale1"], params["bias1"])
    y = conv_bn_relu(h, params["w2"], params["scale2"], params["bias2"])
    return jnp.transpose(y, (0, 3, 1, 2))


if __name__ == "__main__":
    key = jax.random.PRNGKey(0)
    k_p, k1, k2 = jax.random.split(key, 3)

    in_channels = 8      # channels after concat (x2: 4 + upsampled x1: 4)
    out_channels = 4
    N, h, w = 2, 8, 8    # x1 spatial; x2 is 2x larger

    params = make_up_params(k_p, in_channels, out_channels)
    x1 = jax.random.normal(k1, (N, in_channels // 2, h, w), jnp.float32)           # (2,4,8,8)
    x2 = jax.random.normal(k2, (N, in_channels // 2, 2 * h, 2 * w), jnp.float32)   # (2,4,16,16)

    # tile_h=8 -> two H-tiles per image, exercising the tiled (halo) path.
    fwd = jax.jit(functools.partial(up_forward, tile_h=8))
    out = jax.block_until_ready(fwd(params, x1, x2))

    assert out.shape == (N, out_channels, 2 * h, 2 * w), out.shape
    assert out.dtype == jnp.float32

    ref = jax.block_until_ready(jax.jit(up_forward_reference)(params, x1, x2))
    err = float(jnp.max(jnp.abs(out - ref)))
    assert err < 5e-2, f"max abs error vs reference: {err}"

    print("KERNEL_OK")
</pallas_src>

<mosaic_0001>
module attributes {stable_mosaic.version = 11 : i64} {
  func.func @_up_double_conv_kernel(%arg0: i32, %arg1: i32, %arg2: memref<1x1x416x8xbf16, #tpu.memory_space<vmem>>, %arg3: memref<9x8x128xbf16, #tpu.memory_space<vmem>>, %arg4: memref<9x128x128xbf16, #tpu.memory_space<vmem>>, %arg5: memref<1x128xf32, #tpu.memory_space<vmem>>, %arg6: memref<1x128xf32, #tpu.memory_space<vmem>>, %arg7: memref<1x128xf32, #tpu.memory_space<vmem>>, %arg8: memref<1x128xf32, #tpu.memory_space<vmem>>, %arg9: memref<1x8x16x128xbf16, #tpu.memory_space<vmem>>, %arg10: memref<328x128xbf16, #tpu.memory_space<vmem>>) attributes {dimension_semantics = [#tpu.dimension_semantics<parallel>, #tpu.dimension_semantics<parallel>], iteration_bounds = array<i64: 2, 2>, scalar_prefetch = 0 : i64, scratch_operands = 1 : i64, tpu.core_type = #tpu.core_type<tc>, window_params = [{transform_indices = @transform_0, window_bounds = array<i64: 1, 1, 416, 8>}, {pipeline_mode = #tpu.pipeline_mode<synchronous>, transform_indices = @transform_1, window_bounds = array<i64: 9, 8, 128>}, {pipeline_mode = #tpu.pipeline_mode<synchronous>, transform_indices = @transform_2, window_bounds = array<i64: 9, 128, 128>}, {pipeline_mode = #tpu.pipeline_mode<synchronous>, transform_indices = @transform_3, window_bounds = array<i64: 1, 128>}, {pipeline_mode = #tpu.pipeline_mode<synchronous>, transform_indices = @transform_4, window_bounds = array<i64: 1, 128>}, {pipeline_mode = #tpu.pipeline_mode<synchronous>, transform_indices = @transform_5, window_bounds = array<i64: 1, 128>}, {pipeline_mode = #tpu.pipeline_mode<synchronous>, transform_indices = @transform_6, window_bounds = array<i64: 1, 128>}, {transform_indices = @transform_7, window_bounds = array<i64: 1, 8, 16, 128>}]} {
    %cst = arith.constant 0.000000e+00 : f32
    %0 = vector.broadcast %cst : f32 to vector<320x128xf32>
    %c0 = arith.constant 0 : index
    %c0_0 = arith.constant 0 : index
    %c0_1 = arith.constant 0 : index
    %c0_2 = arith.constant 0 : index
    %1 = vector.load %arg2[%c0, %c0_0, %c0_1, %c0_2] : memref<1x1x416x8xbf16, #tpu.memory_space<vmem>>, vector<1x1x320x8xbf16>
    %2 = vector.shape_cast %1 : vector<1x1x320x8xbf16> to vector<320x8xbf16>
    %c0_3 = arith.constant 0 : index
    %c0_4 = arith.constant 0 : index
    %c0_5 = arith.constant 0 : index
    %3 = vector.load %arg3[%c0_3, %c0_4, %c0_5] : memref<9x8x128xbf16, #tpu.memory_space<vmem>>, vector<1x8x128xbf16>
    %4 = vector.shape_cast %3 : vector<1x8x128xbf16> to vector<8x128xbf16>
    %cst_6 = arith.constant dense<0.000000e+00> : vector<320x128xf32>
    %5 = tpu.matmul %2, %4, %cst_6 {dimension_numbers = #tpu.dot_dimension_numbers<[1], [0], [0], [1], [0, 0, 1, 1], [], []>} : vector<320x8xbf16>, vector<8x128xbf16>, vector<320x128xf32> -> vector<320x128xf32>
    %6 = arith.addf %0, %5 : vector<320x128xf32>
    %c0_7 = arith.constant 0 : index
    %c0_8 = arith.constant 0 : index
    %c1 = arith.constant 1 : index
    %c0_9 = arith.constant 0 : index
    %7 = vector.load %arg2[%c0_7, %c0_8, %c1, %c0_9] : memref<1x1x416x8xbf16, #tpu.memory_space<vmem>>, vector<1x1x320x8xbf16>
    %8 = vector.shape_cast %7 : vector<1x1x320x8xbf16> to vector<320x8xbf16>
    %c1_10 = arith.constant 1 : index
    %c0_11 = arith.constant 0 : index
    %c0_12 = arith.constant 0 : index
    %9 = vector.load %arg3[%c1_10, %c0_11, %c0_12] : memref<9x8x128xbf16, #tpu.memory_space<vmem>>, vector<1x8x128xbf16>
    %10 = vector.shape_cast %9 : vector<1x8x128xbf16> to vector<8x128xbf16>
    %cst_13 = arith.constant dense<0.000000e+00> : vector<320x128xf32>
    %11 = tpu.matmul %8, %10, %cst_13 {dimension_numbers = #tpu.dot_dimension_numbers<[1], [0], [0], [1], [0, 0, 1, 1], [], []>} : vector<320x8xbf16>, vector<8x128xbf16>, vector<320x128xf32> -> vector<320x128xf32>
    %12 = arith.addf %6, %11 : vector<320x128xf32>
    %c0_14 = arith.constant 0 : index
    %c0_15 = arith.constant 0 : index
    %c2 = arith.constant 2 : index
    %c0_16 = arith.constant 0 : index
    %13 = vector.load %arg2[%c0_14, %c0_15, %c2, %c0_16] : memref<1x1x416x8xbf16, #tpu.memory_space<vmem>>, vector<1x1x320x8xbf16>
    %14 = vector.shape_cast %13 : vector<1x1x320x8xbf16> to vector<320x8xbf16>
    %c2_17 = arith.constant 2 : index
    %c0_18 = arith.constant 0 : index
    %c0_19 = arith.constant 0 : index
    %15 = vector.load %arg3[%c2_17, %c0_18, %c0_19] : memref<9x8x128xbf16, #tpu.memory_space<vmem>>, vector<1x8x128xbf16>
    %16 = vector.shape_cast %15 : vector<1x8x128xbf16> to vector<8x128xbf16>
    %cst_20 = arith.constant dense<0.000000e+00> : vector<320x128xf32>
    %17 = tpu.matmul %14, %16, %cst_20 {dimension_numbers = #tpu.dot_dimension_numbers<[1], [0], [0], [1], [0, 0, 1, 1], [], []>} : vector<320x8xbf16>, vector<8x128xbf16>, vector<320x128xf32> -> vector<320x128xf32>
    %18 = arith.addf %12, %17 : vector<320x128xf32>
    %c0_21 = arith.constant 0 : index
    %c0_22 = arith.constant 0 : index
    %c32 = arith.constant 32 : index
    %c0_23 = arith.constant 0 : index
    %19 = vector.load %arg2[%c0_21, %c0_22, %c32, %c0_23] : memref<1x1x416x8xbf16, #tpu.memory_space<vmem>>, vector<1x1x320x8xbf16>
    %20 = vector.shape_cast %19 : vector<1x1x320x8xbf16> to vector<320x8xbf16>
    %c3 = arith.constant 3 : index
    %c0_24 = arith.constant 0 : index
    %c0_25 = arith.constant 0 : index
    %21 = vector.load %arg3[%c3, %c0_24, %c0_25] : memref<9x8x128xbf16, #tpu.memory_space<vmem>>, vector<1x8x128xbf16>
    %22 = vector.shape_cast %21 : vector<1x8x128xbf16> to vector<8x128xbf16>
    %cst_26 = arith.constant dense<0.000000e+00> : vector<320x128xf32>
    %23 = tpu.matmul %20, %22, %cst_26 {dimension_numbers = #tpu.dot_dimension_numbers<[1], [0], [0], [1], [0, 0, 1, 1], [], []>} : vector<320x8xbf16>, vector<8x128xbf16>, vector<320x128xf32> -> vector<320x128xf32>
    %24 = arith.addf %18, %23 : vector<320x128xf32>
    %c0_27 = arith.constant 0 : index
    %c0_28 = arith.constant 0 : index
    %c33 = arith.constant 33 : index
    %c0_29 = arith.constant 0 : index
    %25 = vector.load %arg2[%c0_27, %c0_28, %c33, %c0_29] : memref<1x1x416x8xbf16, #tpu.memory_space<vmem>>, vector<1x1x320x8xbf16>
    %26 = vector.shape_cast %25 : vector<1x1x320x8xbf16> to vector<320x8xbf16>
    %c4 = arith.constant 4 : index
    %c0_30 = arith.constant 0 : index
    %c0_31 = arith.constant 0 : index
    %27 = vector.load %arg3[%c4, %c0_30, %c0_31] : memref<9x8x128xbf16, #tpu.memory_space<vmem>>, vector<1x8x128xbf16>
    %28 = vector.shape_cast %27 : vector<1x8x128xbf16> to vector<8x128xbf16>
    %cst_32 = arith.constant dense<0.000000e+00> : vector<320x128xf32>
    %29 = tpu.matmul %26, %28, %cst_32 {dimension_numbers = #tpu.dot_dimension_numbers<[1], [0], [0], [1], [0, 0, 1, 1], [], []>} : vector<320x8xbf16>, vector<8x128xbf16>, vector<320x128xf32> -> vector<320x128xf32>
    %30 = arith.addf %24, %29 : vector<320x128xf32>
    %c0_33 = arith.constant 0 : index
    %c0_34 = arith.constant 0 : index
    %c34 = arith.constant 34 : index
    %c0_35 = arith.constant 0 : index
    %31 = vector.load %arg2[%c0_33, %c0_34, %c34, %c0_35] : memref<1x1x416x8xbf16, #tpu.memory_space<vmem>>, vector<1x1x320x8xbf16>
    %32 = vector.shape_cast %31 : vector<1x1x320x8xbf16> to vector<320x8xbf16>
    %c5 = arith.constant 5 : index
    %c0_36 = arith.constant 0 : index
    %c0_37 = arith.constant 0 : index
    %33 = vector.load %arg3[%c5, %c0_36, %c0_37] : memref<9x8x128xbf16, #tpu.memory_space<vmem>>, vector<1x8x128xbf16>
    %34 = vector.shape_cast %33 : vector<1x8x128xbf16> to vector<8x128xbf16>
    %cst_38 = arith.constant dense<0.000000e+00> : vector<320x128xf32>
    %35 = tpu.matmul %32, %34, %cst_38 {dimension_numbers = #tpu.dot_dimension_numbers<[1], [0], [0], [1], [0, 0, 1, 1], [], []>} : vector<320x8xbf16>, vector<8x128xbf16>, vector<320x128xf32> -> vector<320x128xf32>
    %36 = arith.addf %30, %35 : vector<320x128xf32>
    %c0_39 = arith.constant 0 : index
    %c0_40 = arith.constant 0 : index
    %c64 = arith.constant 64 : index
    %c0_41 = arith.constant 0 : index
    %37 = vector.load %arg2[%c0_39, %c0_40, %c64, %c0_41] : memref<1x1x416x8xbf16, #tpu.memory_space<vmem>>, vector<1x1x320x8xbf16>
    %38 = vector.shape_cast %37 : vector<1x1x320x8xbf16> to vector<320x8xbf16>
    %c6 = arith.constant 6 : index
    %c0_42 = arith.constant 0 : index
    %c0_43 = arith.constant 0 : index
    %39 = vector.load %arg3[%c6, %c0_42, %c0_43] : memref<9x8x128xbf16, #tpu.memory_space<vmem>>, vector<1x8x128xbf16>
    %40 = vector.shape_cast %39 : vector<1x8x128xbf16> to vector<8x128xbf16>
    %cst_44 = arith.constant dense<0.000000e+00> : vector<320x128xf32>
    %41 = tpu.matmul %38, %40, %cst_44 {dimension_numbers = #tpu.dot_dimension_numbers<[1], [0], [0], [1], [0, 0, 1, 1], [], []>} : vector<320x8xbf16>, vector<8x128xbf16>, vector<320x128xf32> -> vector<320x128xf32>
    %42 = arith.addf %36, %41 : vector<320x128xf32>
    %c0_45 = arith.constant 0 : index
    %c0_46 = arith.constant 0 : index
    %c65 = arith.constant 65 : index
    %c0_47 = arith.constant 0 : index
    %43 = vector.load %arg2[%c0_45, %c0_46, %c65, %c0_47] : memref<1x1x416x8xbf16, #tpu.memory_space<vmem>>, vector<1x1x320x8xbf16>
    %44 = vector.shape_cast %43 : vector<1x1x320x8xbf16> to vector<320x8xbf16>
    %c7 = arith.constant 7 : index
    %c0_48 = arith.constant 0 : index
    %c0_49 = arith.constant 0 : index
    %45 = vector.load %arg3[%c7, %c0_48, %c0_49] : memref<9x8x128xbf16, #tpu.memory_space<vmem>>, vector<1x8x128xbf16>
    %46 = vector.shape_cast %45 : vector<1x8x128xbf16> to vector<8x128xbf16>
    %cst_50 = arith.constant dense<0.000000e+00> : vector<320x128xf32>
    %47 = tpu.matmul %44, %46, %cst_50 {dimension_numbers = #tpu.dot_dimension_numbers<[1], [0], [0], [1], [0, 0, 1, 1], [], []>} : vector<320x8xbf16>, vector<8x128xbf16>, vector<320x128xf32> -> vector<320x128xf32>
    %48 = arith.addf %42, %47 : vector<320x128xf32>
    %c0_51 = arith.constant 0 : index
    %c0_52 = arith.constant 0 : index
    %c66 = arith.constant 66 : index
    %c0_53 = arith.constant 0 : index
    %49 = vector.load %arg2[%c0_51, %c0_52, %c66, %c0_53] : memref<1x1x416x8xbf16, #tpu.memory_space<vmem>>, vector<1x1x320x8xbf16>
    %50 = vector.shape_cast %49 : vector<1x1x320x8xbf16> to vector<320x8xbf16>
    %c8 = arith.constant 8 : index
    %c0_54 = arith.constant 0 : index
    %c0_55 = arith.constant 0 : index
    %51 = vector.load %arg3[%c8, %c0_54, %c0_55] : memref<9x8x128xbf16, #tpu.memory_space<vmem>>, vector<1x8x128xbf16>
    %52 = vector.shape_cast %51 : vector<1x8x128xbf16> to vector<8x128xbf16>
    %cst_56 = arith.constant dense<0.000000e+00> : vector<320x128xf32>
    %53 = tpu.matmul %50, %52, %cst_56 {dimension_numbers = #tpu.dot_dimension_numbers<[1], [0], [0], [1], [0, 0, 1, 1], [], []>} : vector<320x8xbf16>, vector<8x128xbf16>, vector<320x128xf32> -> vector<320x128xf32>
    %54 = arith.addf %48, %53 : vector<320x128xf32>
    %c0_57 = arith.constant 0 : index
    %c0_58 = arith.constant 0 : index
    %55 = vector.load %arg5[%c0_57, %c0_58] : memref<1x128xf32, #tpu.memory_space<vmem>>, vector<1x128xf32>
    %56 = vector.shape_cast %55 : vector<1x128xf32> to vector<128xf32>
    %57 = vector.shape_cast %56 : vector<128xf32> to vector<1x128xf32>
    %58 = vector.broadcast %57 : vector<1x128xf32> to vector<320x128xf32>
    %59 = arith.mulf %54, %58 : vector<320x128xf32>
    %c0_59 = arith.constant 0 : index
    %c0_60 = arith.constant 0 : index
    %60 = vector.load %arg6[%c0_59, %c0_60] : memref<1x128xf32, #tpu.memory_space<vmem>>, vector<1x128xf32>
    %61 = vector.shape_cast %60 : vector<1x128xf32> to vector<128xf32>
    %62 = vector.shape_cast %61 : vector<128xf32> to vector<1x128xf32>
    %63 = vector.broadcast %62 : vector<1x128xf32> to vector<320x128xf32>
    %64 = arith.addf %59, %63 : vector<320x128xf32>
    %cst_61 = arith.constant 0.000000e+00 : f32
    %65 = vector.broadcast %cst_61 : f32 to vector<320x128xf32>
    %66 = arith.maximumf %64, %65 : vector<320x128xf32>
    %67 = vector.shape_cast %66 : vector<320x128xf32> to vector<10x32x128xf32>
    %68 = tpu.iota {dimensions = array<i32: 1>} : vector<10x32x1xi32>
    %69 = tpu.iota {dimensions = array<i32: 0>} : vector<10x32x1xi32>
    %c8_i32 = arith.constant 8 : i32
    %70 = arith.muli %arg1, %c8_i32 : i32
    %71 = vector.broadcast %70 : i32 to vector<10x32x1xi32>
    %72 = arith.addi %71, %69 : vector<10x32x1xi32>
    %c1_i32 = arith.constant 1 : i32
    %73 = vector.broadcast %c1_i32 : i32 to vector<10x32x1xi32>
    %74 = arith.subi %72, %73 : vector<10x32x1xi32>
    %c1_i32_62 = arith.constant 1 : i32
    %75 = vector.broadcast %c1_i32_62 : i32 to vector<10x32x1xi32>
    %76 = arith.cmpi sge, %68, %75 : vector<10x32x1xi32>
    %c16_i32 = arith.constant 16 : i32
    %77 = vector.broadcast %c16_i32 : i32 to vector<10x32x1xi32>
    %78 = arith.cmpi sle, %68, %77 : vector<10x32x1xi32>
    %79 = arith.andi %76, %78 : vector<10x32x1xi1>
    %c0_i32 = arith.constant 0 : i32
    %80 = vector.broadcast %c0_i32 : i32 to vector<10x32x1xi32>
    %81 = arith.cmpi sge, %74, %80 : vector<10x32x1xi32>
    %82 = arith.andi %79, %81 : vector<10x32x1xi1>
    %c16_i32_63 = arith.constant 16 : i32
    %83 = vector.broadcast %c16_i32_63 : i32 to vector<10x32x1xi32>
    %84 = arith.cmpi slt, %74, %83 : vector<10x32x1xi32>
    %85 = arith.andi %82, %84 : vector<10x32x1xi1>
    %cst_64 = arith.constant 0.000000e+00 : f32
    %86 = vector.shape_cast %85 : vector<10x32x1xi1> to vector<10x32x1xi1>
    %87 = vector.broadcast %86 : vector<10x32x1xi1> to vector<10x32x128xi1>
    %88 = vector.broadcast %cst_64 : f32 to vector<10x32x128xf32>
    %89 = arith.select %87, %67, %88 : vector<10x32x128xi1>, vector<10x32x128xf32>
    %90 = vector.shape_cast %89 : vector<10x32x128xf32> to vector<320x128xf32>
    %91 = arith.truncf %90 : vector<320x128xf32> to vector<320x128xbf16>
    %c0_65 = arith.constant 0 : index
    %c0_66 = arith.constant 0 : index
    %92 = vector.load %arg10[%c0_65, %c0_66] : memref<328x128xbf16, #tpu.memory_space<vmem>>, vector<320x128xbf16>
    tpu.vector_store %arg10[%c0_65, %c0_66], %91 {strides = array<i32>} : memref<328x128xbf16, #tpu.memory_space<vmem>>, vector<320x128xbf16>,
    %cst_67 = arith.constant 0.000000e+00 : f32
    %93 = vector.broadcast %cst_67 : f32 to vector<256x128xf32>
    %c0_68 = arith.constant 0 : index
    %c0_69 = arith.constant 0 : index
    %94 = vector.load %arg10[%c0_68, %c0_69] : memref<328x128xbf16, #tpu.memory_space<vmem>>, vector<256x128xbf16>
    %c0_70 = arith.constant 0 : index
    %c0_71 = arith.constant 0 : index
    %c0_72 = arith.constant 0 : index
    %95 = vector.load %arg4[%c0_70, %c0_71, %c0_72] : memref<9x128x128xbf16, #tpu.memory_space<vmem>>, vector<1x128x128xbf16>
    %96 = vector.shape_cast %95 : vector<1x128x128xbf16> to vector<128x128xbf16>
    %cst_73 = arith.constant dense<0.000000e+00> : vector<256x128xf32>
    %97 = tpu.matmul %94, %96, %cst_73 {dimension_numbers = #tpu.dot_dimension_numbers<[1], [0], [0], [1], [0, 0, 1, 1], [], []>} : vector<256x128xbf16>, vector<128x128xbf16>, vector<256x128xf32> -> vector<256x128xf32>
    %98 = arith.addf %93, %97 : vector<256x128xf32>
    %c1_74 = arith.constant 1 : index
    %c0_75 = arith.constant 0 : index
    %99 = vector.load %arg10[%c1_74, %c0_75] : memref<328x128xbf16, #tpu.memory_space<vmem>>, vector<256x128xbf16>
    %c1_76 = arith.constant 1 : index
    %c0_77 = arith.constant 0 : index
    %c0_78 = arith.constant 0 : index
    %100 = vector.load %arg4[%c1_76, %c0_77, %c0_78] : memref<9x128x128xbf16, #tpu.memory_space<vmem>>, vector<1x128x128xbf16>
    %101 = vector.shape_cast %100 : vector<1x128x128xbf16> to vector<128x128xbf16>
    %cst_79 = arith.constant dense<0.000000e+00> : vector<256x128xf32>
    %102 = tpu.matmul %99, %101, %cst_79 {dimension_numbers = #tpu.dot_dimension_numbers<[1], [0], [0], [1], [0, 0, 1, 1], [], []>} : vector<256x128xbf16>, vector<128x128xbf16>, vector<256x128xf32> -> vector<256x128xf32>
    %103 = arith.addf %98, %102 : vector<256x128xf32>
    %c2_80 = arith.constant 2 : index
    %c0_81 = arith.constant 0 : index
    %104 = vector.load %arg10[%c2_80, %c0_81] : memref<328x128xbf16, #tpu.memory_space<vmem>>, vector<256x128xbf16>
    %c2_82 = arith.constant 2 : index
    %c0_83 = arith.constant 0 : index
    %c0_84 = arith.constant 0 : index
    %105 = vector.load %arg4[%c2_82, %c0_83, %c0_84] : memref<9x128x128xbf16, #tpu.memory_space<vmem>>, vector<1x128x128xbf16>
    %106 = vector.shape_cast %105 : vector<1x128x128xbf16> to vector<128x128xbf16>
    %cst_85 = arith.constant dense<0.000000e+00> : vector<256x128xf32>
    %107 = tpu.matmul %104, %106, %cst_85 {dimension_numbers = #tpu.dot_dimension_numbers<[1], [0], [0], [1], [0, 0, 1, 1], [], []>} : vector<256x128xbf16>, vector<128x128xbf16>, vector<256x128xf32> -> vector<256x128xf32>
    %108 = arith.addf %103, %107 : vector<256x128xf32>
    %c32_86 = arith.constant 32 : index
    %c0_87 = arith.constant 0 : index
    %109 = vector.load %arg10[%c32_86, %c0_87] : memref<328x128xbf16, #tpu.memory_space<vmem>>, vector<256x128xbf16>
    %c3_88 = arith.constant 3 : index
    %c0_89 = arith.constant 0 : index
    %c0_90 = arith.constant 0 : index
    %110 = vector.load %arg4[%c3_88, %c0_89, %c0_90] : memref<9x128x128xbf16, #tpu.memory_space<vmem>>, vector<1x128x128xbf16>
    %111 = vector.shape_cast %110 : vector<1x128x128xbf16> to vector<128x128xbf16>
    %cst_91 = arith.constant dense<0.000000e+00> : vector<256x128xf32>
    %112 = tpu.matmul %109, %111, %cst_91 {dimension_numbers = #tpu.dot_dimension_numbers<[1], [0], [0], [1], [0, 0, 1, 1], [], []>} : vector<256x128xbf16>, vector<128x128xbf16>, vector<256x128xf32> -> vector<256x128xf32>
    %113 = arith.addf %108, %112 : vector<256x128xf32>
    %c33_92 = arith.constant 33 : index
    %c0_93 = arith.constant 0 : index
    %114 = vector.load %arg10[%c33_92, %c0_93] : memref<328x128xbf16, #tpu.memory_space<vmem>>, vector<256x128xbf16>
    %c4_94 = arith.constant 4 : index
    %c0_95 = arith.constant 0 : index
    %c0_96 = arith.constant 0 : index
    %115 = vector.load %arg4[%c4_94, %c0_95, %c0_96] : memref<9x128x128xbf16, #tpu.memory_space<vmem>>, vector<1x128x128xbf16>
    %116 = vector.shape_cast %115 : vector<1x128x128xbf16> to vector<128x128xbf16>
    %cst_97 = arith.constant dense<0.000000e+00> : vector<256x128xf32>
    %117 = tpu.matmul %114, %116, %cst_97 {dimension_numbers = #tpu.dot_dimension_numbers<[1], [0], [0], [1], [0, 0, 1, 1], [], []>} : vector<256x128xbf16>, vector<128x128xbf16>, vector<256x128xf32> -> vector<256x128xf32>
    %118 = arith.addf %113, %117 : vector<256x128xf32>
    %c34_98 = arith.constant 34 : index
    %c0_99 = arith.constant 0 : index
    %119 = vector.load %arg10[%c34_98, %c0_99] : memref<328x128xbf16, #tpu.memory_space<vmem>>, vector<256x128xbf16>
    %c5_100 = arith.constant 5 : index
    %c0_101 = arith.constant 0 : index
    %c0_102 = arith.constant 0 : index
    %120 = vector.load %arg4[%c5_100, %c0_101, %c0_102] : memref<9x128x128xbf16, #tpu.memory_space<vmem>>, vector<1x128x128xbf16>
    %121 = vector.shape_cast %120 : vector<1x128x128xbf16> to vector<128x128xbf16>
    %cst_103 = arith.constant dense<0.000000e+00> : vector<256x128xf32>
    %122 = tpu.matmul %119, %121, %cst_103 {dimension_numbers = #tpu.dot_dimension_numbers<[1], [0], [0], [1], [0, 0, 1, 1], [], []>} : vector<256x128xbf16>, vector<128x128xbf16>, vector<256x128xf32> -> vector<256x128xf32>
    %123 = arith.addf %118, %122 : vector<256x128xf32>
    %c64_104 = arith.constant 64 : index
    %c0_105 = arith.constant 0 : index
    %124 = vector.load %arg10[%c64_104, %c0_105] : memref<328x128xbf16, #tpu.memory_space<vmem>>, vector<256x128xbf16>
    %c6_106 = arith.constant 6 : index
    %c0_107 = arith.constant 0 : index
    %c0_108 = arith.constant 0 : index
    %125 = vector.load %arg4[%c6_106, %c0_107, %c0_108] : memref<9x128x128xbf16, #tpu.memory_space<vmem>>, vector<1x128x128xbf16>
    %126 = vector.shape_cast %125 : vector<1x128x128xbf16> to vector<128x128xbf16>
    %cst_109 = arith.constant dense<0.000000e+00> : vector<256x128xf32>
    %127 = tpu.matmul %124, %126, %cst_109 {dimension_numbers = #tpu.dot_dimension_numbers<[1], [0], [0], [1], [0, 0, 1, 1], [], []>} : vector<256x128xbf16>, vector<128x128xbf16>, vector<256x128xf32> -> vector<256x128xf32>
    %128 = arith.addf %123, %127 : vector<256x128xf32>
    %c65_110 = arith.constant 65 : index
    %c0_111 = arith.constant 0 : index
    %129 = vector.load %arg10[%c65_110, %c0_111] : memref<328x128xbf16, #tpu.memory_space<vmem>>, vector<256x128xbf16>
    %c7_112 = arith.constant 7 : index
    %c0_113 = arith.constant 0 : index
    %c0_114 = arith.constant 0 : index
    %130 = vector.load %arg4[%c7_112, %c0_113, %c0_114] : memref<9x128x128xbf16, #tpu.memory_space<vmem>>, vector<1x128x128xbf16>
    %131 = vector.shape_cast %130 : vector<1x128x128xbf16> to vector<128x128xbf16>
    %cst_115 = arith.constant dense<0.000000e+00> : vector<256x128xf32>
    %132 = tpu.matmul %129, %131, %cst_115 {dimension_numbers = #tpu.dot_dimension_numbers<[1], [0], [0], [1], [0, 0, 1, 1], [], []>} : vector<256x128xbf16>, vector<128x128xbf16>, vector<256x128xf32> -> vector<256x128xf32>
    %133 = arith.addf %128, %132 : vector<256x128xf32>
    %c66_116 = arith.constant 66 : index
    %c0_117 = arith.constant 0 : index
    %134 = vector.load %arg10[%c66_116, %c0_117] : memref<328x128xbf16, #tpu.memory_space<vmem>>, vector<256x128xbf16>
    %c8_118 = arith.constant 8 : index
    %c0_119 = arith.constant 0 : index
    %c0_120 = arith.constant 0 : index
    %135 = vector.load %arg4[%c8_118, %c0_119, %c0_120] : memref<9x128x128xbf16, #tpu.memory_space<vmem>>, vector<1x128x128xbf16>
    %136 = vector.shape_cast %135 : vector<1x128x128xbf16> to vector<128x128xbf16>
    %cst_121 = arith.constant dense<0.000000e+00> : vector<256x128xf32>
    %137 = tpu.matmul %134, %136, %cst_121 {dimension_numbers = #tpu.dot_dimension_numbers<[1], [0], [0], [1], [0, 0, 1, 1], [], []>} : vector<256x128xbf16>, vector<128x128xbf16>, vector<256x128xf32> -> vector<256x128xf32>
    %138 = arith.addf %133, %137 : vector<256x128xf32>
    %c0_122 = arith.constant 0 : index
    %c0_123 = arith.constant 0 : index
    %139 = vector.load %arg7[%c0_122, %c0_123] : memref<1x128xf32, #tpu.memory_space<vmem>>, vector<1x128xf32>
    %140 = vector.shape_cast %139 : vector<1x128xf32> to vector<128xf32>
    %141 = vector.shape_cast %140 : vector<128xf32> to vector<1x128xf32>
    %142 = vector.broadcast %141 : vector<1x128xf32> to vector<256x128xf32>
    %143 = arith.mulf %138, %142 : vector<256x128xf32>
    %c0_124 = arith.constant 0 : index
    %c0_125 = arith.constant 0 : index
    %144 = vector.load %arg8[%c0_124, %c0_125] : memref<1x128xf32, #tpu.memory_space<vmem>>, vector<1x128xf32>
    %145 = vector.shape_cast %144 : vector<1x128xf32> to vector<128xf32>
    %146 = vector.shape_cast %145 : vector<128xf32> to vector<1x128xf32>
    %147 = vector.broadcast %146 : vector<1x128xf32> to vector<256x128xf32>
    %148 = arith.addf %143, %147 : vector<256x128xf32>
    %cst_126 = arith.constant 0.000000e+00 : f32
    %149 = vector.broadcast %cst_126 : f32 to vector<256x128xf32>
    %150 = arith.maximumf %148, %149 : vector<256x128xf32>
    %151 = vector.shape_cast %150 : vector<256x128xf32> to vector<8x32x128xf32>
    %152 = vector.extract_strided_slice %151 {offsets = [0, 0, 0], sizes = [8, 16, 128], strides = [1, 1, 1]} : vector<8x32x128xf32> to vector<8x16x128xf32>
    %153 = arith.truncf %152 : vector<8x16x128xf32> to vector<8x16x128xbf16>
    %c0_127 = arith.constant 0 : index
    %c0_128 = arith.constant 0 : index
    %c0_129 = arith.constant 0 : index
    %c0_130 = arith.constant 0 : index
    %154 = vector.load %arg9[%c0_127, %c0_128, %c0_129, %c0_130] : memref<1x8x16x128xbf16, #tpu.memory_space<vmem>>, vector<1x8x16x128xbf16>
    %155 = vector.shape_cast %154 : vector<1x8x16x128xbf16> to vector<8x16x128xbf16>
    %156 = vector.shape_cast %153 : vector<8x16x128xbf16> to vector<1x8x16x128xbf16>
    tpu.vector_store %arg9[%c0_127, %c0_128, %c0_129, %c0_130], %156 {strides = array<i32>} : memref<1x8x16x128xbf16, #tpu.memory_space<vmem>>, vector<1x8x16x128xbf16>,
    return
  }
  func.func @transform_0(%arg0: i32, %arg1: i32) -> (i32, i32, i32, i32) {
    %c0_i32 = arith.constant 0 : i32
    %c0_i32_0 = arith.constant 0 : i32
    %c0_i32_1 = arith.constant 0 : i32
    return %arg0, %arg1, %c0_i32, %c0_i32_0 : i32, i32, i32, i32
  }
  func.func @transform_1(%arg0: i32, %arg1: i32) -> (i32, i32, i32) {
    %c0_i32 = arith.constant 0 : i32
    %c0_i32_0 = arith.constant 0 : i32
    %c0_i32_1 = arith.constant 0 : i32
    %c0_i32_2 = arith.constant 0 : i32
    return %c0_i32, %c0_i32_0, %c0_i32_1 : i32, i32, i32
  }
  func.func @transform_2(%arg0: i32, %arg1: i32) -> (i32, i32, i32) {
    %c0_i32 = arith.constant 0 : i32
    %c0_i32_0 = arith.constant 0 : i32
    %c0_i32_1 = arith.constant 0 : i32
    %c0_i32_2 = arith.constant 0 : i32
    return %c0_i32, %c0_i32_0, %c0_i32_1 : i32, i32, i32
  }
  func.func @transform_3(%arg0: i32, %arg1: i32) -> (i32, i32) {
    %c0_i32 = arith.constant 0 : i32
    %c0_i32_0 = arith.constant 0 : i32
    %c0_i32_1 = arith.constant 0 : i32
    return %c0_i32, %c0_i32_0 : i32, i32
  }
  func.func @transform_4(%arg0: i32, %arg1: i32) -> (i32, i32) {
    %c0_i32 = arith.constant 0 : i32
    %c0_i32_0 = arith.constant 0 : i32
    %c0_i32_1 = arith.constant 0 : i32
    return %c0_i32, %c0_i32_0 : i32, i32
  }
  func.func @transform_5(%arg0: i32, %arg1: i32) -> (i32, i32) {
    %c0_i32 = arith.constant 0 : i32
    %c0_i32_0 = arith.constant 0 : i32
    %c0_i32_1 = arith.constant 0 : i32
    return %c0_i32, %c0_i32_0 : i32, i32
  }
  func.func @transform_6(%arg0: i32, %arg1: i32) -> (i32, i32) {
    %c0_i32 = arith.constant 0 : i32
    %c0_i32_0 = arith.constant 0 : i32
    %c0_i32_1 = arith.constant 0 : i32
    return %c0_i32, %c0_i32_0 : i32, i32
  }
  func.func @transform_7(%arg0: i32, %arg1: i32) -> (i32, i32, i32, i32) {
    %c0_i32 = arith.constant 0 : i32
    %c0_i32_0 = arith.constant 0 : i32
    %c0_i32_1 = arith.constant 0 : i32
    return %arg0, %arg1, %c0_i32, %c0_i32_0 : i32, i32, i32, i32
  }
}

</mosaic_0001>

<bundles_post_ra>
// kernel: up_forward.1
= control target key start
LH: loop header
LB: loop body
LE: loop exit
PB: predicated region body
PF: predicated region fallthrough
CT: control target
= control target key end

     0   :  { %s10800_s24 = smov 0   ;;  %s10802_s25 = smov 0   ;;  %s14061_s0 = inlined_call_operand.vmem [shape: bf16[2,2,416,8], index: 0, kind: input, shape index: {}]   ;;  %s14062_s1 = inlined_call_operand.vmem [shape: bf16[9,8,128], index: 1, kind: input, shape index: {}]   ;;  %s14063_s2 = inlined_call_operand.vmem [shape: bf16[9,128,128], index: 2, kind: input, shape index: {}]   ;;  %s14064_s3 = inlined_call_operand.vmem [shape: f32[1,128], index: 3, kind: input, shape index: {}]   ;;  %s14065_s4 = inlined_call_operand.vmem [shape: f32[1,128], index: 4, kind: input, shape index: {}]   ;;  %s14066_s5 = inlined_call_operand.vmem [shape: f32[1,128], index: 5, kind: input, shape index: {}]   ;;  %s14067_s6 = inlined_call_operand.vmem [shape: f32[1,128], index: 6, kind: input, shape index: {}]   ;;  %s14068_s7 = inlined_call_operand.vmem [shape: bf16[2,16,16,128], index: 7, kind: output, shape index: {}]  }
   0x1   :  { %s10804_s26 = smov 0   ;;  %s10806_s27 = smov 0  }
   0x2   :  { %s10808_s28 = smov 0  }
   0x3 LB: > { %s26_s29 = sadd.s32 1, %s10749_s26  ;;  %s29_s30 = sadd.s32 1, %s10753_s27  ;;  %s10757_s28 = sphi %s10808_s28, %s17_s28   ;;  %s10753_s27 = sphi %s10806_s27, %s14288_s27   ;;  %s10749_s26 = sphi %s10804_s26, %s14287_s26   ;;  %s10745_s25 = sphi %s10802_s25, %s14286_s25   ;;  %s10741_s24 = sphi %s10800_s24, %s14285_s24  }
   0x4   : > { %p27_p0 = scmp.ge.s32.totalorder %s26_s29, 2  ;;  %p8302_p1 = scmp.ge.s32.totalorder %s10757_s28, 1 }
   0x5   : > { %p257_p2 = scmp.lt.s32.totalorder %s10757_s28, 5 }
   0x6   : > { %s14290_s29 = smov (%p27_p0, %s26_s29), 0  ;;  %s14292_s30 = smov (!%p27_p0, %s29_s30), %s10753_s27 }
   0x7   : > { %p258_p3 = pnand %p8302_p1, %p257_p2  ;;  %p31_p4 = scmp.ge.s32.totalorder %s14292_s30, 2 }
   0x9   : > { %s14294_s30 = smov (%p31_p4, %s14292_s30), 0  ;;  %261 = sbr.rel (%p258_p3) target bundleno = 1106 (0x452), region = 48 }
   0xe   : > { %v8308_v0 = vld [vmem:[%s14062_s1 + $0x4] sm:$0xf]  ;;  %vm692_vm0 = vcmask 1043456   ;;  %p298_p5 = scmp.lt.s32.totalorder %s10745_s25, 1  ;;  %p300_p6 = scmp.lt.s32.totalorder %s10741_s24, 1  ;;  %vm631_vm2 = vcmask 64512  }
   0xf   : > { %10389 = vmatprep.subr.msk.bf16.mxu0 %vm692_vm0, %v8308_v0  ;;  %10390 = vmatprep.subr.msk.bf16.mxu1 %vm692_vm0, %v8308_v0  ;;  %v694_v1 = vsel %vm692_vm0, %v8308_v0, 0  ;;  %v8370_v2 = vld [vmem:[%s14062_s1 + $0x8] sm:$0xf]  ;;  %v359_v3 = vld [vmem:[%s14062_s1] sm:$0xf]  ;;  %vm1131_vm3 = vcmask 1046528  }
  0x10   : > { %9578 = vmatpush3.bf16.msra.mxu0 %v694_v1  ;;  %10388 = vmatpush3.bf16.msra.mxu1 %v694_v1  ;;  %s14296_s25 = smov (!%p298_p5, %s10745_s25), 1  ;;  %vm466_vm1 = vsmask.f32 7424  ;;  %v1234_v8 = vsel %vm692_vm0, %v8370_v2, 0  ;;  %v930_v16 = vsel %vm692_vm0, %v359_v3, 0  ;;  %s12174_s22 = sshll.u32 %s10741_s24, 3 }
  0x11   : > { %s301_s14 = scalar_select %p300_p6, %s10741_s24, 1  ;;  %10392 = vmatprep.subr.msk.bf16.mxu0 %vm692_vm0, %v8370_v2  ;;  %10391 = vmatprep.subr.msk.bf16.mxu1 %vm692_vm0, %v359_v3  ;;  %v10892_v33 = vld [vmem:[%s14062_s1 + $0x10] sm:$0xf]  ;;  %v8392_v51 = vld [vmem:[%s14062_s1 + $0xc] sm:$0xf] }
  0x12   : > { %s10400_s15 = smul.u32 104, %s14296_s25  ;;  %p310_p7 = scmp.lt.s32.totalorder %s12174_s22, 15 }
  0x13   : > { %s10399_s16 = smul.u32 52, %s301_s14  ;;  %s8306_s13 = sshll.u32 %s14296_s25, 5 }
  0x15   : > { %s304_s17 = sadd.s32 %s10400_s15, %s10399_s16 }
  0x16   : > { %s8303_s18 = sshll.u32 %s304_s17, 2 }
  0x17   : > { %s10854_s21 = scalar_lea.vmem %s14061_s0, %s8303_s18 }
  0x18   : > { %v319_v4 = vld [vmem:[%s10854_s21] sm:$0xf]  ;;  %v10858_v5 = vld [vmem:[%s10854_s21 + $0x4] sm:$0xf]  ;;  %v10862_v7 = vld [vmem:[%s10854_s21 + $0x8] sm:$0xff]  }
  0x19   : > { %v8309_v6 = vcombine.low %v319_v4, %v10858_v5  ;;  %v475_v11 = vshll.u32 %v10862_v7, 16  ;;  %v479_v12 = vshrl.u32 %v10862_v7, 16  ;;  %v10868_v13 = vld [vmem:[%s10854_s21 + $0x90] sm:$0xff]   ;;  %v10871_v14 = vld [vmem:[%s10854_s21 + $0x98] sm:$0xff]   ;;  %v10898_v37 = vld [vmem:[%s10854_s21 + $0x20] sm:$0xff]   ;;  %v1133_v61 = vrot.slane %v10862_v7, 1 }
  0x1a   : > { %v10874_v15 = vld [vmem:[%s10854_s21 + $0x10] sm:$0xff]   ;;  %v611_v19 = vshll.u32 %v10868_v13, 16  ;;  %v615_v20 = vshrl.u32 %v10868_v13, 16  ;;  %v619_v21 = vshll.u32 %v10871_v14, 16  ;;  %v623_v22 = vshrl.u32 %v10871_v14, 16  ;;  %v10886_v28 = vld [vmem:[%s10854_s21 + $0x18] sm:$0xff]  }
  0x1b   : > { %v468_v9 = vshrl.u32 %v8309_v6, 16  ;;  %v470_v10 = vshll.u32 %v8309_v6, 16  ;;  %v477_v18 = vrot.slane %v475_v11, 1  ;;  %v483_v23 = vshll.u32 %v10874_v15, 16  ;;  %v10902_v39 = vld [vmem:[%s10854_s21 + $0x28] sm:$0xff]   ;;  %v10911_v48 = vld [vmem:[%s10854_s21 + $0x30] sm:$0xff]  }
  0x1c   : > { %v10447_v24 = vld [vmem:[%s10854_s21 + $0xa0] ss:$0 sps:$4 sm:$0x11]   ;;  %v10883_v27 = vrot.slane %v611_v19, 1  ;;  %v621_v29 = vrot.slane %v619_v21, 1  ;;  %v487_v32 = vshrl.u32 %v10874_v15, 16 }
  0x1d   : > { %v472_v17 = vrot.slane %v470_v10, 1  ;;  %v481_v26 = vor.u32 %v479_v12, %v477_v18  ;;  %v485_v30 = vrot.slane %v483_v23, 1  ;;  %v627_v31 = vshll.u32 %v10447_v24, 16  ;;  %v10922_v55 = vld [vmem:[%s10854_s21 + $0x38] sm:$0xff]   ;;  %v10937_v1 = vld [vmem:[%s10854_s21 + $0x40] sm:$0xff]  }
  0x1e   : > { %v617_v35 = vor.u32 %v615_v20, %v10883_v27  ;;  %v491_v36 = vshll.u32 %v10886_v28, 16  ;;  %v495_v38 = vshrl.u32 %v10886_v28, 16  ;;  %v625_v40 = vor.u32 %v623_v22, %v621_v29  ;;  %v10959_v20 = vld [vmem:[%s10854_s21 + $0x50] sm:$0xff]   ;;  %v10963_v22 = vld [vmem:[%s10854_s21 + $0x58] sm:$0xff]   ;;  %v1125_v23 = vld [vmem:[%s10854_s21] sm:$0xe] }
  0x1f   : > { %v473_v25 = vor.u32 %v472_v17, %v468_v9  ;;  %v486_v41 = vsel %vm466_vm1, %v481_v26, %v485_v30  ;;  %v629_v42 = vrot.slane %v627_v31, 1  ;;  %v489_v43 = vor.u32 %v487_v32, %v485_v30  ;;  %v10973_v30 = vld [vmem:[%s10854_s21 + $0x60] sm:$0xff]  }
  0x20   : > { %v622_v44 = vsel %vm466_vm1, %v617_v35, %v621_v29  ;;  %v493_v45 = vrot.slane %v491_v36, 1  ;;  %v499_v46 = vshll.u32 %v10898_v37, 16  ;;  %v503_v47 = vshrl.u32 %v10898_v37, 16 }
  0x21   : > { %v478_v34 = vsel %vm466_vm1, %v473_v25, %v477_v18  ;;  %9615 = vmatprep.mubr.msk.bf16.mxu1 %vm631_vm2, %v622_v44  ;;  %v630_v49 = vsel %vm466_vm1, %v625_v40, %v629_v42  ;;  %v507_v50 = vshll.u32 %v10902_v39, 16  ;;  %v515_v58 = vshll.u32 %v10911_v48, 16 }
  0x22   : > { %9579 = vmatprep.mubr.msk.bf16.mxu0 %vm631_vm2, %v478_v34  ;;  %9616 = vmatmul.mubr.msk.bf16.vlgmr.msra.gmra.mxu1 %vm631_vm2, %v630_v49  ;;  %v494_v52 = vsel %vm466_vm1, %v489_v43, %v493_v45  ;;  %v497_v53 = vor.u32 %v495_v38, %v493_v45  ;;  %v501_v54 = vrot.slane %v499_v46, 1  ;;  %v511_v60 = vshrl.u32 %v10902_v39, 16 }
  0x23   : > { %9580 = vmatmul.mubr.msk.bf16.vlgmr.msra.gmra.mxu0 %vm631_vm2, %v486_v41  ;;  %9620 = vmatpush3.bf16.msra.mxu1 %v930_v16  ;;  %v509_v56 = vrot.slane %v507_v50, 1  ;;  %v519_v63 = vshrl.u32 %v10911_v48, 16  ;;  %v523_v0 = vshll.u32 %v10922_v55, 16  ;;  %v1135_v2 = vrot.slane %v10874_v15, 1  ;;  %v11002_v50 = vld [vmem:[%s10854_s21 + $0x68] sm:$0xff]  }
  0x24   : > { %9662 = vmatpush3.bf16.msra.mxu0 %v1234_v8  ;;  %9583 = vmatprep.mubr.msk.bf16.mxu0 %vm631_vm2, %v494_v52  ;;  %v505_v57 = vor.u32 %v503_v47, %v501_v54  ;;  %v502_v59 = vsel %vm466_vm1, %v497_v53, %v501_v54  ;;  %v517_v3 = vrot.slane %v515_v58, 1  ;;  %v1672_v4 = vsel %vm692_vm0, %v8392_v51, 0  ;;  %v10944_v8 = vld [vmem:[%s10854_s21 + $0x48] sm:$0xff]  }
  0x25   : > { %10394 = vmatprep.subr.msk.bf16.mxu0 %vm692_vm0, %v10892_v33  ;;  %9621 = vmatprep.mubr.msk.bf16.mxu1 %vm631_vm2, %v8309_v6  ;;  %v513_v6 = vor.u32 %v511_v60, %v509_v56  ;;  %v10947_v9 = vsel %vm1131_vm3, %v1133_v61, %v1135_v2  ;;  %v525_v11 = vrot.slane %v523_v0, 1  ;;  %v531_v12 = vshll.u32 %v10937_v1, 16 }
  0x26   : > { %10393 = vmatprep.subr.msk.bf16.mxu1 %vm692_vm0, %v8392_v51  ;;  %v510_v62 = vsel %vm466_vm1, %v505_v57, %v509_v56  ;;  %v521_v10 = vor.u32 %v519_v63, %v517_v3  ;;  %v527_v16 = vshrl.u32 %v10922_v55, 16  ;;  %v535_v18 = vshrl.u32 %v10937_v1, 16  ;;  %v11005_v51 = vld [vmem:[%s10854_s21 + $0x70] sm:$0xff]  }
  0x27   : > { %v518_v17 = vsel %vm466_vm1, %v513_v6, %v517_v3  ;;  %v539_v19 = vshll.u32 %v10944_v8, 16  ;;  %v533_v21 = vrot.slane %v531_v12, 1  ;;  %v543_v26 = vshrl.u32 %v10944_v8, 16  ;;  %v11048_v12 = vld [vmem:[%s10854_s21 + $0x88] sm:$0xff]  }
  0x28   : > { %v547_v29 = vshll.u32 %v10959_v20, 16  ;;  %v8371_v31 = vcombine.low %v1125_v23, %v10858_v5  ;;  %v1137_v32 = vrot.slane %v10886_v28, 1  ;;  %v551_v34 = vshrl.u32 %v10959_v20, 16 }
  0x29   : > { %v537_v24 = vor.u32 %v535_v18, %v533_v21  ;;  %v541_v25 = vrot.slane %v539_v19, 1  ;;  %v555_v35 = vshll.u32 %v10963_v22, 16  ;;  %v559_v36 = vshrl.u32 %v10963_v22, 16 }
  0x2a   : > { %9622 = vmatmul.mubr.msk.bf16.vlgmr.msra.gmra.mxu1 %vm631_vm2, %v10862_v7  ;;  %v526_v7 = vsel %vm466_vm1, %v521_v10, %v525_v11  ;;  %v1139_v38 = vrot.slane %v10898_v37, 1  ;;  %v1132_v41 = vrot.slane %v8371_v31, 1  ;;  %v10985_v5 = vsel %vm1131_vm3, %v1135_v2, %v1137_v32  ;;  %v11029_v2 = vld [vmem:[%s10854_s21 + $0x78] sm:$0xff]   ;;  %v11041_v10 = vld [vmem:[%s10854_s21 + $0x80] sm:$0xff]  }
  0x2b   : > { %9584 = vmatmul.mubr.msk.bf16.gmra.mxu0 %vm631_vm2, %v502_v59  ;;  %9625 = vmatprep.mubr.msk.bf16.mxu1 %vm631_vm2, %v10874_v15  ;;  %v529_v15 = vor.u32 %v527_v16, %v525_v11  ;;  %v542_v42 = vsel %vm466_vm1, %v537_v24, %v541_v25  ;;  %v549_v43 = vrot.slane %v547_v29, 1  ;;  %v1143_v45 = vrot.slane %v10911_v48, 1 }
  0x2c   : > { %9587 = vmatprep.mubr.msk.bf16.mxu0 %vm631_vm2, %v510_v62  ;;  %9704 = vmatpush3.bf16.msra.mxu1 %v1672_v4  ;;  %v10990_v44 = vsel %vm1131_vm3, %v1137_v32, %v1139_v38  ;;  %v563_v46 = vshll.u32 %v10973_v30, 16  ;;  %v1145_v49 = vrot.slane %v10922_v55, 1  ;;  %v1147_v53 = vrot.slane %v10937_v1, 1 }
  0x2d   : > { %v534_v40 = vsel %vm466_vm1, %v529_v15, %v533_v21  ;;  %v1149_v54 = vrot.slane %v10944_v8, 1  ;;  %v545_v56 = vor.u32 %v543_v26, %v541_v25  ;;  %v1151_v58 = vrot.slane %v10959_v20, 1 }
  0x2e   : > { %v11014_v57 = vsel %vm1131_vm3, %v1143_v45, %v1145_v49  ;;  %v1153_v59 = vrot.slane %v10963_v22, 1  ;;  %v557_v60 = vrot.slane %v555_v35, 1  ;;  %v1155_v63 = vrot.slane %v10973_v30, 1  ;;  %v8475_v35 = vld [vmem:[%s14062_s1 + $0x14] sm:$0xf] }
  0x2f   : > { %v11023_v62 = vsel %vm1131_vm3, %v1147_v53, %v1149_v54  ;;  %v553_v0 = vor.u32 %v551_v34, %v549_v43  ;;  %v11032_v3 = vsel %vm1131_vm3, %v1149_v54, %v1151_v58  ;;  %v1157_v6 = vrot.slane %v11002_v50, 1  ;;  %10395 = vmatprep.subr.msk.bf16.mxu1 %vm692_vm0, %v8475_v35 }
  0x30   : > { %v11035_v4 = vsel %vm1131_vm3, %v1151_v58, %v1153_v59  ;;  %v11044_v11 = vsel %vm1131_vm3, %v1153_v59, %v1155_v63  ;;  %v550_v18 = vsel %vm466_vm1, %v545_v56, %v549_v43  ;;  %v571_v19 = vshll.u32 %v11002_v50, 16 }
  0x31   : > { %v11051_v16 = vsel %vm1131_vm3, %v1155_v63, %v1157_v6  ;;  %v558_v21 = vsel %vm466_vm1, %v553_v0, %v557_v60  ;;  %v567_v15 = vshrl.u32 %v10973_v30, 16  ;;  %v1165_v24 = vrot.slane %v11048_v12, 1 }
  0x32   : > { %9626 = vmatmul.mubr.msk.bf16.gmra.mxu1 %vm631_vm2, %v10886_v28  ;;  %v1141_v28 = vrot.slane %v10902_v39, 1  ;;  %v565_v26 = vrot.slane %v563_v46, 1  ;;  %v561_v31 = vor.u32 %v559_v36, %v557_v60  ;;  %v573_v32 = vrot.slane %v571_v19, 1  ;;  %v11213_v19 = vld [vmem:[%s10854_s21 + $0x18] sm:$0xff]  }
  0x33   : > { %9588 = vmatmul.mubr.msk.bf16.gmra.mxu0 %vm631_vm2, %v518_v17  ;;  %9629 = vmatprep.mubr.msk.bf16.mxu1 %vm631_vm2, %v10898_v37  ;;  %v10995_v37 = vsel %vm1131_vm3, %v1132_v41, %v1133_v61  ;;  %v11020_v61 = vsel %vm1131_vm3, %v1145_v49, %v1147_v53  ;;  %v1161_v17 = vrot.slane %v11029_v2, 1  ;;  %v575_v36 = vshrl.u32 %v11002_v50, 16 }
  0x34   : > { %9591 = vmatprep.mubr.msk.bf16.mxu0 %vm631_vm2, %v526_v7  ;;  %v10998_v47 = vsel %vm1131_vm3, %v1139_v38, %v1141_v28  ;;  %v11008_v52 = vsel %vm1131_vm3, %v1141_v28, %v1143_v45  ;;  %v1163_v7 = vrot.slane %v11041_v10, 1  ;;  %v569_v34 = vor.u32 %v567_v15, %v565_v26 }
  0x35   : > { %v579_v38 = vshll.u32 %v11005_v51, 16  ;;  %v587_v28 = vshll.u32 %v11029_v2, 16  ;;  %v595_v46 = vshll.u32 %v11041_v10, 16  ;;  %v591_v53 = vshrl.u32 %v11029_v2, 16 }
  0x36   : > { %v11067_v25 = vsel %vm1131_vm3, %v1161_v17, %v1163_v7  ;;  %v11073_v29 = vsel %vm1131_vm3, %v1163_v7, %v1165_v24  ;;  %v574_v41 = vsel %vm466_vm1, %v569_v34, %v573_v32  ;;  %v599_v56 = vshrl.u32 %v11041_v10, 16 }
  0x37   : > { %v589_v45 = vrot.slane %v587_v28, 1  ;;  %v603_v58 = vshll.u32 %v11048_v12, 16  ;;  %v607_v0 = vshrl.u32 %v11048_v12, 16  ;;  %v10480_v28 = vld [vmem:[%s10854_s21 + $0x90] sm:$0xff]  }
  0x39   : > { %v593_v59 = vor.u32 %v591_v53, %v589_v45  ;;  %v605_v60 = vrot.slane %v603_v58, 1 }
  0x3a   : > { %9630 = vmatmul.mubr.msk.bf16.gmra.mxu1 %vm631_vm2, %v10902_v39  ;;  %v1159_v39 = vrot.slane %v11005_v51, 1 }
  0x3b   : > { %9592 = vmatmul.mubr.msk.bf16.gmra.mxu0 %vm631_vm2, %v534_v40  ;;  %9633 = vmatprep.mubr.msk.bf16.mxu1 %vm631_vm2, %v10911_v48  ;;  %v566_v40 = vsel %vm466_vm1, %v561_v31, %v565_v26  ;;  %v11226_v26 = vld [vmem:[%s10854_s21 + $0x20] sm:$0xff]   ;;  %v11231_v31 = vld [vmem:[%s10854_s21 + $0x28] sm:$0xff]  }
  0x3c   : > { %9595 = vmatprep.mubr.msk.bf16.mxu0 %vm631_vm2, %v542_v42  ;;  %v11057_v48 = vsel %vm1131_vm3, %v1157_v6, %v1159_v39  ;;  %v11063_v23 = vsel %vm1131_vm3, %v1159_v39, %v1161_v17  ;;  %v581_v42 = vrot.slane %v579_v38, 1  ;;  %v609_v39 = vor.u32 %v607_v0, %v605_v60  ;;  %v10479_v38 = vld [vmem:[%s10854_s21 + $0x88] sm:$0xff]  }
  0x3d   : > { %v1167_v17 = vrot.slane %v10868_v13, 1  ;;  %v2069_v34 = vshll.u32 %v11226_v26, 16 }
  0x3f   : > { %v1168_v7 = vsel %vm1131_vm3, %v1165_v24, %v1167_v17 }
  0x42   : > { %9634 = vmatmul.mubr.msk.bf16.gmra.mxu1 %vm631_vm2, %v10922_v55  ;;  %v583_v55 = vshrl.u32 %v11005_v51, 16 }
  0x43   : > { %9596 = vmatmul.mubr.msk.bf16.gmra.mxu0 %vm631_vm2, %v550_v18  ;;  %9637 = vmatprep.mubr.msk.bf16.mxu1 %vm631_vm2, %v10937_v1  ;;  %v577_v1 = vor.u32 %v575_v36, %v573_v32  ;;  %v1169_v18 = vrot.slane %v10871_v14, 1  ;;  %v2073_v36 = vshrl.u32 %v11226_v26, 16 }
  0x44   : > { %9599 = vmatprep.mubr.msk.bf16.mxu0 %vm631_vm2, %v558_v21  ;;  %v585_v43 = vor.u32 %v583_v55, %v581_v42  ;;  %v10477_v21 = vld [vmem:[%s10854_s21 + $0x78] sm:$0xff]  }
  0x45   : > { %v582_v49 = vsel %vm466_vm1, %v577_v1, %v581_v42  ;;  %v2071_v42 = vrot.slane %v2069_v34, 1  ;;  %v11245_v1 = vld [vmem:[%s10854_s21 + $0x30] sm:$0xff]  }
  0x46   : > { %v590_v54 = vsel %vm466_vm1, %v585_v43, %v589_v45  ;;  %v2085_v58 = vshll.u32 %v11245_v1, 16 }
  0x4a   : > { %9638 = vmatmul.mubr.msk.bf16.gmra.mxu1 %vm631_vm2, %v10944_v8  ;;  %v597_v8 = vrot.slane %v595_v46, 1  ;;  %v11249_v46 = vld [vmem:[%s10854_s21 + $0x38] sm:$0xff]  }
  0x4b   : > { %9600 = vmatmul.mubr.msk.bf16.gmra.mxu0 %vm631_vm2, %v566_v40  ;;  %9641 = vmatprep.mubr.msk.bf16.mxu1 %vm631_vm2, %v10959_v20  ;;  %v2065_v40 = vshrl.u32 %v11213_v19, 16 }
  0x4c   : > { %9603 = vmatprep.mubr.msk.bf16.mxu0 %vm631_vm2, %v574_v41  ;;  %v601_v20 = vor.u32 %v599_v56, %v597_v8  ;;  %v598_v63 = vsel %vm466_vm1, %v593_v59, %v597_v8  ;;  %v2077_v41 = vshll.u32 %v11231_v31, 16  ;;  %v2081_v56 = vshrl.u32 %v11231_v31, 16  ;;  %v10485_v59 = vld [vmem:[%s10854_s21 + $0xa0] sm:$0xff]  }
  0x4e   : > { %v606_v6 = vsel %vm466_vm1, %v601_v20, %v605_v60  ;;  %v2079_v45 = vrot.slane %v2077_v41, 1  ;;  %v2089_v20 = vshrl.u32 %v11245_v1, 16  ;;  %v2093_v60 = vshll.u32 %v11249_v46, 16 }
  0x52   : > { %9642 = vmatmul.mubr.msk.bf16.gmra.mxu1 %vm631_vm2, %v10963_v22  ;;  %v614_v22 = vsel %vm466_vm1, %v609_v39, %v10883_v27  ;;  %v11131_v27 = vld [vmem:[%s14062_s1 + $0x18] sm:$0xf]  ;;  %v2087_v39 = vrot.slane %v2085_v58, 1 }
  0x53   : > { %9604 = vmatmul.mubr.msk.bf16.gmra.mxu0 %vm631_vm2, %v582_v49  ;;  %9645 = vmatprep.mubr.msk.bf16.mxu1 %vm631_vm2, %v10973_v30  ;;  %v2278_v30 = vsel %vm692_vm0, %v10892_v33, 0  ;;  %v10464_v33 = vld [vmem:[%s10854_s21 + $0x10] sm:$0xff]   ;;  %v2075_v49 = vor.u32 %v2073_v36, %v2071_v42  ;;  %v3059_v53 = vsel %vm692_vm0, %v11131_v27, 0 }
  0x54   : > { %9607 = vmatprep.mubr.msk.bf16.mxu0 %vm631_vm2, %v590_v54  ;;  %v10483_v54 = vld [vmem:[%s10854_s21 + $0x98] sm:$0xff]  }
  0x55   : > { %v2080_v0 = vsel %vm466_vm1, %v2075_v49, %v2079_v45 }
  0x5a   : > { %9646 = vmatmul.mubr.msk.bf16.gmra.mxu1 %vm631_vm2, %v11002_v50  ;;  %v10469_v50 = vld [vmem:[%s10854_s21 + $0x38] sm:$0xff]  }
  0x5b   : > { %9608 = vmatmul.mubr.msk.bf16.gmra.mxu0 %vm631_vm2, %v598_v63  ;;  %9649 = vmatprep.mubr.msk.bf16.mxu1 %vm631_vm2, %v11005_v51  ;;  %v11172_v51 = vld [vmem:[%s14062_s1 + $0x1c] sm:$0xf]  ;;  %v2513_v63 = vld [vmem:[%s10854_s21 + $0x10] sm:$0xe] }
  0x5c   : > { %9611 = vmatprep.mubr.msk.bf16.mxu0 %vm631_vm2, %v606_v6  ;;  %v11267_v6 = vld [vmem:[%s14062_s1 + $0x20] sm:$0xf] }
  0x62   : > { %9650 = vmatmul.mubr.msk.bf16.gmra.mxu1 %vm631_vm2, %v11029_v2  ;;  %v10474_v2 = vld [vmem:[%s10854_s21 + $0x60] sm:$0xff]  }
  0x63   : > { %9612 = vmatmul.mubr.msk.bf16.gmra.mxu0 %vm631_vm2, %v614_v22  ;;  %9653 = vmatprep.mubr.msk.bf16.mxu1 %vm631_vm2, %v11041_v10  ;;  %v10475_v10 = vld [vmem:[%s10854_s21 + $0x68] sm:$0xff]  }
  0x64   : > { %9663 = vmatprep.mubr.msk.bf16.mxu0 %vm631_vm2, %v10995_v37  ;;  %v2621_v37 = vsel %vm692_vm0, %v8475_v35, 0 }
  0x6a   : > { %9654 = vmatmul.mubr.msk.bf16.gmra.mxu1 %vm631_vm2, %v11048_v12 }
  0x6b   : > { %9664 = vmatmul.mubr.msk.bf16.vlgmr.msra.gmra.mxu0 %vm631_vm2, %v10947_v9  ;;  %9657 = vmatprep.mubr.msk.bf16.mxu1 %vm631_vm2, %v10868_v13  ;;  %v10465_v9 = vld [vmem:[%s10854_s21 + $0x18] sm:$0xff]   ;;  %v2061_v13 = vshll.u32 %v11213_v19, 16 }
  0x6c   : > { %9746 = vmatpush3.bf16.msra.mxu0 %v2278_v30  ;;  %9667 = vmatprep.mubr.msk.bf16.mxu0 %vm631_vm2, %v10985_v5  ;;  %v10466_v5 = vld [vmem:[%s10854_s21 + $0x20] sm:$0xff]  }
  0x6d   : > { %10396 = vmatprep.subr.msk.bf16.mxu0 %vm692_vm0, %v11131_v27  ;;  %v2063_v24 = vrot.slane %v2061_v13, 1  ;;  %v11272_v30 = vld [vmem:[%s10854_s21 + $0x40] sm:$0xff]   ;;  %v2083_v27 = vor.u32 %v2081_v56, %v2079_v45  ;;  %v11340_v56 = vld [vmem:[%s10854_s21 + $0x78] sm:$0xff]  }
  0x6e   : > { %v2530_v58 = vrot.slane %v11272_v30, 1 }
  0x6f   : > { %v2067_v43 = vor.u32 %v2065_v40, %v2063_v24  ;;  %v2528_v40 = vrot.slane %v11249_v46, 1 }
  0x71   : > { %v2072_v8 = vsel %vm466_vm1, %v2067_v43, %v2071_v42 }
  0x72   : > { %9658 = vmatmul.mubr.msk.bf16.gmra.mxu1 %vm631_vm2, %v10871_v14  ;;  %v1170_v14 = vsel %vm1131_vm3, %v1167_v17, %v1169_v18  ;;  %v11297_v17 = vld [vmem:[%s10854_s21 + $0x58] sm:$0xff]  }
  0x73   : > { %9668 = vmatmul.mubr.msk.bf16.gmra.mxu0 %vm631_vm2, %v10990_v44  ;;  %9705 = vmatprep.mubr.msk.bf16.mxu1 %vm631_vm2, %v10464_v33  ;;  %v10467_v44 = vld [vmem:[%s10854_s21 + $0x28] sm:$0xff]   ;;  %v2095_v33 = vrot.slane %v2093_v60, 1  ;;  %v2129_v41 = vshrl.u32 %v11297_v17, 16 }
  0x74   : > { %9671 = vmatprep.mubr.msk.bf16.mxu0 %vm631_vm2, %v10998_v47  ;;  %v10468_v47 = vld [vmem:[%s10854_s21 + $0x30] sm:$0xff]  }
  0x7a   : > { %9706 = vmatmul.mubr.msk.bf16.vlgmr.msra.gmra.mxu1 %vm631_vm2, %v10465_v9  ;;  %v11276_v9 = vld [vmem:[%s10854_s21 + $0x48] sm:$0xff]  }
  0x7b   : > { %9672 = vmatmul.mubr.msk.bf16.gmra.mxu0 %vm631_vm2, %v11008_v52  ;;  %9709 = vmatprep.mubr.msk.bf16.mxu1 %vm631_vm2, %v10466_v5  ;;  %v10470_v52 = vld [vmem:[%s10854_s21 + $0x40] sm:$0xff]   ;;  %v2091_v5 = vor.u32 %v2089_v20, %v2087_v39 }
  0x7c   : > { %9675 = vmatprep.mubr.msk.bf16.mxu0 %vm631_vm2, %v11014_v57  ;;  %9788 = vmatpush3.bf16.msra.mxu1 %v2621_v37  ;;  %v10471_v57 = vld [vmem:[%s10854_s21 + $0x48] sm:$0xff]   ;;  %v2520_v37 = vrot.slane %v11213_v19, 1  ;;  %v2522_v19 = vrot.slane %v11226_v26, 1 }
  0x7d   : > { %10397 = vmatprep.subr.msk.bf16.mxu1 %vm692_vm0, %v11172_v51 }
  0x82   : > { %9710 = vmatmul.mubr.msk.bf16.gmra.mxu1 %vm631_vm2, %v10467_v44 }
  0x83   : > { %9676 = vmatmul.mubr.msk.bf16.gmra.mxu0 %vm631_vm2, %v11020_v61  ;;  %9713 = vmatprep.mubr.msk.bf16.mxu1 %vm631_vm2, %v10468_v47  ;;  %v10472_v61 = vld [vmem:[%s10854_s21 + $0x50] sm:$0xff]   ;;  %v2101_v47 = vshll.u32 %v11272_v30, 16 }
  0x84   : > { %9679 = vmatprep.mubr.msk.bf16.mxu0 %vm631_vm2, %v11023_v62  ;;  %v10473_v62 = vld [vmem:[%s10854_s21 + $0x58] sm:$0xff]  }
  0x8a   : > { %9714 = vmatmul.mubr.msk.bf16.gmra.mxu1 %vm631_vm2, %v10469_v50  ;;  %v10487_v50 = vld [vmem:[%s10854_s21 + $0xa8] sm:$0xff]  }
  0x8b   : > { %9680 = vmatmul.mubr.msk.bf16.gmra.mxu0 %vm631_vm2, %v11032_v3  ;;  %9717 = vmatprep.mubr.msk.bf16.mxu1 %vm631_vm2, %v10470_v52  ;;  %v1907_v3 = vld [vmem:[%s10854_s21 + $0x10] sm:$0xf]  ;;  %v2088_v52 = vsel %vm466_vm1, %v2083_v27, %v2087_v39  ;;  %v2157_v39 = vshll.u32 %v11340_v56, 16 }
  0x8c   : > { %9683 = vmatprep.mubr.msk.bf16.mxu0 %vm631_vm2, %v11035_v4  ;;  %v11199_v4 = vld [vmem:[%s10854_s21 + $0x14] sm:$0xf] }
  0x8d   : > { %v8476_v22 = vcombine.low %v2513_v63, %v11199_v4 }
  0x8f   : > { %v2519_v44 = vrot.slane %v8476_v22, 1  ;;  %v2531_v22 = vsel %vm1131_vm3, %v2528_v40, %v2530_v58 }
  0x92   : > { %9718 = vmatmul.mubr.msk.bf16.gmra.mxu1 %vm631_vm2, %v10471_v57  ;;  %v2097_v57 = vshrl.u32 %v11249_v46, 16  ;;  %v11335_v46 = vld [vmem:[%s10854_s21 + $0x70] sm:$0xff]  }
  0x93   : > { %9684 = vmatmul.mubr.msk.bf16.gmra.mxu0 %vm631_vm2, %v11044_v11  ;;  %9721 = vmatprep.mubr.msk.bf16.mxu1 %vm631_vm2, %v10472_v61  ;;  %v8434_v11 = vcombine.low %v1907_v3, %v11199_v4  ;;  %v2105_v61 = vshrl.u32 %v11272_v30, 16  ;;  %v2521_v3 = vsel %vm1131_vm3, %v2519_v44, %v2520_v37  ;;  %v2103_v4 = vrot.slane %v2101_v47, 1  ;;  %v11360_v44 = vld [vmem:[%s10854_s21 + $0x88] sm:$0xff]  }
  0x94   : > { %9687 = vmatprep.mubr.msk.bf16.mxu0 %vm631_vm2, %v11051_v16  ;;  %v10476_v16 = vld [vmem:[%s10854_s21 + $0x70] sm:$0xff]  }
  0x95   : > { %v2054_v15 = vshrl.u32 %v8434_v11, 16 }
  0x9a   : > { %9722 = vmatmul.mubr.msk.bf16.gmra.mxu1 %vm631_vm2, %v10473_v62  ;;  %v2109_v62 = vshll.u32 %v11276_v9, 16 }
  0x9b   : > { %9688 = vmatmul.mubr.msk.bf16.gmra.mxu0 %vm631_vm2, %v11057_v48  ;;  %9725 = vmatprep.mubr.msk.bf16.mxu1 %vm631_vm2, %v10474_v2  ;;  %v2056_v48 = vshll.u32 %v8434_v11, 16  ;;  %v2096_v2 = vsel %vm466_vm1, %v2091_v5, %v2095_v33  ;;  %v2099_v11 = vor.u32 %v2097_v57, %v2095_v33  ;;  %v11355_v33 = vld [vmem:[%s10854_s21 + $0x80] sm:$0xff]  }
  0x9c   : > { %9691 = vmatprep.mubr.msk.bf16.mxu0 %vm631_vm2, %v11063_v23 }
  0x9d   : > { %v2058_v23 = vrot.slane %v2056_v48, 1  ;;  %v2524_v48 = vrot.slane %v11231_v31, 1 }
  0x9f   : > { %v2059_v32 = vor.u32 %v2058_v23, %v2054_v15  ;;  %v2113_v15 = vshrl.u32 %v11276_v9, 16  ;;  %v2525_v26 = vsel %vm1131_vm3, %v2522_v19, %v2524_v48 }
  0xa1   : > { %v2064_v55 = vsel %vm466_vm1, %v2059_v32, %v2063_v24  ;;  %v3665_v24 = vsel %vm692_vm0, %v11172_v51, 0 }
  0xa2   : > { %9726 = vmatmul.mubr.msk.bf16.gmra.mxu1 %vm631_vm2, %v10475_v10  ;;  %v11293_v10 = vld [vmem:[%s10854_s21 + $0x50] sm:$0xff]  }
  0xa3   : > { %9692 = vmatmul.mubr.msk.bf16.gmra.mxu0 %vm631_vm2, %v11067_v25  ;;  %9729 = vmatprep.mubr.msk.bf16.mxu1 %vm631_vm2, %v10476_v16  ;;  %v10478_v25 = vld [vmem:[%s10854_s21 + $0x80] sm:$0xff]   ;;  %v2111_v16 = vrot.slane %v2109_v62, 1  ;;  %v2121_v13 = vshrl.u32 %v11293_v10, 16  ;;  %v2534_v47 = vrot.slane %v11293_v10, 1 }
  0xa4   : > { %9695 = vmatprep.mubr.msk.bf16.mxu0 %vm631_vm2, %v11073_v29  ;;  %v10706_v29 = vld [vmem:[%s10854_s21 + $0xa0] ss:$0 sps:$4 sm:$0x11]  }
  0xa5   : > { %v1171_v12 = vrot.slane %v10706_v29, 1  ;;  %v2115_v31 = vor.u32 %v2113_v15, %v2111_v16  ;;  %v11382_v15 = vld [vmem:[%s10854_s21 + $0x98] sm:$0xff]  }
  0xa7   : > { %v1172_v35 = vsel %vm1131_vm3, %v1169_v18, %v1171_v12  ;;  %v2107_v18 = vor.u32 %v2105_v61, %v2103_v4  ;;  %v11313_v12 = vld [vmem:[%s10854_s21 + $0x60] sm:$0xff]   ;;  %v2161_v61 = vshrl.u32 %v11340_v56, 16 }
  0xa8   : > { %v2133_v36 = vshll.u32 %v11313_v12, 16 }
  0xa9   : > { %v2112_v23 = vsel %vm466_vm1, %v2107_v18, %v2111_v16 }
  0xaa   : > { %9730 = vmatmul.mubr.msk.bf16.gmra.mxu1 %vm631_vm2, %v10477_v21  ;;  %v2104_v21 = vsel %vm466_vm1, %v2099_v11, %v2103_v4  ;;  %v2135_v45 = vrot.slane %v2133_v36, 1 }
  0xab   : > { %9696 = vmatmul.mubr.msk.bf16.gmra.mxu0 %vm631_vm2, %v1168_v7  ;;  %9733 = vmatprep.mubr.msk.bf16.mxu1 %vm631_vm2, %v10478_v25  ;;  %v2117_v7 = vshll.u32 %v11293_v10, 16  ;;  %v2523_v25 = vsel %vm1131_vm3, %v2520_v37, %v2522_v19  ;;  %v2159_v37 = vrot.slane %v2157_v39, 1 }
  0xac   : > { %9699 = vmatprep.mubr.msk.bf16.mxu0 %vm631_vm2, %v1170_v14  ;;  %v2125_v14 = vshll.u32 %v11297_v17, 16 }
  0xad   : > { %v2119_v29 = vrot.slane %v2117_v7, 1  ;;  %v2163_v18 = vor.u32 %v2161_v61, %v2159_v37 }
  0xae   : > { %v2127_v34 = vrot.slane %v2125_v14, 1 }
  0xaf   : > { %v2123_v32 = vor.u32 %v2121_v13, %v2119_v29  ;;  %v2120_v51 = vsel %vm466_vm1, %v2115_v31, %v2119_v29 }
  0xb0   : > { %v2131_v49 = vor.u32 %v2129_v41, %v2127_v34 }
  0xb2   : > { %9734 = vmatmul.mubr.msk.bf16.gmra.mxu1 %vm631_vm2, %v10479_v38  ;;  %v2526_v38 = vrot.slane %v11245_v1, 1  ;;  %v2136_v20 = vsel %vm466_vm1, %v2131_v49, %v2135_v45  ;;  %v11406_v49 = vld [vmem:[%s10854_s21 + $0xa8] sm:$0xff]  }
  0xb3   : > { %9700 = vmatmul.mubr.msk.bf16.gmra.mxu0 %vm631_vm2, %v1172_v35  ;;  %9737 = vmatprep.mubr.msk.bf16.mxu1 %vm631_vm2, %v10480_v28  ;;  %v11320_v35 = vld [vmem:[%s10854_s21 + $0x68] sm:$0xff]   ;;  %v2137_v28 = vshrl.u32 %v11313_v12, 16 }
  0xb4   : > { %9747 = vmatprep.mubr.msk.bf16.mxu0 %vm631_vm2, %v2064_v55  ;;  %v2128_v55 = vsel %vm466_vm1, %v2123_v32, %v2127_v34  ;;  %v2141_v42 = vshll.u32 %v11320_v35, 16  ;;  %v2527_v43 = vsel %vm1131_vm3, %v2524_v48, %v2526_v38  ;;  %v2529_v1 = vsel %vm1131_vm3, %v2526_v38, %v2528_v40 }
  0xb5   : > { %v2145_v60 = vshrl.u32 %v11320_v35, 16 }
  0xba   : > { %9738 = vmatmul.mubr.msk.bf16.gmra.mxu1 %vm631_vm2, %v10483_v54  ;;  %v2143_v54 = vrot.slane %v2141_v42, 1 }
  0xbb   : > { %9748 = vmatmul.mubr.msk.bf16.vlgmr.msra.gmra.mxu0 %vm631_vm2, %v2072_v8  ;;  %9741 = vmatprep.mubr.msk.bf16.mxu1 %vm631_vm2, %v10485_v59  ;;  %v2532_v8 = vrot.slane %v11276_v9, 1  ;;  %v2149_v59 = vshll.u32 %v11335_v46, 16 }
  0xbc   : > { %9830 = vmatpush3.bf16.msra.mxu0 %v3059_v53  ;;  %9751 = vmatprep.mubr.msk.bf16.mxu0 %vm631_vm2, %v2080_v0  ;;  %v2139_v53 = vor.u32 %v2137_v28, %v2135_v45  ;;  %v2153_v0 = vshrl.u32 %v11335_v46, 16  ;;  %v2147_v9 = vor.u32 %v2145_v60, %v2143_v54 }
  0xbd   : > { %10398 = vmatprep.subr.msk.bf16.mxu0 %vm692_vm0, %v11267_v6  ;;  %v2533_v30 = vsel %vm1131_vm3, %v2530_v58, %v2532_v8  ;;  %v2151_v27 = vrot.slane %v2149_v59, 1  ;;  %v2535_v4 = vsel %vm1131_vm3, %v2532_v8, %v2534_v47  ;;  %v2544_v59 = vrot.slane %v11340_v56, 1 }
  0xbe   : > { %v2144_v63 = vsel %vm466_vm1, %v2139_v53, %v2143_v54  ;;  %v2542_v54 = vrot.slane %v11335_v46, 1  ;;  %v2205_v46 = vshll.u32 %v11406_v49, 16 }
  0xbf   : > { %v2155_v5 = vor.u32 %v2153_v0, %v2151_v27  ;;  %v2152_v57 = vsel %vm466_vm1, %v2147_v9, %v2151_v27  ;;  %v2193_v0 = vshrl.u32 %v11382_v15, 16 }
  0xc1   : > { %v2160_v62 = vsel %vm466_vm1, %v2155_v5, %v2159_v37  ;;  %v2545_v37 = vsel %vm1131_vm3, %v2542_v54, %v2544_v59 }
  0xc2   : > { %9742 = vmatmul.mubr.msk.bf16.gmra.mxu1 %vm631_vm2, %v10487_v50  ;;  %v2536_v50 = vrot.slane %v11297_v17, 1  ;;  %v11375_v17 = vld [vmem:[%s10854_s21 + $0x90] sm:$0xff]  }
  0xc3   : > { %9752 = vmatmul.mubr.msk.bf16.gmra.mxu0 %vm631_vm2, %v2088_v52  ;;  %9789 = vmatprep.mubr.msk.bf16.mxu1 %vm631_vm2, %v2521_v3  ;;  %v2165_v52 = vshll.u32 %v11355_v33, 16  ;;  %v2173_v3 = vshll.u32 %v11360_v44, 16  ;;  %v2185_v38 = vshrl.u32 %v11375_v17, 16 }
  0xc4   : > { %9755 = vmatprep.mubr.msk.bf16.mxu0 %vm631_vm2, %v2096_v2  ;;  %v2169_v2 = vshrl.u32 %v11355_v33, 16  ;;  %v2537_v10 = vsel %vm1131_vm3, %v2534_v47, %v2536_v50 }
  0xc5   : > { %v2167_v16 = vrot.slane %v2165_v52, 1 }
  0xc7   : > { %v2171_v7 = vor.u32 %v2169_v2, %v2167_v16  ;;  %v2168_v29 = vsel %vm466_vm1, %v2163_v18, %v2167_v16  ;;  %v2548_v18 = vrot.slane %v11360_v44, 1 }
  0xca   : > { %9790 = vmatmul.mubr.msk.bf16.vlgmr.msra.gmra.mxu1 %vm631_vm2, %v2523_v25  ;;  %v2540_v25 = vrot.slane %v11320_v35, 1 }
  0xcb   : > { %9756 = vmatmul.mubr.msk.bf16.gmra.mxu0 %vm631_vm2, %v2104_v21  ;;  %9793 = vmatprep.mubr.msk.bf16.mxu1 %vm631_vm2, %v2525_v26  ;;  %v2175_v21 = vrot.slane %v2173_v3, 1  ;;  %v2181_v26 = vshll.u32 %v11375_v17, 16  ;;  %v2207_v3 = vrot.slane %v2205_v46, 1 }
  0xcc   : > { %9759 = vmatprep.mubr.msk.bf16.mxu0 %vm631_vm2, %v2112_v23  ;;  %9872 = vmatpush3.bf16.msra.mxu1 %v3665_v24  ;;  %v2538_v23 = vrot.slane %v11313_v12, 1  ;;  %v2177_v24 = vshrl.u32 %v11360_v44, 16  ;;  %v2189_v12 = vshll.u32 %v11382_v15, 16  ;;  %v2543_v9 = vsel %vm1131_vm3, %v2540_v25, %v2542_v54  ;;  %v11460_v54 = vld [vmem:[%s10854_s21 + $0x24] sm:$0xf] }
  0xcd   : > { %v2176_v34 = vsel %vm466_vm1, %v2171_v7, %v2175_v21  ;;  %v2183_v41 = vrot.slane %v2181_v26, 1 }
  0xce   : > { %v2539_v40 = vsel %vm1131_vm3, %v2536_v50, %v2538_v23  ;;  %v2179_v28 = vor.u32 %v2177_v24, %v2175_v21  ;;  %v2191_v45 = vrot.slane %v2189_v12, 1  ;;  %v2209_v21 = vshrl.u32 %v11406_v49, 16 }
  0xd0   : > { %v2195_v52 = vor.u32 %v2193_v0, %v2191_v45 }
  0xd2   : > { %9794 = vmatmul.mubr.msk.bf16.gmra.mxu1 %vm631_vm2, %v2527_v43 }
  0xd3   : > { %9760 = vmatmul.mubr.msk.bf16.gmra.mxu0 %vm631_vm2, %v2120_v51  ;;  %9797 = vmatprep.mubr.msk.bf16.mxu1 %vm631_vm2, %v2529_v1  ;;  %v2541_v51 = vsel %vm1131_vm3, %v2538_v23, %v2540_v25  ;;  %v2187_v1 = vor.u32 %v2185_v38, %v2183_v41 }
  0xd4   : > { %9763 = vmatprep.mubr.msk.bf16.mxu0 %vm631_vm2, %v2128_v55  ;;  %v11401_v55 = vld [vmem:[%s10854_s21 + $0xa0] sm:$0xff]  }
  0xd5   : > { %v2201_v27 = vshrl.u32 %v11401_v55, 16 }
  0xda   : > { %9798 = vmatmul.mubr.msk.bf16.gmra.mxu1 %vm631_vm2, %v2531_v22 }
  0xdb   : > { %9764 = vmatmul.mubr.msk.bf16.gmra.mxu0 %vm631_vm2, %v2136_v20  ;;  %9801 = vmatprep.mubr.msk.bf16.mxu1 %vm631_vm2, %v2533_v30  ;;  %v2197_v20 = vshll.u32 %v11401_v55, 16  ;;  %v2192_v30 = vsel %vm466_vm1, %v2187_v1, %v2191_v45  ;;  %v10506_v1 = vld [vmem:[%s10854_s21 + $0x20] sm:$0xff]  }
  0xdc   : > { %9767 = vmatprep.mubr.msk.bf16.mxu0 %vm631_vm2, %v2144_v63  ;;  %v2184_v63 = vsel %vm466_vm1, %v2179_v28, %v2183_v41  ;;  %v2552_v28 = vrot.slane %v11382_v15, 1  ;;  %v3294_v45 = vld [vmem:[%s10854_s21 + $0x20] sm:$0xf] }
  0xdd   : > { %v2199_v47 = vrot.slane %v2197_v20, 1  ;;  %v8539_v15 = vcombine.low %v3294_v45, %v11460_v54 }
  0xdf   : > { %v2203_v2 = vor.u32 %v2201_v27, %v2199_v47  ;;  %v2200_v7 = vsel %vm466_vm1, %v2195_v52, %v2199_v47  ;;  %v2554_v27 = vrot.slane %v11401_v55, 1  ;;  %v3443_v47 = vshll.u32 %v8539_v15, 16 }
  0xe1   : > { %v2208_v26 = vsel %vm466_vm1, %v2203_v2, %v2207_v3 }
  0xe2   : > { %v11378_v19 = vpop.f32.mrf.mxu1  ;;  %9802 = vmatmul.mubr.msk.bf16.gmra.mxu1 %vm631_vm2, %v2535_v4 }
  0xe3   : > { %v9581_v11 = vpop.f32.mrf.mxu0  ;;  %9768 = vmatmul.mubr.msk.bf16.gmra.mxu0 %vm631_vm2, %v2152_v57  ;;  %9805 = vmatprep.mubr.msk.bf16.mxu1 %vm631_vm2, %v2537_v10  ;;  %v11428_v57 = vld [vmem:[%s10854_s21 + $0xb0] ss:$0 sps:$4 sm:$0x11]  }
  0xe4   : > { %9771 = vmatprep.mubr.msk.bf16.mxu0 %vm631_vm2, %v2160_v62  ;;  %v11386_v13 = vpop.f32.mrf.mxu1  ;;  %v2213_v23 = vshll.u32 %v11428_v57, 16 }
  0xe5   : > { %v730_v48 = vpop.f32.mrf.mxu0 }
  0xe6   : > { %v9618_v31 = vpop.f32.mrf.mxu1 }
  0xe7   : > { %v9582_v14 = vpop.f32.mrf.mxu0 }
  0xe8   : > { %v11396_v36 = vpop.f32.mrf.mxu1 }
  0xe9   : > { %v733_v32 = vpop.f32.mrf.mxu0  ;;  %14078 = vst [vmem:[#allocation3_spill] sm:$0xff] %v11396_v36 }
  0xea   : > { %v9623_v42 = vpop.f32.mrf.mxu1  ;;  %9806 = vmatmul.mubr.msk.bf16.gmra.mxu1 %vm631_vm2, %v2539_v40 }
  0xeb   : > { %v9585_v35 = vpop.f32.mrf.mxu0  ;;  %9772 = vmatmul.mubr.msk.bf16.gmra.mxu0 %vm631_vm2, %v2168_v29  ;;  %v11408_v53 = vadd.f32 %v9623_v42, %v9581_v11  ;;  %9809 = vmatprep.mubr.msk.bf16.mxu1 %vm631_vm2, %v2541_v51  ;;  %v2546_v11 = vrot.slane %v11355_v33, 1 }
  0xec   : > { %9775 = vmatprep.mubr.msk.bf16.mxu0 %vm631_vm2, %v2176_v34  ;;  %v966_v58 = vpop.f32.mrf.mxu1  ;;  %v2215_v34 = vrot.slane %v2213_v23, 1 }
  0xed   : > { %v746_v43 = vpop.f32.mrf.mxu0  ;;  %v11414_v60 = vadd.f32 %v966_v58, %v730_v48  ;;  %v2547_v29 = vsel %vm1131_vm3, %v2544_v59, %v2546_v11  ;;  %v2549_v44 = vsel %vm1131_vm3, %v2546_v11, %v2548_v18  ;;  %v2555_v11 = vsel %vm1131_vm3, %v2552_v28, %v2554_v27 }
  0xee   : > { %v9624_v39 = vpop.f32.mrf.mxu1 }
  0xef   : > { %v9586_v8 = vpop.f32.mrf.mxu0 }
  0xf0   : > { %v969_v56 = vpop.f32.mrf.mxu1 }
  0xf1   : > { %v749_v22 = vpop.f32.mrf.mxu0  ;;  %v11424_v50 = vadd.f32 %v969_v56, %v733_v32  ;;  %v2211_v32 = vor.u32 %v2209_v21, %v2207_v3  ;;  %v10507_v56 = vld [vmem:[%s10854_s21 + $0x28] sm:$0xff]   ;;  %v4008_v3 = vsel %vm692_vm0, %v11267_v6, 0 }
  0xf2   : > { %v9627_v61 = vpop.f32.mrf.mxu1  ;;  %9810 = vmatmul.mubr.msk.bf16.gmra.mxu1 %vm631_vm2, %v2543_v9 }
  0xf3   : > { %v9589_v5 = vpop.f32.mrf.mxu0  ;;  %9776 = vmatmul.mubr.msk.bf16.gmra.mxu0 %vm631_vm2, %v2184_v63  ;;  %v11431_v4 = vadd.f32 %v9627_v61, %v9585_v35  ;;  %9813 = vmatprep.mubr.msk.bf16.mxu1 %vm631_vm2, %v2545_v37  ;;  %v2550_v35 = vrot.slane %v11375_v17, 1  ;;  %v11477_v37 = vld [vmem:[%s10854_s21 + $0x28] sm:$0xff]   ;;  %v10508_v61 = vld [vmem:[%s10854_s21 + $0x30] sm:$0xff]  }
  0xf4   : > { %9779 = vmatprep.mubr.msk.bf16.mxu0 %vm631_vm2, %v2192_v30  ;;  %v982_v10 = vpop.f32.mrf.mxu1 }
  0xf5   : > { %v762_v62 = vpop.f32.mrf.mxu0  ;;  %v11436_v48 = vadd.f32 %v982_v10, %v746_v43  ;;  %v2216_v43 = vsel %vm466_vm1, %v2211_v32, %v2215_v34  ;;  %v2551_v59 = vsel %vm1131_vm3, %v2548_v18, %v2550_v35  ;;  %v2553_v17 = vsel %vm1131_vm3, %v2550_v35, %v2552_v28  ;;  %v11501_v34 = vld [vmem:[%s10854_s21 + $0x38] sm:$0xff]  }
  0xf6   : > { %v9628_v14 = vpop.f32.mrf.mxu1  ;;  %v3445_v18 = vrot.slane %v3443_v47, 1  ;;  %v11525_v47 = vld [vmem:[%s10854_s21 + $0x48] sm:$0xff]  }
  0xf7   : > { %v9590_v16 = vpop.f32.mrf.mxu0  ;;  %v11493_v14 = vld [vmem:[%s10854_s21 + $0x30] sm:$0xff]  }
  0xf8   : > { %v985_v24 = vpop.f32.mrf.mxu1  ;;  %v3441_v16 = vshrl.u32 %v8539_v15, 16  ;;  %v11518_v15 = vld [vmem:[%s10854_s21 + $0x40] sm:$0xff]  }
  0xf9   : > { %v765_v25 = vpop.f32.mrf.mxu0  ;;  %v11445_v31 = vadd.f32 %v985_v24, %v749_v22 }
  0xfa   : > { %v9631_v38 = vpop.f32.mrf.mxu1  ;;  %9814 = vmatmul.mubr.msk.bf16.gmra.mxu1 %vm631_vm2, %v2547_v29 }
  0xfb   : > { %v9593_v33 = vpop.f32.mrf.mxu0  ;;  %9780 = vmatmul.mubr.msk.bf16.gmra.mxu0 %vm631_vm2, %v2200_v7  ;;  %v11449_v40 = vadd.f32 %v9631_v38, %v9589_v5  ;;  %9817 = vmatprep.mubr.msk.bf16.mxu1 %vm631_vm2, %v2549_v44  ;;  %v2556_v5 = vrot.slane %v11406_v49, 1  ;;  %v3448_v7 = vshll.u32 %v11477_v37, 16  ;;  %v3446_v44 = vor.u32 %v3445_v18, %v3441_v16 }
  0xfc   : > { %9783 = vmatprep.mubr.msk.bf16.mxu0 %vm631_vm2, %v2208_v26  ;;  %v998_v51 = vpop.f32.mrf.mxu1  ;;  %v2558_v26 = vrot.slane %v11428_v57, 1 }
  0xfd   : > { %v778_v12 = vpop.f32.mrf.mxu0  ;;  %v11454_v42 = vadd.f32 %v998_v51, %v762_v62  ;;  %v2557_v49 = vsel %vm1131_vm3, %v2554_v27, %v2556_v5  ;;  %v3450_v32 = vrot.slane %v3448_v7, 1  ;;  %v3476_v7 = vshrl.u32 %v11518_v15, 16 }
  0xfe   : > { %v9632_v58 = vpop.f32.mrf.mxu1  ;;  %v2559_v28 = vsel %vm1131_vm3, %v2556_v5, %v2558_v26 }
  0xff   : > { %v9594_v41 = vpop.f32.mrf.mxu0  ;;  %v3451_v45 = vsel %vm466_vm1, %v3446_v44, %v3450_v32  ;;  %v3460_v58 = vshrl.u32 %v11493_v14, 16 }
 0x100   : > { %v1001_v20 = vpop.f32.mrf.mxu1  ;;  %v3456_v41 = vshll.u32 %v11493_v14, 16 }
 0x101   : > { %v781_v8 = vpop.f32.mrf.mxu0  ;;  %v11466_v0 = vadd.f32 %v1001_v20, %v765_v25 }
 0x102   : > { %v9635_v39 = vpop.f32.mrf.mxu1  ;;  %9818 = vmatmul.mubr.msk.bf16.gmra.mxu1 %vm631_vm2, %v2551_v59 }
 0x103   : > { %v9597_v63 = vpop.f32.mrf.mxu0  ;;  %9784 = vmatmul.mubr.msk.bf16.gmra.mxu0 %vm631_vm2, %v2216_v43  ;;  %v11470_v30 = vadd.f32 %v9635_v39, %v9593_v33  ;;  %9821 = vmatprep.mubr.msk.bf16.mxu1 %vm631_vm2, %v2553_v17  ;;  %v10509_v33 = vld [vmem:[%s10854_s21 + $0x38] sm:$0xff]   ;;  %v3452_v43 = vshrl.u32 %v11477_v37, 16  ;;  %v3458_v17 = vrot.slane %v3456_v41, 1 }
 0x104   : > { %9831 = vmatprep.mubr.msk.bf16.mxu0 %vm631_vm2, %v10506_v1  ;;  %v1014_v46 = vpop.f32.mrf.mxu1 }
 0x105   : > { %v794_v22 = vpop.f32.mrf.mxu0  ;;  %v11479_v52 = vadd.f32 %v1014_v46, %v778_v12  ;;  %v10510_v12 = vld [vmem:[%s10854_s21 + $0x40] sm:$0xff]  }
 0x106   : > { %v9636_v62 = vpop.f32.mrf.mxu1 }
 0x107   : > { %v9598_v9 = vpop.f32.mrf.mxu0  ;;  %v10515_v62 = vld [vmem:[%s10854_s21 + $0x50] sm:$0xff]  }
 0x108   : > { %v1017_v55 = vpop.f32.mrf.mxu1  ;;  %v10513_v9 = vld [vmem:[%s10854_s21 + $0x48] sm:$0xff]  }
 0x109   : > { %v797_v2 = vpop.f32.mrf.mxu0  ;;  %v11488_v21 = vadd.f32 %v1017_v55, %v781_v8  ;;  %v3464_v8 = vshll.u32 %v11501_v34, 16 }
 0x10a   : > { %v9639_v6 = vpop.f32.mrf.mxu1  ;;  %9822 = vmatmul.mubr.msk.bf16.gmra.mxu1 %vm631_vm2, %v2555_v11  ;;  %v3472_v11 = vshll.u32 %v11518_v15, 16 }
 0x10b   : > { %v9601_v10 = vpop.f32.mrf.mxu0  ;;  %9832 = vmatmul.mubr.msk.bf16.vlgmr.msra.gmra.mxu0 %vm631_vm2, %v10507_v56  ;;  %v11495_v25 = vadd.f32 %v9639_v6, %v9597_v63  ;;  %9825 = vmatprep.mubr.msk.bf16.mxu1 %vm631_vm2, %v2557_v49  ;;  %v3462_v56 = vor.u32 %v3460_v58, %v3458_v17  ;;  %v3466_v5 = vrot.slane %v3464_v8, 1  ;;  %v3480_v6 = vshll.u32 %v11525_v47, 16  ;;  %v11555_v58 = vld [vmem:[%s10854_s21 + $0xb8] sm:$0xff]  }
 0x10c   : > { %9914 = vmatpush3.bf16.msra.mxu0 %v4008_v3  ;;  %9835 = vmatprep.mubr.msk.bf16.mxu0 %vm631_vm2, %v10508_v61  ;;  %v1030_v29 = vpop.f32.mrf.mxu1 }
 0x10d   : > { %v810_v23 = vpop.f32.mrf.mxu0  ;;  %v11503_v38 = vadd.f32 %v1030_v29, %v794_v22  ;;  %v3454_v22 = vor.u32 %v3452_v43, %v3450_v32  ;;  %v3467_v18 = vsel %vm466_vm1, %v3462_v56, %v3466_v5  ;;  %v11549_v43 = vld [vmem:[%s10854_s21 + $0x58] sm:$0xff]  }
 0x10e   : > { %v9640_v35 = vpop.f32.mrf.mxu1 }
 0x10f   : > { %v9602_v24 = vpop.f32.mrf.mxu0  ;;  %v3459_v55 = vsel %vm466_vm1, %v3454_v22, %v3458_v17  ;;  %v11559_v17 = vld [vmem:[%s10854_s21 + $0xc0] ss:$0 sps:$4 sm:$0x11]  }
 0x110   : > { %v1033_v57 = vpop.f32.mrf.mxu1  ;;  %v3474_v24 = vrot.slane %v3472_v11, 1 }
 0x111   : > { %v813_v51 = vpop.f32.mrf.mxu0  ;;  %v11513_v59 = vadd.f32 %v1033_v57, %v797_v2 }
 0x112   : > { %v9643_v20 = vpop.f32.mrf.mxu1  ;;  %9826 = vmatmul.mubr.msk.bf16.gmra.mxu1 %vm631_vm2, %v2559_v28  ;;  %v3478_v41 = vor.u32 %v3476_v7, %v3474_v24  ;;  %v3482_v28 = vrot.slane %v3480_v6, 1 }
 0x113   : > { %v9605_v1 = vpop.f32.mrf.mxu0  ;;  %9836 = vmatmul.mubr.msk.bf16.gmra.mxu0 %vm631_vm2, %v10509_v33  ;;  %v11520_v39 = vadd.f32 %v9643_v20, %v9601_v10  ;;  %9873 = vmatprep.mubr.msk.bf16.mxu1 %vm631_vm2, %v3451_v45  ;;  %v3468_v10 = vshrl.u32 %v11501_v34, 16  ;;  %v11542_v33 = vld [vmem:[%s10854_s21 + $0x50] sm:$0xff]   ;;  %v10519_v45 = vld [vmem:[%s10854_s21 + $0x60] sm:$0xff]  }
 0x114   : > { %9839 = vmatprep.mubr.msk.bf16.mxu0 %vm631_vm2, %v10510_v12  ;;  %v1046_v27 = vpop.f32.mrf.mxu1 }
 0x115   : > { %v826_v63 = vpop.f32.mrf.mxu0  ;;  %v11527_v61 = vadd.f32 %v1046_v27, %v810_v23  ;;  %v3470_v32 = vor.u32 %v3468_v10, %v3466_v5  ;;  %v3484_v27 = vshrl.u32 %v11525_v47, 16  ;;  %v3492_v5 = vshrl.u32 %v11542_v33, 16 }
 0x116   : > { %v9644_v2 = vpop.f32.mrf.mxu1 }
 0x117   : > { %v9606_v46 = vpop.f32.mrf.mxu0  ;;  %v3475_v22 = vsel %vm466_vm1, %v3470_v32, %v3474_v24  ;;  %v3945_v2 = vrot.slane %v11559_v17, 1  ;;  %v10521_v32 = vld [vmem:[%s10854_s21 + $0x68] sm:$0xff]  }
 0x118   : > { %v1049_v49 = vpop.f32.mrf.mxu1  ;;  %v14069_v46 = vrot.slane %v11555_v58, 1 }
 0x119   : > { %v829_v3 = vpop.f32.mrf.mxu0  ;;  %v11537_v23 = vadd.f32 %v1049_v49, %v813_v51  ;;  %v10517_v51 = vld [vmem:[%s10854_s21 + $0x58] sm:$0xff]  }
 0x11a   : > { %v9647_v26 = vpop.f32.mrf.mxu1  ;;  %9874 = vmatmul.mubr.msk.bf16.vlgmr.msra.gmra.mxu1 %vm631_vm2, %v3459_v55  ;;  %v11579_v7 = vsel %vm1131_vm3, %v14069_v46, %v3945_v2 }
 0x11b   : > { %v9609_v16 = vpop.f32.mrf.mxu0  ;;  %9840 = vmatmul.mubr.msk.bf16.gmra.mxu0 %vm631_vm2, %v10513_v9  ;;  %v11544_v44 = vadd.f32 %v9647_v26, %v9605_v1  ;;  %9877 = vmatprep.mubr.msk.bf16.mxu1 %vm631_vm2, %v3467_v18  ;;  %v3488_v1 = vshll.u32 %v11542_v33, 16  ;;  %v11574_v18 = vld [vmem:[%s10854_s21 + $0x60] sm:$0xff]   ;;  %14079 = vst [vmem:[#allocation4_spill] sm:$0xff] %v11579_v7 }
 0x11c   : > { %9843 = vmatprep.mubr.msk.bf16.mxu0 %vm631_vm2, %v10515_v62  ;;  %v1062_v12 = vpop.f32.mrf.mxu1  ;;  %v3496_v62 = vshll.u32 %v11549_v43, 16 }
 0x11d   : > { %v842_v29 = vpop.f32.mrf.mxu0  ;;  %v11551_v57 = vadd.f32 %v1062_v12, %v826_v63  ;;  %v3483_v63 = vsel %vm466_vm1, %v3478_v41, %v3482_v28  ;;  %v3490_v49 = vrot.slane %v3488_v1, 1 }
 0x11e   : > { %v9648_v8 = vpop.f32.mrf.mxu1 }
 0x11f   : > { %v9610_v35 = vpop.f32.mrf.mxu0  ;;  %v3494_v12 = vor.u32 %v3492_v5, %v3490_v49  ;;  %v3508_v5 = vshrl.u32 %v11574_v18, 16 }
 0x120   : > { %v1065_v9 = vpop.f32.mrf.mxu1  ;;  %v3498_v35 = vrot.slane %v3496_v62, 1 }
 0x121   : > { %v845_v20 = vpop.f32.mrf.mxu0  ;;  %v11569_v11 = vadd.f32 %v1065_v9, %v829_v3  ;;  %v3486_v3 = vor.u32 %v3484_v27, %v3482_v28  ;;  %v3500_v28 = vshrl.u32 %v11549_v43, 16 }
 0x122   : > { %v9651_v55 = vpop.f32.mrf.mxu1  ;;  %9878 = vmatmul.mubr.msk.bf16.gmra.mxu1 %vm631_vm2, %v3475_v22  ;;  %v3504_v22 = vshll.u32 %v11574_v18, 16 }
 0x123   : > { %v9613_v56 = vpop.f32.mrf.mxu0  ;;  %9844 = vmatmul.mubr.msk.bf16.gmra.mxu0 %vm631_vm2, %v10517_v51  ;;  %v11581_v6 = vadd.f32 %v9651_v55, %v9609_v16  ;;  %9881 = vmatprep.mubr.msk.bf16.mxu1 %vm631_vm2, %v3483_v63  ;;  %v11586_v51 = vld [vmem:[%s10854_s21 + $0x68] sm:$0xff]   ;;  %v3491_v16 = vsel %vm466_vm1, %v3486_v3, %v3490_v49  ;;  %v3499_v63 = vsel %vm466_vm1, %v3494_v12, %v3498_v35 }
 0x124   : > { %9847 = vmatprep.mubr.msk.bf16.mxu0 %vm631_vm2, %v10519_v45  ;;  %v1078_v26 = vpop.f32.mrf.mxu1  ;;  %v10523_v45 = vld [vmem:[%s10854_s21 + $0x70] sm:$0xff]   ;;  %v3506_v3 = vrot.slane %v3504_v22, 1  ;;  %v10527_v22 = vld [vmem:[%s10854_s21 + $0x80] sm:$0xff]  }
 0x125   : > { %v858_v10 = vpop.f32.mrf.mxu0  ;;  %v11588_v41 = vadd.f32 %v1078_v26, %v842_v29  ;;  %v3512_v29 = vshll.u32 %v11586_v51, 16  ;;  %v11606_v26 = vld [vmem:[%s10854_s21 + $0x70] sm:$0xff]  }
 0x126   : > { %v9652_v8 = vpop.f32.mrf.mxu1  ;;  %14080 = vst [vmem:[#allocation5_spill] sm:$0xff] %v11606_v26 }
 0x127   : > { %v9614_v24 = vpop.f32.mrf.mxu0  ;;  %v10525_v8 = vld [vmem:[%s10854_s21 + $0x78] sm:$0xff]  }
 0x128   : > { %v1081_v27 = vpop.f32.mrf.mxu1 }
 0x129   : > { %v861_v1 = vpop.f32.mrf.mxu0  ;;  %v11598_v62 = vadd.f32 %v1081_v27, %v845_v20  ;;  %v3502_v20 = vor.u32 %v3500_v28, %v3498_v35  ;;  %v3514_v27 = vrot.slane %v3512_v29, 1  ;;  %v3516_v28 = vshrl.u32 %v11586_v51, 16 }
 0x12a   : > { %v9655_v55 = vpop.f32.mrf.mxu1  ;;  %9882 = vmatmul.mubr.msk.bf16.gmra.mxu1 %vm631_vm2, %v3491_v16 }
 0x12b   : > { %v9665_v9 = vpop.f32.mrf.mxu0  ;;  %9848 = vmatmul.mubr.msk.bf16.gmra.mxu0 %vm631_vm2, %v10521_v32  ;;  %v11608_v24 = vadd.f32 %v9655_v55, %v9613_v56  ;;  %9885 = vmatprep.mubr.msk.bf16.mxu1 %vm631_vm2, %v3499_v63  ;;  %v3520_v56 = vshll.u32 %v11606_v26, 16  ;;  %v3507_v35 = vsel %vm466_vm1, %v3502_v20, %v3506_v3  ;;  %v11641_v20 = vld [vmem:[%s10854_s21 + $0x80] sm:$0xff]  }
 0x12c   : > { %v11601_v2 = vadd.f32 %v9665_v9, %v11408_v53  ;;  %9851 = vmatprep.mubr.msk.bf16.mxu0 %vm631_vm2, %v10523_v45  ;;  %v1094_v53 = vpop.f32.mrf.mxu1  ;;  %v3510_v45 = vor.u32 %v3508_v5, %v3506_v3  ;;  %v11616_v9 = vld [vmem:[%s10854_s21 + $0x78] sm:$0xff]   ;;  %14082 = vst [vmem:[#allocation7_spill] sm:$0xff] %v11641_v20 }
 0x12d   : > { %v1270_v49 = vpop.f32.mrf.mxu0  ;;  %14081 = vst [vmem:[#allocation6_spill] sm:$0xff] %v11616_v9  ;;  %v11618_v16 = vadd.f32 %v1094_v53, %v858_v10  ;;  %v3528_v29 = vshll.u32 %v11616_v9, 16  ;;  %v3522_v3 = vrot.slane %v3520_v56, 1  ;;  %v3536_v56 = vshll.u32 %v11641_v20, 16 }
 0x12e   : > { %v11611_v32 = vadd.f32 %v1270_v49, %v11414_v60  ;;  %v9656_v46 = vpop.f32.mrf.mxu1  ;;  %v3515_v10 = vsel %vm466_vm1, %v3510_v45, %v3514_v27 }
 0x12f   : > { %v9666_v12 = vpop.f32.mrf.mxu0  ;;  %v3524_v46 = vshrl.u32 %v11606_v26, 16  ;;  %v11683_v26 = vld [vmem:[%s10854_s21 + $0x98] sm:$0xff]  }
 0x130   : > { %v1097_v63 = vpop.f32.mrf.mxu1 }
 0x131   : > { %v1273_v7 = vpop.f32.mrf.mxu0  ;;  %v11631_v55 = vadd.f32 %v1097_v63, %v861_v1  ;;  %v3518_v1 = vor.u32 %v3516_v28, %v3514_v27  ;;  %v3526_v45 = vor.u32 %v3524_v46, %v3522_v3  ;;  %v11651_v63 = vld [vmem:[%s10854_s21 + $0x88] sm:$0xff]   ;;  %v3532_v28 = vshrl.u32 %v11616_v9, 16 }
 0x132   : > { %v11623_v60 = vadd.f32 %v1273_v7, %v11424_v50  ;;  %v11637_v7 = vpop.f32.mrf.mxu1  ;;  %9886 = vmatmul.mubr.msk.bf16.gmra.mxu1 %vm631_vm2, %v3507_v35 }
 0x133   : > { %v9669_v5 = vpop.f32.mrf.mxu0  ;;  %9852 = vmatmul.mubr.msk.bf16.gmra.mxu0 %vm631_vm2, %v10525_v8  ;;  %9889 = vmatprep.mubr.msk.bf16.mxu1 %vm631_vm2, %v3515_v10  ;;  %v10529_v8 = vld [vmem:[%s10854_s21 + $0x88] sm:$0xff]   ;;  %v3523_v27 = vsel %vm466_vm1, %v3518_v1, %v3522_v3  ;;  %v3538_v3 = vrot.slane %v3536_v56, 1  ;;  %v11672_v1 = vld [vmem:[%s10854_s21 + $0x90] sm:$0xff]  }
 0x134   : > { %v11634_v50 = vadd.f32 %v9669_v5, %v11431_v4  ;;  %9855 = vmatprep.mubr.msk.bf16.mxu0 %vm631_vm2, %v10527_v22  ;;  %v11647_v12 = vpop.f32.mrf.mxu1  ;;  %v3530_v22 = vrot.slane %v3528_v29, 1  ;;  %v10531_v5 = vld [vmem:[%s10854_s21 + $0x90] sm:$0xff]   ;;  %v3540_v29 = vshrl.u32 %v11641_v20, 16  ;;  %14085 = vst [vmem:[#allocation10_spill] sm:$0xff] %v11672_v1 }
 0x135   : > { %v1286_v49 = vpop.f32.mrf.mxu0  ;;  %14083 = vst [vmem:[#allocation8_spill] sm:$0xff] %v11647_v12 }
 0x136   : > { %v11644_v53 = vadd.f32 %v1286_v49, %v11436_v48  ;;  %v9660_v35 = vpop.f32.mrf.mxu1  ;;  %v3531_v46 = vsel %vm466_vm1, %v3526_v45, %v3530_v22  ;;  %v3534_v20 = vor.u32 %v3532_v28, %v3530_v22  ;;  %v3548_v28 = vshrl.u32 %v11651_v63, 16 }
 0x137   : > { %v9670_v4 = vpop.f32.mrf.mxu0 }
 0x138   : > { %v11660_v10 = vpop.f32.mrf.mxu1  ;;  %v3544_v4 = vshll.u32 %v11651_v63, 16  ;;  %v3539_v22 = vsel %vm466_vm1, %v3534_v20, %v3538_v3 }
 0x139   : > { %v1289_v36 = vpop.f32.mrf.mxu0  ;;  %14084 = vst [vmem:[#allocation9_spill] sm:$0xff] %v11660_v10  ;;  %v3542_v10 = vor.u32 %v3540_v29, %v3538_v3 }
 0x13a   : > { %v11656_v48 = vadd.f32 %v1289_v36, %v11445_v31  ;;  %v9707_v36 = vpop.f32.mrf.mxu1  ;;  %9890 = vmatmul.mubr.msk.bf16.gmra.mxu1 %vm631_vm2, %v3523_v27  ;;  %v3546_v9 = vrot.slane %v3544_v4, 1  ;;  %v10535_v27 = vld [vmem:[%s10854_s21 + $0xa0] sm:$0xff]   ;;  %v3560_v4 = vshll.u32 %v11683_v26, 16 }
 0x13b   : > { %v9673_v49 = vpop.f32.mrf.mxu0  ;;  %9856 = vmatmul.mubr.msk.bf16.gmra.mxu0 %vm631_vm2, %v10529_v8  ;;  %v11675_v8 = vadd.f32 %v9707_v36, %v11601_v2  ;;  %9893 = vmatprep.mubr.msk.bf16.mxu1 %vm631_vm2, %v3531_v46  ;;  %v3552_v36 = vshll.u32 %v11672_v1, 16 }
 0x13c   : > { %v11667_v35 = vadd.f32 %v9673_v49, %v11449_v40  ;;  %9859 = vmatprep.mubr.msk.bf16.mxu0 %vm631_vm2, %v10531_v5  ;;  %v1708_v40 = vpop.f32.mrf.mxu1  ;;  %v10533_v5 = vld [vmem:[%s10854_s21 + $0x98] sm:$0xff]  }
 0x13d   : > { %v1302_v31 = vpop.f32.mrf.mxu0  ;;  %v11686_v56 = vadd.f32 %v1708_v40, %v11611_v32  ;;  %v3547_v32 = vsel %vm466_vm1, %v3542_v10, %v3546_v9  ;;  %v3554_v10 = vrot.slane %v3552_v36, 1  ;;  %v11708_v40 = vld [vmem:[%s10854_s21 + $0xa0] sm:$0xff]  }
 0x13e   : > { %v11678_v45 = vadd.f32 %v1302_v31, %v11454_v42  ;;  %v9708_v12 = vpop.f32.mrf.mxu1  ;;  %14087 = vst [vmem:[#allocation12_spill] sm:$0xff] %v11708_v40 }
 0x13f   : > { %v9674_v49 = vpop.f32.mrf.mxu0  ;;  %v3556_v12 = vshrl.u32 %v11672_v1, 16  ;;  %v10539_v1 = vld [vmem:[%s10854_s21 + $0xb0] sm:$0xff]  }
 0x140   : > { %v1711_v46 = vpop.f32.mrf.mxu1 }
 0x141   : > { %v1305_v2 = vpop.f32.mrf.mxu0 }
 0x142   : > { %v11691_v42 = vadd.f32 %v1305_v2, %v11466_v0  ;;  %v11700_v0 = vadd.f32 %v1711_v46, %v11623_v60  ;;  %v9711_v20 = vpop.f32.mrf.mxu1  ;;  %9894 = vmatmul.mubr.msk.bf16.gmra.mxu1 %vm631_vm2, %v3539_v22  ;;  %v10537_v46 = vld [vmem:[%s10854_s21 + $0xa8] sm:$0xff]   ;;  %v3562_v22 = vrot.slane %v3560_v4, 1 }
 0x143   : > { %v9677_v29 = vpop.f32.mrf.mxu0  ;;  %9860 = vmatmul.mubr.msk.bf16.gmra.mxu0 %vm631_vm2, %v10533_v5  ;;  %v11711_v49 = vadd.f32 %v9711_v20, %v11634_v50  ;;  %v3550_v5 = vor.u32 %v3548_v28, %v3546_v9  ;;  %9897 = vmatprep.mubr.msk.bf16.mxu1 %vm631_vm2, %v3547_v32 }
 0x144   : > { %14086 = vst [vmem:[#allocation11_spill] sm:$0xff] %v11691_v42  ;;  %v11703_v31 = vadd.f32 %v9677_v29, %v11470_v30  ;;  %9863 = vmatprep.mubr.msk.bf16.mxu0 %vm631_vm2, %v10535_v27  ;;  %v3900_v30 = vld [vmem:[%s10854_s21 + $0x20] sm:$0xe]  ;;  %v1724_v27 = vpop.f32.mrf.mxu1  ;;  %v3558_v29 = vor.u32 %v3556_v12, %v3554_v10  ;;  %v11720_v42 = vld [vmem:[%s10854_s21 + $0xa8] sm:$0xff]   ;;  %v3564_v12 = vshrl.u32 %v11683_v26, 16 }
 0x145   : > { %v1318_v3 = vpop.f32.mrf.mxu0  ;;  %v11723_v36 = vadd.f32 %v1724_v27, %v11644_v53  ;;  %v8581_v9 = vcombine.low %v3900_v30, %v11460_v54  ;;  %v3555_v32 = vsel %vm466_vm1, %v3550_v5, %v3554_v10  ;;  %v3572_v27 = vshrl.u32 %v11708_v40, 16 }
 0x146   : > { %v11714_v60 = vadd.f32 %v1318_v3, %v11479_v52  ;;  %v9712_v50 = vpop.f32.mrf.mxu1  ;;  %v3568_v52 = vshll.u32 %v11708_v40, 16  ;;  %v3563_v53 = vsel %vm466_vm1, %v3558_v29, %v3562_v22  ;;  %v3907_v29 = vrot.slane %v11477_v37, 1 }
 0x147   : > { %v9678_v2 = vpop.f32.mrf.mxu0  ;;  %v11747_v50 = vld [vmem:[%s10854_s21 + $0xb0] sm:$0xff]  }
 0x148   : > { %v1727_v4 = vpop.f32.mrf.mxu1  ;;  %v3576_v2 = vshll.u32 %v11720_v42, 16  ;;  %v3570_v30 = vrot.slane %v3568_v52, 1 }
 0x149   : > { %v1321_v20 = vpop.f32.mrf.mxu0  ;;  %v11738_v54 = vadd.f32 %v1727_v4, %v11656_v48 }
 0x14a   : > { %v11729_v28 = vadd.f32 %v1321_v20, %v11488_v21  ;;  %v9715_v10 = vpop.f32.mrf.mxu1  ;;  %9898 = vmatmul.mubr.msk.bf16.gmra.mxu1 %vm631_vm2, %v3555_v32  ;;  %v3574_v32 = vor.u32 %v3572_v27, %v3570_v30 }
 0x14b   : > { %v9681_v3 = vpop.f32.mrf.mxu0  ;;  %9864 = vmatmul.mubr.msk.bf16.gmra.mxu0 %vm631_vm2, %v10537_v46  ;;  %v3906_v46 = vrot.slane %v8581_v9, 1  ;;  %v11750_v20 = vadd.f32 %v9715_v10, %v11667_v35  ;;  %9901 = vmatprep.mubr.msk.bf16.mxu1 %vm631_vm2, %v3563_v53  ;;  %v3584_v35 = vshll.u32 %v11747_v50, 16  ;;  %v3592_v10 = vshll.u32 %v11555_v58, 16 }
 0x14c   : > { %14088 = vst [vmem:[#allocation13_spill] sm:$0xff] %v11729_v28  ;;  %v11741_v21 = vadd.f32 %v9681_v3, %v11495_v25  ;;  %9867 = vmatprep.mubr.msk.bf16.mxu0 %vm631_vm2, %v10539_v1  ;;  %v3566_v25 = vor.u32 %v3564_v12, %v3562_v22  ;;  %v1740_v1 = vpop.f32.mrf.mxu1  ;;  %v10541_v3 = vld [vmem:[%s10854_s21 + $0xb8] sm:$0xff]   ;;  %v3578_v28 = vrot.slane %v3576_v2, 1  ;;  %v3580_v12 = vshrl.u32 %v11720_v42, 16 }
 0x14d   : > { %v1334_v5 = vpop.f32.mrf.mxu0  ;;  %v11758_v52 = vadd.f32 %v1740_v1, %v11678_v45  ;;  %v3908_v40 = vsel %vm1131_vm3, %v3906_v46, %v3907_v29  ;;  %v3588_v2 = vshrl.u32 %v11747_v50, 16  ;;  %v3911_v1 = vrot.slane %v11501_v34, 1 }
 0x14e   : > { %v11753_v48 = vadd.f32 %v1334_v5, %v11503_v38  ;;  %v9716_v37 = vpop.f32.mrf.mxu1  ;;  %v3571_v22 = vsel %vm466_vm1, %v3566_v25, %v3570_v30  ;;  %v3579_v45 = vsel %vm466_vm1, %v3574_v32, %v3578_v28  ;;  %v3586_v25 = vrot.slane %v3584_v35, 1 }
 0x14f   : > { %v9682_v4 = vpop.f32.mrf.mxu0  ;;  %v3582_v32 = vor.u32 %v3580_v12, %v3578_v28  ;;  %v3596_v28 = vshrl.u32 %v11555_v58, 16  ;;  %v3600_v12 = vshll.u32 %v11559_v17, 16 }
 0x150   : > { %v11767_v53 = vpop.f32.mrf.mxu1 }
 0x151   : > { %v1337_v9 = vpop.f32.mrf.mxu0 }
 0x152   : > { %v11763_v38 = vadd.f32 %v1337_v9, %v11513_v59  ;;  %v3909_v59 = vrot.slane %v11493_v14, 1  ;;  %v9719_v30 = vpop.f32.mrf.mxu1  ;;  %9902 = vmatmul.mubr.msk.bf16.gmra.mxu1 %vm631_vm2, %v3571_v22  ;;  %v3594_v9 = vrot.slane %v3592_v10, 1 }
 0x153   : > { %v9685_v27 = vpop.f32.mrf.mxu0  ;;  %9868 = vmatmul.mubr.msk.bf16.gmra.mxu0 %vm631_vm2, %v10541_v3  ;;  %v11779_v4 = vadd.f32 %v9719_v30, %v11703_v31  ;;  %9905 = vmatprep.mubr.msk.bf16.mxu1 %vm631_vm2, %v3579_v45  ;;  %v3915_v30 = vrot.slane %v11525_v47, 1 }
 0x154   : > { %v1451_v5 = vadd.f32 %v9685_v27, %v11520_v39  ;;  %9915 = vmatprep.mubr.msk.bf16.mxu0 %vm631_vm2, %v3908_v40  ;;  %v1756_v39 = vpop.f32.mrf.mxu1  ;;  %v3590_v40 = vor.u32 %v3588_v2, %v3586_v25  ;;  %v3910_v22 = vsel %vm1131_vm3, %v3907_v29, %v3909_v59  ;;  %v3912_v34 = vsel %vm1131_vm3, %v3909_v59, %v3911_v1 }
 0x155   : > { %v1350_v46 = vpop.f32.mrf.mxu0  ;;  %v11784_v14 = vadd.f32 %v1756_v39, %v11714_v60 }
 0x156   : > { %v1449_v3 = vadd.f32 %v1350_v46, %v11527_v61  ;;  %v9720_v35 = vpop.f32.mrf.mxu1  ;;  %v3587_v61 = vsel %vm466_vm1, %v3582_v32, %v3586_v25  ;;  %v3595_v60 = vsel %vm466_vm1, %v3590_v40, %v3594_v9  ;;  %v3598_v25 = vor.u32 %v3596_v28, %v3594_v9 }
 0x157   : > { %v9686_v37 = vpop.f32.mrf.mxu0  ;;  %v3602_v32 = vrot.slane %v3600_v12, 1 }
 0x158   : > { %v11794_v45 = vpop.f32.mrf.mxu1 }
 0x159   : > { %v1353_v27 = vpop.f32.mrf.mxu0 }
 0x15a   : > { %v11789_v31 = vadd.f32 %v1353_v27, %v11537_v23  ;;  %v3913_v23 = vrot.slane %v11518_v15, 1  ;;  %v9723_v10 = vpop.f32.mrf.mxu1  ;;  %9906 = vmatmul.mubr.msk.bf16.gmra.mxu1 %vm631_vm2, %v3587_v61 }
 0x15b   : > { %v9689_v2 = vpop.f32.mrf.mxu0  ;;  %9916 = vmatmul.mubr.msk.bf16.vlgmr.msra.gmra.mxu0 %vm631_vm2, %v3910_v22  ;;  %v11804_v17 = vadd.f32 %v9723_v10, %v11741_v21  ;;  %9909 = vmatprep.mubr.msk.bf16.mxu1 %vm631_vm2, %v3595_v60 }
 0x15c   : > { %v1455_v29 = vadd.f32 %v9689_v2, %v11544_v44  ;;  %9919 = vmatprep.mubr.msk.bf16.mxu0 %vm631_vm2, %v3912_v34  ;;  %v1772_v44 = vpop.f32.mrf.mxu1  ;;  %v3914_v15 = vsel %vm1131_vm3, %v3911_v1, %v3913_v23  ;;  %v3916_v47 = vsel %vm1131_vm3, %v3913_v23, %v3915_v30 }
 0x15d   : > { %v1366_v59 = vpop.f32.mrf.mxu0  ;;  %v11809_v37 = vadd.f32 %v1772_v44, %v11753_v48  ;;  %v3917_v48 = vrot.slane %v11542_v33, 1 }
 0x15e   : > { %v1453_v46 = vadd.f32 %v1366_v59, %v11551_v57  ;;  %v9724_v40 = vpop.f32.mrf.mxu1  ;;  %v3603_v57 = vsel %vm466_vm1, %v3598_v25, %v3602_v32  ;;  %v3923_v32 = vrot.slane %v11586_v51, 1 }
 0x15f   : > { %v9690_v39 = vpop.f32.mrf.mxu0 }
 0x160   : > { %v11817_v9 = vpop.f32.mrf.mxu1 }
 0x161   : > { %v1369_v22 = vpop.f32.mrf.mxu0 }
 0x162   : > { %v11814_v21 = vadd.f32 %v1369_v22, %v11569_v11  ;;  %v9727_v1 = vpop.f32.mrf.mxu1  ;;  %9910 = vmatmul.mubr.msk.bf16.gmra.mxu1 %vm631_vm2, %v3603_v57  ;;  %v3919_v11 = vrot.slane %v11549_v43, 1 }
 0x163   : > { %v9693_v35 = vpop.f32.mrf.mxu0  ;;  %9920 = vmatmul.mubr.msk.bf16.gmra.mxu0 %vm631_vm2, %v3914_v15  ;;  %v11825_v61 = vadd.f32 %v9727_v1, %v1451_v5  ;;  %v3921_v5 = vrot.slane %v11574_v18, 1  ;;  %v1119_v18 = vadd.f32 %v11637_v7, %v11378_v19  ;;  %v14090_v1 = vld [vmem:[#allocation5_spill] sm:$0xff] }
 0x164   : > { %v1459_v27 = vadd.f32 %v9693_v35, %v11581_v6  ;;  %9923 = vmatprep.mubr.msk.bf16.mxu0 %vm631_vm2, %v3916_v47  ;;  %v1788_v12 = vpop.f32.mrf.mxu1  ;;  %v3918_v6 = vsel %vm1131_vm3, %v3915_v30, %v3917_v48  ;;  %v3920_v33 = vsel %vm1131_vm3, %v3917_v48, %v3919_v11 }
 0x165   : > { %v1382_v34 = vpop.f32.mrf.mxu0  ;;  %v11828_v60 = vadd.f32 %v1788_v12, %v1449_v3  ;;  %v3922_v22 = vsel %vm1131_vm3, %v3919_v11, %v3921_v5  ;;  %v3924_v57 = vsel %vm1131_vm3, %v3921_v5, %v3923_v32 }
 0x166   : > { %v1457_v28 = vadd.f32 %v1382_v34, %v11588_v41  ;;  %v9728_v23 = vpop.f32.mrf.mxu1  ;;  %v3925_v34 = vrot.slane %v14090_v1, 1 }
 0x167   : > { %v9694_v2 = vpop.f32.mrf.mxu0 }
 0x168   : > { %v11835_v25 = vpop.f32.mrf.mxu1  ;;  %v14091_v2 = vld [vmem:[#allocation6_spill] sm:$0xff] }
 0x169   : > { %v1385_v10 = vpop.f32.mrf.mxu0  ;;  %v3927_v19 = vrot.slane %v14091_v2, 1 }
 0x16a   : > { %v11833_v59 = vadd.f32 %v1385_v10, %v11598_v62  ;;  %v9731_v3 = vpop.f32.mrf.mxu1 }
 0x16b   : > { %v9697_v43 = vpop.f32.mrf.mxu0  ;;  %9924 = vmatmul.mubr.msk.bf16.gmra.mxu0 %vm631_vm2, %v3918_v6  ;;  %v11842_v44 = vadd.f32 %v9731_v3, %v1455_v29  ;;  %v10548_v6 = vld [vmem:[%s14063_s2 + $0x78] sm:$0xff]   ;;  %v3926_v3 = vsel %vm1131_vm3, %v3923_v32, %v3925_v34 }
 0x16c   : > { %v1463_v41 = vadd.f32 %v9697_v43, %v11608_v24  ;;  %9927 = vmatprep.mubr.msk.bf16.mxu0 %vm631_vm2, %v3920_v33  ;;  %v1804_v39 = vpop.f32.mrf.mxu1  ;;  %v14092_v33 = vld [vmem:[#allocation3_spill] sm:$0xff]  ;;  %9955 = vmatprep.subr.bf16.mxu1 %v10548_v6 }
 0x16d   : > { %v1398_v30 = vpop.f32.mrf.mxu0  ;;  %v11845_v40 = vadd.f32 %v1804_v39, %v1453_v46  ;;  %9956 = vmatpush3.bf16.msra.mxu1 %v10548_v6 }
 0x16e   : > { %v1461_v62 = vadd.f32 %v1398_v30, %v11618_v16  ;;  %v9732_v47 = vpop.f32.mrf.mxu1  ;;  %v14089_v16 = vld [vmem:[#allocation8_spill] sm:$0xff] }
 0x16f   : > { %v9698_v15 = vpop.f32.mrf.mxu0  ;;  %v1111_v46 = vadd.f32 %v14089_v16, %v11386_v13  ;;  %v14093_v13 = vld [vmem:[#allocation9_spill] sm:$0xff] }
 0x170   : > { %v11854_v51 = vpop.f32.mrf.mxu1  ;;  %v1114_v43 = vadd.f32 %v14093_v13, %v14092_v33 }
 0x171   : > { %v1401_v24 = vpop.f32.mrf.mxu0 }
 0x172   : > { %v11852_v35 = vadd.f32 %v1401_v24, %v11631_v55  ;;  %v9735_v11 = vpop.f32.mrf.mxu1 }
 0x173   : > { %v9701_v29 = vpop.f32.mrf.mxu0  ;;  %9928 = vmatmul.mubr.msk.bf16.gmra.mxu0 %vm631_vm2, %v3922_v22  ;;  %v11862_v7 = vadd.f32 %v9735_v11, %v1459_v27  ;;  %v3928_v27 = vsel %vm1131_vm3, %v3925_v34, %v3927_v19 }
 0x174   : > { %v1467_v48 = vadd.f32 %v9701_v29, %v1119_v18  ;;  %9931 = vmatprep.mubr.msk.bf16.mxu0 %vm631_vm2, %v3924_v57  ;;  %v1820_v23 = vpop.f32.mrf.mxu1  ;;  %v3931_v29 = vrot.slane %v11651_v63, 1 }
 0x175   : > { %v1414_v12 = vpop.f32.mrf.mxu0  ;;  %v11869_v5 = vadd.f32 %v1820_v23, %v1457_v28  ;;  %v14094_v28 = vld [vmem:[#allocation7_spill] sm:$0xff] }
 0x176   : > { %v1465_v55 = vadd.f32 %v1414_v12, %v1111_v46  ;;  %v9736_v30 = vpop.f32.mrf.mxu1  ;;  %v3929_v57 = vrot.slane %v14094_v28, 1 }
 0x177   : > { %v9702_v10 = vpop.f32.mrf.mxu0 }
 0x178   : > { %v11875_v22 = vpop.f32.mrf.mxu1  ;;  %v3930_v12 = vsel %vm1131_vm3, %v3927_v19, %v3929_v57  ;;  %v3932_v23 = vsel %vm1131_vm3, %v3929_v57, %v3931_v29  ;;  %v14095_v19 = vld [vmem:[#allocation10_spill] sm:$0xff] }
 0x179   : > { %v1417_v39 = vpop.f32.mrf.mxu0  ;;  %v3933_v10 = vrot.slane %v14095_v19, 1 }
 0x17a   : > { %v11873_v15 = vadd.f32 %v1417_v39, %v1114_v43  ;;  %v9739_v32 = vpop.f32.mrf.mxu1  ;;  %v3935_v43 = vrot.slane %v11683_v26, 1 }
 0x17b   : > { %v9749_v47 = vpop.f32.mrf.mxu0  ;;  %9932 = vmatmul.mubr.msk.bf16.gmra.mxu0 %vm631_vm2, %v3926_v3  ;;  %v11882_v16 = vadd.f32 %v9739_v32, %v1463_v41  ;;  %v10550_v32 = vld [vmem:[%s14063_s2 + $0x68] sm:$0xff]  }
 0x17c   : > { %v2475_v24 = vadd.f32 %v9749_v47, %v11675_v8  ;;  %9935 = vmatprep.mubr.msk.bf16.mxu0 %vm631_vm2, %v3928_v27  ;;  %v1836_v1 = vpop.f32.mrf.mxu1  ;;  %v10549_v8 = vld [vmem:[%s14063_s2 + $0x70] sm:$0xff]   ;;  %v3934_v47 = vsel %vm1131_vm3, %v3931_v29, %v3933_v10  ;;  %v3936_v57 = vsel %vm1131_vm3, %v3933_v10, %v3935_v43 }
 0x17d   : > { %v2314_v18 = vpop.f32.mrf.mxu0  ;;  %v11885_v11 = vadd.f32 %v1836_v1, %v1461_v62  ;;  %9957 = vmatprep.subr.bf16.mxu1 %v10549_v8 }
 0x17e   : > { %v2473_v46 = vadd.f32 %v2314_v18, %v11686_v56  ;;  %v9740_v2 = vpop.f32.mrf.mxu1  ;;  %9958 = vmatpush3.bf16.msra.mxu1 %v10549_v8  ;;  %v14096_v18 = vld [vmem:[#allocation12_spill] sm:$0xff] }
 0x17f   : > { %v9750_v34 = vpop.f32.mrf.mxu0  ;;  %9959 = vmatprep.subr.bf16.mxu1 %v10550_v32  ;;  %v3937_v29 = vrot.slane %v14096_v18, 1 }
 0x180   : > { %v11895_v41 = vpop.f32.mrf.mxu1 }
 0x181   : > { %v2317_v6 = vpop.f32.mrf.mxu0 }
 0x182   : > { %v11893_v63 = vadd.f32 %v2317_v6, %v11700_v0  ;;  %v9743_v33 = vpop.f32.mrf.mxu1  ;;  %9960 = vmatpush3.bf16.msra.mxu1 %v10550_v32  ;;  %v14097_v32 = vrot.slane %v11555_v58, 1 }
 0x183   : > { %v9753_v56 = vpop.f32.mrf.mxu0  ;;  %9936 = vmatmul.mubr.msk.bf16.gmra.mxu0 %vm631_vm2, %v3930_v12  ;;  %v11902_v3 = vadd.f32 %v9743_v33, %v1467_v48  ;;  %v3939_v12 = vrot.slane %v11720_v42, 1 }
 0x184   : > { %v2479_v62 = vadd.f32 %v9753_v56, %v11711_v49  ;;  %9939 = vmatprep.mubr.msk.bf16.mxu0 %vm631_vm2, %v3932_v23  ;;  %v1852_v30 = vpop.f32.mrf.mxu1  ;;  %v3938_v56 = vsel %vm1131_vm3, %v3935_v43, %v3937_v29 }
 0x185   : > { %v2330_v13 = vpop.f32.mrf.mxu0  ;;  %v11905_v27 = vadd.f32 %v1852_v30, %v1465_v55  ;;  %v3940_v10 = vsel %vm1131_vm3, %v3937_v29, %v3939_v12 }
 0x186   : > { %v2477_v0 = vadd.f32 %v2330_v13, %v11723_v36  ;;  %v9744_v28 = vpop.f32.mrf.mxu1 }
 0x187   : > { %v9754_v39 = vpop.f32.mrf.mxu0 }
 0x188   : > { %v11915_v48 = vpop.f32.mrf.mxu1 }
 0x189   : > { %v2333_v49 = vpop.f32.mrf.mxu0 }
 0x18a   : > { %v11913_v26 = vadd.f32 %v2333_v49, %v11738_v54  ;;  %v9791_v1 = vpop.f32.mrf.mxu1 }
 0x18b   : > { %v9757_v36 = vpop.f32.mrf.mxu0  ;;  %9940 = vmatmul.mubr.msk.bf16.gmra.mxu0 %vm631_vm2, %v3934_v47  ;;  %v11922_v8 = vadd.f32 %v9791_v1, %v2475_v24  ;;  %v10551_v24 = vld [vmem:[%s14063_s2 + $0x60] sm:$0xff]  }
 0x18c   : > { %v2483_v55 = vadd.f32 %v9757_v36, %v11750_v20  ;;  %9943 = vmatprep.mubr.msk.bf16.mxu0 %vm631_vm2, %v3936_v57  ;;  %v2657_v2 = vpop.f32.mrf.mxu1  ;;  %9961 = vmatprep.subr.bf16.mxu1 %v10551_v24 }
 0x18d   : > { %v2346_v34 = vpop.f32.mrf.mxu0  ;;  %v11925_v23 = vadd.f32 %v2657_v2, %v2473_v46  ;;  %9962 = vmatpush3.bf16.msra.mxu1 %v10551_v24 }
 0x18e   : > { %v2481_v54 = vadd.f32 %v2346_v34, %v11758_v52  ;;  %v9792_v20 = vpop.f32.mrf.mxu1  ;;  %v3941_v52 = vrot.slane %v11747_v50, 1 }
 0x18f   : > { %v9758_v6 = vpop.f32.mrf.mxu0  ;;  %v10553_v20 = vld [vmem:[%s14063_s2 + $0xb8] sm:$0xff]  }
 0x190   : > { %v11931_v33 = vpop.f32.mrf.mxu1  ;;  %v3944_v36 = vsel %vm1131_vm3, %v3941_v52, %v14097_v32  ;;  %10051 = vmatprep.subr.bf16.mxu0 %v10553_v20 }
 0x191   : > { %v11928_v19 = vpop.f32.mrf.mxu0  ;;  %10052 = vmatpush3.bf16.msra.mxu0 %v10553_v20 }
 0x192   : > { %v9795_v46 = vpop.f32.mrf.mxu1 }
 0x193   : > { %v9761_v13 = vpop.f32.mrf.mxu0  ;;  %9944 = vmatmul.mubr.msk.bf16.gmra.mxu0 %vm631_vm2, %v3938_v56  ;;  %v11940_v30 = vadd.f32 %v9795_v46, %v2479_v62  ;;  %v10555_v46 = vld [vmem:[%s14063_s2 + $0xb0] sm:$0xff]  }
 0x194   : > { %v2487_v42 = vadd.f32 %v9761_v13, %v11779_v4  ;;  %9947 = vmatprep.mubr.msk.bf16.mxu0 %vm631_vm2, %v3940_v10  ;;  %v2673_v47 = vpop.f32.mrf.mxu1  ;;  %v3942_v4 = vsel %vm1131_vm3, %v3939_v12, %v3941_v52  ;;  %v14098_v13 = vld [vmem:[#allocation4_spill] sm:$0xff]  ;;  %10053 = vmatprep.subr.bf16.mxu0 %v10555_v46 }
 0x195   : > { %v2362_v43 = vpop.f32.mrf.mxu0  ;;  %v11943_v49 = vadd.f32 %v2673_v47, %v2477_v0  ;;  %10054 = vmatpush3.bf16.msra.mxu0 %v10555_v46 }
 0x196   : > { %v2485_v39 = vadd.f32 %v2362_v43, %v11784_v14  ;;  %v9796_v57 = vpop.f32.mrf.mxu1 }
 0x197   : > { %v9762_v28 = vpop.f32.mrf.mxu0 }
 0x198   : > { %v11951_v18 = vpop.f32.mrf.mxu1  ;;  %v10552_v28 = vld [vmem:[%s14063_s2 + $0x58] sm:$0xff]  }
 0x199   : > { %v11946_v50 = vpop.f32.mrf.mxu0  ;;  %9963 = vmatprep.subr.bf16.mxu1 %v10552_v28 }
 0x19a   : > { %v9799_v0 = vpop.f32.mrf.mxu1  ;;  %9964 = vmatpush3.bf16.msra.mxu1 %v10552_v28  ;;  %v10560_v28 = vld [vmem:[%s14063_s2 + $0x90] sm:$0xff]  }
 0x19b   : > { %v9765_v62 = vpop.f32.mrf.mxu0  ;;  %9948 = vmatmul.mubr.msk.bf16.gmra.mxu0 %vm631_vm2, %v3942_v4  ;;  %v11956_v1 = vadd.f32 %v9799_v0, %v2483_v55 }
 0x19c   : > { %v2491_v14 = vadd.f32 %v9765_v62, %v11804_v17  ;;  %9951 = vmatprep.mubr.msk.bf16.mxu0 %vm631_vm2, %v3944_v36  ;;  %v2689_v12 = vpop.f32.mrf.mxu1 }
 0x19d   : > { %v2378_v29 = vpop.f32.mrf.mxu0  ;;  %v11959_v58 = vadd.f32 %v2689_v12, %v2481_v54  ;;  %v10557_v12 = vld [vmem:[%s14063_s2 + $0xa0] sm:$0xff]  }
 0x19e   : > { %v2489_v34 = vadd.f32 %v2378_v29, %v11809_v37  ;;  %v9800_v6 = vpop.f32.mrf.mxu1 }
 0x19f   : > { %v9766_v2 = vpop.f32.mrf.mxu0 }
 0x1a0   : > { %v11966_v17 = vpop.f32.mrf.mxu1 }
 0x1a1   : > { %v11961_v56 = vpop.f32.mrf.mxu0 }
 0x1a2   : > { %v9803_v37 = vpop.f32.mrf.mxu1 }
 0x1a3   : > { %v9769_v10 = vpop.f32.mrf.mxu0  ;;  %9952 = vmatmul.mubr.msk.bf16.gmra.mxu0 %vm631_vm2, %v14098_v13  ;;  %v11971_v54 = vadd.f32 %v9803_v37, %v2487_v42 }
 0x1a4   : > { %v2495_v55 = vadd.f32 %v9769_v10, %v11825_v61  ;;  %v2705_v43 = vpop.f32.mrf.mxu1 }
 0x1a5   : > { %v2394_v52 = vpop.f32.mrf.mxu0  ;;  %v11980_v4 = vadd.f32 %v2705_v43, %v2485_v39 }
 0x1a6   : > { %v2493_v24 = vadd.f32 %v2394_v52, %v11828_v60  ;;  %v9804_v61 = vpop.f32.mrf.mxu1  ;;  %v10556_v60 = vld [vmem:[%s14063_s2 + $0xa8] sm:$0xff]  }
 0x1a7   : > { %v9770_v47 = vpop.f32.mrf.mxu0  ;;  %10055 = vmatprep.subr.bf16.mxu0 %v10556_v60 }
 0x1a8   : > { %v11987_v42 = vpop.f32.mrf.mxu1  ;;  %10056 = vmatpush3.bf16.msra.mxu0 %v10556_v60 }
 0x1a9   : > { %v11982_v57 = vpop.f32.mrf.mxu0  ;;  %10057 = vmatprep.subr.bf16.mxu0 %v10557_v12 }
 0x1aa   : > { %v9807_v62 = vpop.f32.mrf.mxu1 }
 0x1ab   : > { %v9773_v32 = vpop.f32.mrf.mxu0  ;;  %v11990_v0 = vadd.f32 %v9807_v62, %v2491_v14 }
 0x1ac   : > { %v2499_v36 = vadd.f32 %v9773_v32, %v11842_v44  ;;  %v2721_v2 = vpop.f32.mrf.mxu1  ;;  %v10554_v44 = vld [vmem:[%s14063_s2 + $0x50] sm:$0xff]   ;;  %10058 = vmatpush3.bf16.msra.mxu0 %v10557_v12  ;;  %v10558_v32 = vld [vmem:[%s14063_s2 + $0x48] sm:$0xff]  }
 0x1ad   : > { %v2410_v39 = vpop.f32.mrf.mxu0  ;;  %v11996_v20 = vadd.f32 %v2721_v2, %v2489_v34  ;;  %9965 = vmatprep.subr.bf16.mxu1 %v10554_v44 }
 0x1ae   : > { %v2497_v29 = vadd.f32 %v2410_v39, %v11845_v40  ;;  %v9808_v10 = vpop.f32.mrf.mxu1  ;;  %v10559_v40 = vld [vmem:[%s14063_s2 + $0x98] sm:$0xff]   ;;  %9966 = vmatpush3.bf16.msra.mxu1 %v10554_v44 }
 0x1af   : > { %v9774_v6 = vpop.f32.mrf.mxu0  ;;  %10059 = vmatprep.subr.bf16.mxu0 %v10559_v40  ;;  %9967 = vmatprep.subr.bf16.mxu1 %v10558_v32 }
 0x1b0   : > { %v12006_v14 = vpop.f32.mrf.mxu1  ;;  %10060 = vmatpush3.bf16.msra.mxu0 %v10559_v40  ;;  %v10566_v40 = vld [vmem:[%s14063_s2 + $0x80] sm:$0xff]  }
 0x1b1   : > { %v12001_v13 = vpop.f32.mrf.mxu0  ;;  %10061 = vmatprep.subr.bf16.mxu0 %v10560_v28 }
 0x1b2   : > { %v9811_v52 = vpop.f32.mrf.mxu1  ;;  %9968 = vmatpush3.bf16.msra.mxu1 %v10558_v32 }
 0x1b3   : > { %v9777_v37 = vpop.f32.mrf.mxu0  ;;  %v12009_v43 = vadd.f32 %v9811_v52, %v2495_v55 }
 0x1b4   : > { %v2503_v34 = vadd.f32 %v9777_v37, %v11862_v7  ;;  %v2737_v61 = vpop.f32.mrf.mxu1  ;;  %10062 = vmatpush3.bf16.msra.mxu0 %v10560_v28 }
 0x1b5   : > { %v2426_v46 = vpop.f32.mrf.mxu0  ;;  %v12018_v62 = vadd.f32 %v2737_v61, %v2493_v24 }
 0x1b6   : > { %v2501_v47 = vadd.f32 %v2426_v46, %v11869_v5  ;;  %v9812_v7 = vpop.f32.mrf.mxu1  ;;  %v10562_v5 = vld [vmem:[%s14063_s2 + $0x88] sm:$0xff]  }
 0x1b7   : > { %v9778_v60 = vpop.f32.mrf.mxu0  ;;  %10063 = vmatprep.subr.bf16.mxu0 %v10562_v5 }
 0x1b8   : > { %v12025_v55 = vpop.f32.mrf.mxu1  ;;  %10064 = vmatpush3.bf16.msra.mxu0 %v10562_v5 }
 0x1b9   : > { %v12020_v39 = vpop.f32.mrf.mxu0  ;;  %10065 = vmatprep.subr.bf16.mxu0 %v10566_v40 }
 0x1ba   : > { %v9815_v6 = vpop.f32.mrf.mxu1 }
 0x1bb   : > { %v9781_v12 = vpop.f32.mrf.mxu0  ;;  %v12028_v44 = vadd.f32 %v9815_v6, %v2499_v36 }
 0x1bc   : > { %v2507_v2 = vadd.f32 %v9781_v12, %v11882_v16  ;;  %v2753_v37 = vpop.f32.mrf.mxu1  ;;  %v10561_v16 = vld [vmem:[%s14063_s2 + $0x40] sm:$0xff]   ;;  %10066 = vmatpush3.bf16.msra.mxu0 %v10566_v40 }
 0x1bd   : > { %v2442_v24 = vpop.f32.mrf.mxu0  ;;  %v12034_v46 = vadd.f32 %v2753_v37, %v2497_v29  ;;  %9969 = vmatprep.subr.bf16.mxu1 %v10561_v16 }
 0x1be   : > { %v2505_v10 = vadd.f32 %v2442_v24, %v11885_v11  ;;  %v9816_v28 = vpop.f32.mrf.mxu1  ;;  %9970 = vmatpush3.bf16.msra.mxu1 %v10561_v16 }
 0x1bf   : > { %v9782_v52 = vpop.f32.mrf.mxu0 }
 0x1c0   : > { %v12041_v36 = vpop.f32.mrf.mxu1 }
 0x1c1   : > { %v12039_v61 = vpop.f32.mrf.mxu0  ;;  %14099 = vst [vmem:[#allocation8_spill] sm:$0xff] %v12041_v36 }
 0x1c2   : > { %v9819_v32 = vpop.f32.mrf.mxu1 }
 0x1c3   : > { %v9785_v11 = vpop.f32.mrf.mxu0  ;;  %v12044_v29 = vadd.f32 %v9819_v32, %v2503_v34 }
 0x1c4   : > { %v2511_v60 = vadd.f32 %v9785_v11, %v11902_v3  ;;  %v2769_v12 = vpop.f32.mrf.mxu1 }
 0x1c5   : > { %v2458_v7 = vpop.f32.mrf.mxu0  ;;  %v12047_v24 = vadd.f32 %v2769_v12, %v2501_v47  ;;  %v12062_v47 = vld [vmem:[%s14063_s2 + $0x38] sm:$0xff]  }
 0x1c6   : > { %v2509_v5 = vadd.f32 %v2458_v7, %v11905_v27  ;;  %v9820_v37 = vpop.f32.mrf.mxu1  ;;  %14102 = vst [vmem:[#allocation3_spill] sm:$0xff] %v12062_v47  ;;  %10003 = vmatprep.subr.bf16.mxu1 %v12062_v47 }
 0x1c7   : > { %v9786_v6 = vpop.f32.mrf.mxu0 }
 0x1c8   : > { %v12051_v40 = vpop.f32.mrf.mxu1 }
 0x1c9   : > { %v12049_v52 = vpop.f32.mrf.mxu0  ;;  %14101 = vst [vmem:[#allocation6_spill] sm:$0xff] %v12051_v40 }
 0x1ca   : > { %14100 = vst [vmem:[#allocation5_spill] sm:$0xff] %v12049_v52  ;;  %v9823_v3 = vpop.f32.mrf.mxu1 }
 0x1cb   : > { %v9833_v28 = vpop.f32.mrf.mxu0  ;;  %v12056_v36 = vadd.f32 %v9823_v3, %v2507_v2 }
 0x1cc   : > { %v12054_v16 = vadd.f32 %v9833_v28, %v11922_v8  ;;  %v2785_v27 = vpop.f32.mrf.mxu1 }
 0x1cd   : > { %v3095_v11 = vpop.f32.mrf.mxu0  ;;  %v12064_v7 = vadd.f32 %v2785_v27, %v2505_v10 }
 0x1ce   : > { %v3254_v34 = vadd.f32 %v3095_v11, %v11925_v23  ;;  %v9824_v12 = vpop.f32.mrf.mxu1 }
 0x1cf   : > { %v9834_v32 = vpop.f32.mrf.mxu0 }
 0x1d0   : > { %v12069_v8 = vpop.f32.mrf.mxu1 }
 0x1d1   : > { %v12066_v6 = vpop.f32.mrf.mxu0  ;;  %14103 = vst [vmem:[#allocation9_spill] sm:$0xff] %v12069_v8 }
 0x1d2   : > { %v9827_v23 = vpop.f32.mrf.mxu1 }
 0x1d3   : > { %v9837_v2 = vpop.f32.mrf.mxu0  ;;  %v12074_v3 = vadd.f32 %v9827_v23, %v2511_v60 }
 0x1d4   : > { %v12072_v37 = vadd.f32 %v9837_v2, %v11940_v30  ;;  %v2801_v32 = vpop.f32.mrf.mxu1 }
 0x1d5   : > { %v3111_v28 = vpop.f32.mrf.mxu0  ;;  %v12077_v27 = vadd.f32 %v2801_v32, %v2509_v5 }
 0x1d6   : > { %v3258_v11 = vadd.f32 %v3111_v28, %v11943_v49  ;;  %v9828_v12 = vpop.f32.mrf.mxu1 }
 0x1d7   : > { %v9838_v10 = vpop.f32.mrf.mxu0 }
 0x1d8   : > { %v12081_v47 = vpop.f32.mrf.mxu1 }
 0x1d9   : > { %v12079_v40 = vpop.f32.mrf.mxu0  ;;  %14105 = vst [vmem:[#allocation10_spill] sm:$0xff] %v12081_v47 }
 0x1da   : > { %14104 = vst [vmem:[#allocation7_spill] sm:$0xff] %v12079_v40  ;;  %v12086_v30 = vpop.f32.mrf.mxu1 }
 0x1db   : > { %v9841_v8 = vpop.f32.mrf.mxu0 }
 0x1dc   : > { %v12084_v52 = vadd.f32 %v9841_v8, %v11956_v1  ;;  %v3701_v23 = vpop.f32.mrf.mxu1  ;;  %v12101_v1 = vld [vmem:[%s14063_s2 + $0x138] sm:$0xff]  }
 0x1dd   : > { %v3127_v2 = vpop.f32.mrf.mxu0  ;;  %v12089_v28 = vadd.f32 %v3701_v23, %v3254_v34  ;;  %14109 = vst [vmem:[#allocation15_spill] sm:$0xff] %v12101_v1  ;;  %10147 = vmatprep.subr.bf16.mxu0 %v12101_v1 }
 0x1de   : > { %14106 = vst [vmem:[#allocation12_spill] sm:$0xff] %v12084_v52  ;;  %v3262_v60 = vadd.f32 %v3127_v2, %v11959_v58  ;;  %v9876_v5 = vpop.f32.mrf.mxu1 }
 0x1df   : > { %v9842_v49 = vpop.f32.mrf.mxu0 }
 0x1e0   : > { %v12093_v10 = vpop.f32.mrf.mxu1 }
 0x1e1   : > { %v12091_v32 = vpop.f32.mrf.mxu0 }
 0x1e2   : > { %14107 = vst [vmem:[#allocation4_spill] sm:$0xff] %v12091_v32  ;;  %v12103_v8 = vpop.f32.mrf.mxu1 }
 0x1e3   : > { %v9845_v12 = vpop.f32.mrf.mxu0  ;;  %14110 = vst [vmem:[#allocation16_spill] sm:$0xff] %v12103_v8 }
 0x1e4   : > { %v12096_v47 = vadd.f32 %v9845_v12, %v11971_v54  ;;  %v3717_v2 = vpop.f32.mrf.mxu1 }
 0x1e5   : > { %v3143_v58 = vpop.f32.mrf.mxu0  ;;  %v12107_v49 = vadd.f32 %v3717_v2, %v3258_v11 }
 0x1e6   : > { %14108 = vst [vmem:[#allocation14_spill] sm:$0xff] %v12096_v47  ;;  %v3266_v34 = vadd.f32 %v3143_v58, %v11980_v4  ;;  %v9880_v5 = vpop.f32.mrf.mxu1 }
 0x1e7   : > { %v9846_v23 = vpop.f32.mrf.mxu0 }
 0x1e8   : > { %v12111_v54 = vpop.f32.mrf.mxu1 }
 0x1e9   : > { %v12109_v52 = vpop.f32.mrf.mxu0 }
 0x1ea   : > { %14111 = vst [vmem:[#allocation17_spill] sm:$0xff] %v12109_v52  ;;  %v12116_v32 = vpop.f32.mrf.mxu1 }
 0x1eb   : > { %v9849_v12 = vpop.f32.mrf.mxu0  ;;  %14113 = vst [vmem:[#allocation19_spill] sm:$0xff] %v12116_v32 }
 0x1ec   : > { %v12114_v47 = vadd.f32 %v9849_v12, %v11990_v0  ;;  %v3733_v58 = vpop.f32.mrf.mxu1 }
 0x1ed   : > { %v3159_v40 = vpop.f32.mrf.mxu0  ;;  %v12119_v8 = vadd.f32 %v3733_v58, %v3262_v60 }
 0x1ee   : > { %14112 = vst [vmem:[#allocation18_spill] sm:$0xff] %v12114_v47  ;;  %v3270_v4 = vadd.f32 %v3159_v40, %v11996_v20  ;;  %v9884_v11 = vpop.f32.mrf.mxu1 }
 0x1ef   : > { %v9850_v1 = vpop.f32.mrf.mxu0  ;;  %14114 = vst [vmem:[#allocation20_spill] sm:$0xff] %v12119_v8 }
 0x1f0   : > { %v12123_v23 = vpop.f32.mrf.mxu1 }
 0x1f1   : > { %v12121_v2 = vpop.f32.mrf.mxu0 }
 0x1f2   : > { %v12128_v0 = vpop.f32.mrf.mxu1 }
 0x1f3   : > { %v9853_v5 = vpop.f32.mrf.mxu0  ;;  %14116 = vst [vmem:[#allocation22_spill] sm:$0xff] %v12128_v0 }
 0x1f4   : > { %v12126_v52 = vadd.f32 %v9853_v5, %v12009_v43  ;;  %v3749_v32 = vpop.f32.mrf.mxu1 }
 0x1f5   : > { %v3175_v12 = vpop.f32.mrf.mxu0  ;;  %v12131_v40 = vadd.f32 %v3749_v32, %v3266_v34 }
 0x1f6   : > { %14115 = vst [vmem:[#allocation21_spill] sm:$0xff] %v12126_v52  ;;  %v3274_v47 = vadd.f32 %v3175_v12, %v12018_v62  ;;  %v9888_v60 = vpop.f32.mrf.mxu1 }
 0x1f7   : > { %v9854_v20 = vpop.f32.mrf.mxu0  ;;  %14117 = vst [vmem:[#allocation23_spill] sm:$0xff] %v12131_v40 }
 0x1f8   : > { %v12135_v58 = vpop.f32.mrf.mxu1 }
 0x1f9   : > { %v12133_v1 = vpop.f32.mrf.mxu0 }
 0x1fa   : > { %v12140_v43 = vpop.f32.mrf.mxu1 }
 0x1fb   : > { %v9857_v11 = vpop.f32.mrf.mxu0  ;;  %14119 = vst [vmem:[#allocation25_spill] sm:$0xff] %v12140_v43 }
 0x1fc   : > { %v12138_v8 = vadd.f32 %v9857_v11, %v12028_v44  ;;  %v3765_v0 = vpop.f32.mrf.mxu1 }
 0x1fd   : > { %v3191_v5 = vpop.f32.mrf.mxu0  ;;  %v12143_v12 = vadd.f32 %v3765_v0, %v3270_v4 }
 0x1fe   : > { %14118 = vst [vmem:[#allocation24_spill] sm:$0xff] %v12138_v8  ;;  %v3278_v52 = vadd.f32 %v3191_v5, %v12034_v46  ;;  %v9892_v32 = vpop.f32.mrf.mxu1 }
 0x1ff   : > { %v9858_v62 = vpop.f32.mrf.mxu0  ;;  %14120 = vst [vmem:[#allocation26_spill] sm:$0xff] %v12143_v12 }
 0x200   : > { %v12147_v20 = vpop.f32.mrf.mxu1 }
 0x201   : > { %v12145_v34 = vpop.f32.mrf.mxu0 }
 0x202   : > { %v12152_v44 = vpop.f32.mrf.mxu1 }
 0x203   : > { %v9861_v60 = vpop.f32.mrf.mxu0 }
 0x204   : > { %v12150_v40 = vadd.f32 %v9861_v60, %v12044_v29  ;;  %v3781_v43 = vpop.f32.mrf.mxu1 }
 0x205   : > { %v3207_v11 = vpop.f32.mrf.mxu0  ;;  %v12155_v5 = vadd.f32 %v3781_v43, %v3274_v47 }
 0x206   : > { %14121 = vst [vmem:[#allocation27_spill] sm:$0xff] %v12150_v40  ;;  %v3282_v8 = vadd.f32 %v3207_v11, %v12047_v24  ;;  %v9896_v4 = vpop.f32.mrf.mxu1 }
 0x207   : > { %v9862_v46 = vpop.f32.mrf.mxu0  ;;  %14122 = vst [vmem:[#allocation28_spill] sm:$0xff] %v12155_v5 }
 0x208   : > { %v12159_v62 = vpop.f32.mrf.mxu1  ;;  %v4377_v46 = vlaneseq }
 0x209   : > { %v12157_v0 = vpop.f32.mrf.mxu0 }
 0x20a   : > { %v12164_v29 = vpop.f32.mrf.mxu1 }
 0x20b   : > { %v9865_v32 = vpop.f32.mrf.mxu0 }
 0x20c   : > { %v12162_v12 = vadd.f32 %v9865_v32, %v12056_v36  ;;  %v3797_v24 = vpop.f32.mrf.mxu1  ;;  %v12178_v32 = vshrl.u32 %v4377_v46, 7  ;;  %v1884_v46 = vadd.f32 %v11817_v9, %v11763_v38  ;;  %v1900_v38 = vadd.f32 %v11895_v41, %v11852_v35  ;;  %v12236_v41 = vld [vmem:[%s14064_s3] ss:$0 sm:$0xff] }
 0x20d   : > { %v3223_v60 = vpop.f32.mrf.mxu0  ;;  %v12169_v47 = vadd.f32 %v3797_v24, %v3278_v52  ;;  %v14128_v24 = vld [vmem:[#allocation11_spill] sm:$0xff]  ;;  %v1904_v9 = vadd.f32 %v11915_v48, %v11873_v15  ;;  %v3862_v35 = vadd.f32 %v12086_v30, %v12054_v16 }
 0x20e   : > { %14123 = vst [vmem:[#allocation29_spill] sm:$0xff] %v12162_v12  ;;  %v12167_v40 = vadd.f32 %v3223_v60, %v12064_v7  ;;  %v9900_v43 = vpop.f32.mrf.mxu1  ;;  %v12184_v7 = vstv %s12174_s22  ;;  %vm4401_vm7 = vcmp.ge.s32.totalorder %v12178_v32, 1  ;;  %s14298_s22 = smov (!%p310_p7, %s12174_s22), 15 }
 0x20f   : > { %v9866_v11 = vpop.f32.mrf.mxu0  ;;  %14124 = vst [vmem:[#allocation30_spill] sm:$0xff] %v12169_v47  ;;  %v14129_v47 = vld [vmem:[#allocation13_spill] sm:$0xff]  ;;  %vm4414_vm8 = vcmp.ge.s32.totalorder %v12184_v7, 0  ;;  %vm4464_vm10 = vcmp.lt.s32.totalorder %v12184_v7, 16  ;;  %s8305_s12 = sshll.u32 %s14298_s22, 1 }
 0x210   : > { %v12176_v5 = vpop.f32.mrf.mxu1  ;;  %v1876_v11 = vadd.f32 %v11767_v53, %v14128_v24  ;;  %v1888_v53 = vadd.f32 %v11835_v25, %v11789_v31  ;;  %v2817_v24 = vadd.f32 %v11931_v33, %v11893_v63  ;;  %s314_s16 = sadd.s32 %s8306_s13, %s8305_s12 }
 0x211   : > { %v12171_v4 = vpop.f32.mrf.mxu0  ;;  %14126 = vst [vmem:[#allocation32_spill] sm:$0xff] %v12176_v5  ;;  %v1880_v5 = vadd.f32 %v11794_v45, %v14129_v47  ;;  %v1896_v45 = vadd.f32 %v11875_v22, %v11833_v59  ;;  %v12223_v59 = vadd.f32 %v11951_v18, %v11913_v26  ;;  %v4384_v26 = vadd.s32 2, %v12184_v7  ;;  %v12252_v18 = vld [vmem:[%s14065_s4] ss:$0 sm:$0xff]  ;;  %s8307_s25 = sshll.u32 %s314_s16, 2 }
 0x212   : > { %14125 = vst [vmem:[#allocation31_spill] sm:$0xff] %v12171_v4  ;;  %v12186_v60 = vpop.f32.mrf.mxu1  ;;  %v3255_v30 = vadd.f32 %v12066_v6, %v2817_v24  ;;  %s13963_s18 = scalar_lea.vmem %s14068_s7, %s8307_s25 }
 0x213   : > { %v9869_v36 = vpop.f32.mrf.mxu0  ;;  %v12272_v6 = vadd.s32 4294967295, %v4384_v26 }
 0x214   : > { %v12181_v12 = vadd.f32 %v9869_v36, %v12074_v3  ;;  %v3813_v4 = vpop.f32.mrf.mxu1  ;;  %v12198_v36 = vadd.s32 16, %v12178_v32 }
 0x215   : > { %v3239_v52 = vpop.f32.mrf.mxu0  ;;  %v12209_v47 = vadd.f32 %v3813_v4, %v3282_v8  ;;  %vm4415_vm13 = vcmp.ge.s32.totalorder %v12272_v6, 0  ;;  %vm4465_vm0 = vcmp.lt.s32.totalorder %v12272_v6, 16 }
 0x216   : > { %14127 = vst [vmem:[#allocation33_spill] sm:$0xff] %v12181_v12  ;;  %v12191_v43 = vadd.f32 %v3239_v52, %v12077_v27  ;;  %v12201_v12 = vadd.s32 4294967295, %v12184_v7  ;;  %v1892_v27 = vadd.f32 %v11854_v51, %v11814_v21  ;;  %v2482_v52 = vadd.f32 %v11928_v19, %v1876_v11  ;;  %v9904_v31 = vpop.f32.mrf.mxu1 }
 0x217   : > { %v9870_v3 = vpop.f32.mrf.mxu0  ;;  %v2486_v21 = vadd.f32 %v11946_v50, %v1880_v5  ;;  %v2490_v51 = vadd.f32 %v11961_v56, %v1884_v46  ;;  %vm4407_vm4 = vcmp.le.s32.totalorder %v12198_v36, 16  ;;  %v2494_v19 = vadd.f32 %v11982_v57, %v1888_v53 }
 0x218   : > { %v12229_v15 = vadd.f32 %v11966_v17, %v2482_v52  ;;  %v12231_v22 = vpop.f32.mrf.mxu1  ;;  %vm4413_vm5 = vcmp.ge.s32.totalorder %v12201_v12, 0  ;;  %vm4463_vm6 = vcmp.lt.s32.totalorder %v12201_v12, 16  ;;  %v4385_v17 = vadd.s32 3, %v12184_v7  ;;  %vm12347_vm15 = vmand %vm4407_vm4, %vm4414_vm8 }
 0x219   : > { %v12218_v25 = vpop.f32.mrf.mxu0  ;;  %v12245_v33 = vadd.f32 %v11987_v42, %v2486_v21  ;;  %v2498_v16 = vadd.f32 %v12001_v13, %v1892_v27  ;;  %vm12263_vm9 = vmand %vm4407_vm4, %vm4413_vm5  ;;  %v12270_v5 = vadd.f32 %v12006_v14, %v2490_v51  ;;  %v4386_v11 = vadd.s32 4, %v12184_v7 }
 0x21a   : > { %v12247_v50 = vpop.f32.mrf.mxu1  ;;  %v4387_v46 = vadd.s32 5, %v12184_v7  ;;  %v3861_v3 = vadd.f32 %v12093_v10, %v3255_v30  ;;  %v2502_v14 = vadd.f32 %v12020_v39, %v1896_v45  ;;  %v12284_v52 = vadd.f32 %v12025_v55, %v2494_v19  ;;  %vm12290_vm11 = vmand %vm12263_vm9, %vm4463_vm6  ;;  %v14138_v30 = vld [vmem:[#allocation5_spill] sm:$0xff] }
 0x21b   : > { %v9917_v63 = vpop.f32.mrf.mxu0  ;;  %v12294_v21 = vadd.s32 4294967295, %v4385_v17  ;;  %v2506_v51 = vadd.f32 %v12039_v61, %v1900_v38  ;;  %vm12303_vm12 = vmand %vm4401_vm7, %vm4413_vm5  ;;  %v12315_v38 = vadd.s32 4294967295, %v4386_v11  ;;  %v4389_v17 = vadd.s32 7, %v12184_v7 }
 0x21c   : > { %v4205_v48 = vadd.f32 %v9917_v63, %v3862_v35  ;;  %v3829_v13 = vpop.f32.mrf.mxu1  ;;  %v14136_v63 = vld [vmem:[#allocation8_spill] sm:$0xff]  ;;  %vm12332_vm14 = vmand %vm12303_vm12, %vm4463_vm6 }
 0x21d   : > { %v4044_v56 = vpop.f32.mrf.mxu0  ;;  %v12279_v27 = vadd.f32 %v3829_v13, %v12167_v40  ;;  %v4388_v40 = vadd.s32 6, %v12184_v7  ;;  %v12308_v26 = vadd.f32 %v14136_v63, %v2498_v16  ;;  %v14139_v13 = vld [vmem:[#allocation6_spill] sm:$0xff]  ;;  %vm12360_vm2 = vmand %vm4413_vm5, %vm4463_vm6  ;;  %vm4416_vm9 = vcmp.ge.s32.totalorder %v12294_v21, 0 }
 0x21e   : > { %v4252_v57 = vmul.f32 %v12236_v41, %v4205_v48  ;;  %v4203_v8 = vadd.f32 %v4044_v56, %v12089_v28  ;;  %v9908_v10 = vpop.f32.mrf.mxu1  ;;  %v14137_v48 = vld [vmem:[#allocation16_spill] sm:$0xff]  ;;  %vm12385_vm5 = vmand %vm12347_vm15, %vm4464_vm10 }
 0x21f   : > { %v9918_v4 = vpop.f32.mrf.mxu0  ;;  %v3866_v19 = vadd.f32 %v14137_v48, %v12072_v37  ;;  %v12325_v37 = vadd.f32 %v14139_v13, %v2502_v14  ;;  %v14142_v14 = vld [vmem:[#allocation7_spill] sm:$0xff]  ;;  %v14149_v13 = vld [vmem:[#allocation4_spill] sm:$0xff]  ;;  %vm12398_vm6 = vmand %vm4401_vm7, %vm4414_vm8 }
 0x220   : > { %v4299_v53 = vadd.f32 %v12252_v18, %v4252_v57  ;;  %v4250_v28 = vmul.f32 %v12236_v41, %v4203_v8  ;;  %v12312_v56 = vpop.f32.mrf.mxu1  ;;  %v2510_v57 = vadd.f32 %v14138_v30, %v1904_v9  ;;  %v12322_v8 = vadd.s32 4294967295, %v4387_v46  ;;  %vm12435_vm12 = vmand %vm4407_vm4, %vm4415_vm13 }
 0x221   : > { %v4047_v31 = vpop.f32.mrf.mxu0  ;;  %v10759_v4 = vmov 0.0   ;;  %v12338_v46 = vadd.s32 4294967295, %v4388_v40  ;;  %v3259_v24 = vadd.f32 %v14142_v14, %v12223_v59  ;;  %v14145_v40 = vld [vmem:[#allocation9_spill] sm:$0xff]  ;;  %vm12453_vm15 = vmand %vm4414_vm8, %vm4464_vm10 }
 0x222   : > { %v4339_v39 = vmax.f32 %v4299_v53, 0.0  ;;  %v4297_v55 = vadd.f32 %v12252_v18, %v4250_v28  ;;  %v4204_v35 = vadd.f32 %v4047_v31, %v3861_v3  ;;  %v12336_v9 = vpop.f32.mrf.mxu1  ;;  %vm12479_vm8 = vmand %vm12435_vm12, %vm4465_vm0 }
 0x223   : > { %v9921_v61 = vpop.f32.mrf.mxu0  ;;  %vm12549_vm12 = vmand %vm4415_vm13, %vm4465_vm0 }
 0x224   : > { %v4595_v42 = vsel %vm12290_vm11, %v4339_v39, 0.0  ;;  %v4251_v16 = vmul.f32 %v12236_v41, %v4204_v35  ;;  %v4209_v53 = vadd.f32 %v9921_v61, %v3866_v19  ;;  %v4337_v10 = vmax.f32 %v4297_v55, 0.0  ;;  %v3845_v63 = vpop.f32.mrf.mxu1  ;;  %vm12424_vm11 = vmand %vm12398_vm6, %vm4464_vm10 }
 0x225   : > { %v9023_v3 = vpack.c.bf16 %v10759_v4, %v4595_v42  ;;  %v4060_v28 = vpop.f32.mrf.mxu0  ;;  %v12354_v35 = vadd.f32 %v14145_v40, %v2506_v51  ;;  %v12365_v19 = vadd.s32 4294967295, %v4389_v17  ;;  %v3865_v51 = vadd.f32 %v12111_v54, %v3259_v24  ;;  %v14148_v42 = vld [vmem:[#allocation10_spill] sm:$0xff]  ;;  %v14156_v40 = vld [vmem:[#allocation17_spill] sm:$0xff] }
 0x226   : > { %v4298_v31 = vadd.f32 %v12252_v18, %v4251_v16  ;;  %v4207_v45 = vadd.f32 %v4060_v28, %v12107_v49  ;;  %v4256_v55 = vmul.f32 %v12236_v41, %v4209_v53  ;;  %v4390_v49 = vadd.s32 8, %v12184_v7  ;;  %v14150_v53 = vld [vmem:[#allocation12_spill] sm:$0xff]  ;;  %v14151_v28 = vld [vmem:[#allocation19_spill] sm:$0xff]  ;;  %v14163_v54 = vld [vmem:[#allocation18_spill] sm:$0xff] }
 0x227   : > { %9146 = vst [vmem:[#allocation2 + $0x8] sm:$0xff] %v9023_v3   ;;  %v9922_v48 = vpop.f32.mrf.mxu0  ;;  %v12370_v30 = vadd.f32 %v3845_v63, %v12191_v43  ;;  %v12374_v16 = vadd.f32 %v14148_v42, %v2510_v57  ;;  %v3263_v3 = vadd.f32 %v14149_v13, %v12229_v15  ;;  %v3870_v17 = vadd.f32 %v14151_v28, %v14150_v53  ;;  %v9912_v43 = vpop.f32.mrf.mxu1  ;;  %v14157_v13 = vld [vmem:[#allocation14_spill] sm:$0xff] }
 0x228   : > { %v4338_v61 = vmax.f32 %v4298_v31, 0.0  ;;  %v4254_v12 = vmul.f32 %v12236_v41, %v4207_v45  ;;  %v4303_v14 = vadd.f32 %v12252_v18, %v4256_v55  ;;  %v4593_v57 = vsel %vm12332_vm14, %v4337_v10, 0.0  ;;  %v14164_v43 = vld [vmem:[#allocation25_spill] sm:$0xff] }
 0x229   : > { %v4063_v24 = vpop.f32.mrf.mxu0  ;;  %v3267_v55 = vadd.f32 %v14156_v40, %v12245_v33  ;;  %v12405_v59 = vadd.s32 4294967295, %v4390_v49  ;;  %v3271_v48 = vadd.f32 %v12121_v2, %v12270_v5  ;;  %v12411_v42 = vadd.s32 9, %v12184_v7  ;;  %v14158_v33 = vld [vmem:[#allocation22_spill] sm:$0xff]  ;;  %v14168_v40 = vld [vmem:[#allocation21_spill] sm:$0xff] }
 0x22a   : > { %v4594_v15 = vsel %vm12360_vm2, %v4338_v61, 0.0  ;;  %v4301_v31 = vadd.f32 %v12252_v18, %v4254_v12  ;;  %v4208_v45 = vadd.f32 %v4063_v24, %v3865_v51  ;;  %v4343_v11 = vmax.f32 %v4303_v14, 0.0  ;;  %vm12495_vm2 = vmand %vm4401_vm7, %vm4415_vm13 }
 0x22b   : > { %v9019_v63 = vpack.c.bf16 %v4594_v15, %v4593_v57  ;;  %v9925_v10 = vpop.f32.mrf.mxu0  ;;  %v3869_v51 = vadd.f32 %v12123_v23, %v3263_v3  ;;  %v3874_v53 = vadd.f32 %v14158_v33, %v14157_v13  ;;  %v3275_v28 = vadd.f32 %v12133_v1, %v12284_v52  ;;  %v14174_v13 = vld [vmem:[#allocation31_spill] sm:$0xff]  ;;  %vm4435_vm13 = vmand %vm4401_vm7, %vm4416_vm9 }
 0x22c   : > { %v4255_v61 = vmul.f32 %v12236_v41, %v4208_v45  ;;  %v4213_v12 = vadd.f32 %v9925_v10, %v3870_v17  ;;  %v4599_v49 = vsel %vm12385_vm5, %v4343_v11, 0.0  ;;  %v4341_v3 = vmax.f32 %v4301_v31, 0.0  ;;  %v14167_v31 = vld [vmem:[#allocation20_spill] sm:$0xff]  ;;  %vm12519_vm5 = vmand %vm12495_vm2, %vm4465_vm0 }
 0x22d   : > { %9020 = vst [vmem:[#allocation2] sm:$0xff] %v9019_v63   ;;  %v4076_v5 = vpop.f32.mrf.mxu0  ;;  %v9032_v23 = vpack.c.bf16 %v10759_v4, %v4599_v49  ;;  %vm4466_vm14 = vcmp.lt.s32.totalorder %v12294_v21, 16  ;;  %v12441_v14 = vadd.f32 %v12135_v58, %v3267_v55  ;;  %v12445_v24 = vadd.f32 %v14164_v43, %v14163_v54  ;;  %v14169_v11 = vld [vmem:[#allocation24_spill] sm:$0xff] }
 0x22e   : > { %v4302_v17 = vadd.f32 %v12252_v18, %v4255_v61  ;;  %v4260_v1 = vmul.f32 %v12236_v41, %v4213_v12  ;;  %v3279_v57 = vadd.f32 %v12145_v34, %v12308_v26  ;;  %v4211_v39 = vadd.f32 %v4076_v5, %v14167_v31  ;;  %v12484_v61 = vld [vmem:[#allocation2 + $0x8] sm:$0xff]  }
 0x22f   : > { %v9926_v45 = vpop.f32.mrf.mxu0  ;;  %v12459_v58 = vadd.f32 %v12147_v20, %v3271_v48  ;;  %v12463_v55 = vadd.f32 %v12152_v44, %v14168_v40  ;;  %9148 = vst [vmem:[#allocation2 + $0x18] sm:$0xff] %v9032_v23   ;;  %v3283_v7 = vadd.f32 %v12157_v0, %v12325_v37  ;;  %v12469_v63 = vadd.f32 %v12159_v62, %v3275_v28  ;;  %v14175_v28 = vld [vmem:[#allocation32_spill] sm:$0xff] }
 0x230   : > { %v4342_v34 = vmax.f32 %v4302_v17, 0.0  ;;  %v4307_v26 = vadd.f32 %v12252_v18, %v4260_v1  ;;  %v12473_v10 = vadd.f32 %v12164_v29, %v14169_v11  ;;  %v4258_v44 = vmul.f32 %v12236_v41, %v4211_v39 }
 0x231   : > { %v4079_v48 = vpop.f32.mrf.mxu0  ;;  %vm4417_vm10 = vcmp.ge.s32.totalorder %v12315_v38, 0  ;;  %v4597_v0 = vsel %vm12424_vm11, %v4341_v3, 0.0  ;;  %v12501_v33 = vadd.f32 %v14174_v13, %v12354_v35  ;;  %v12504_v49 = vadd.f32 %v14175_v28, %v3279_v57  ;;  %v14176_v3 = vld [vmem:[#allocation27_spill] sm:$0xff]  ;;  %vm12533_vm11 = vmand %vm4407_vm4, %vm4416_vm9 }
 0x232   : > { %v4598_v62 = vsel %vm12453_vm15, %v4342_v34, 0.0  ;;  %v4347_v29 = vmax.f32 %v4307_v26, 0.0  ;;  %v4212_v12 = vadd.f32 %v4079_v48, %v3869_v51  ;;  %v4305_v5 = vadd.f32 %v12252_v18, %v4258_v44  ;;  %v14181_v26 = vld [vmem:[#allocation23_spill] sm:$0xff]  ;;  %vm4487_vm15 = vmand %vm12533_vm11, %vm4466_vm14 }
 0x233   : > { %v9028_v2 = vpack.c.bf16 %v4598_v62, %v4597_v0  ;;  %v9929_v23 = vpop.f32.mrf.mxu0  ;;  %v12509_v17 = vadd.f32 %v12186_v60, %v14176_v3  ;;  %vm4467_vm6 = vcmp.lt.s32.totalorder %v12315_v38, 16  ;;  %v12540_v44 = vadd.f32 %v12218_v25, %v12374_v16  ;;  %vm12591_vm2 = vmand %vm4407_vm4, %vm4417_vm10 }
 0x234   : > { %v4603_v1 = vsel %vm12479_vm8, %v4347_v29, 0.0  ;;  %v4259_v51 = vmul.f32 %v12236_v41, %v4212_v12  ;;  %v4217_v52 = vadd.f32 %v9929_v23, %v3874_v53  ;;  %v4833_v54 = vld [vmem:[#allocation2] sm:$0xf]  ;;  %v4834_v35 = vld [vmem:[#allocation2 + $0x4] sm:$0xf]  ;;  %v4345_v57 = vmax.f32 %v4305_v5, 0.0  ;;  %vm12577_vm8 = vmand %vm4435_vm13, %vm4466_vm14 }
 0x235   : > { %9147 = vst [vmem:[#allocation2 + $0x10] sm:$0xff] %v9028_v2   ;;  %v9041_v43 = vpack.c.bf16 %v10759_v4, %v4603_v1  ;;  %v4092_v60 = vpop.f32.mrf.mxu0  ;;  %v12523_v31 = vcombine.low %v4833_v54, %v4834_v35  ;;  %v5532_v39 = vld [vmem:[#allocation2] sm:$0xe]  ;;  %v4990_v53 = vshll.u32 %v12484_v61, 16  ;;  %v12543_v48 = vadd.f32 %v12231_v22, %v3283_v7  ;;  %vm12601_vm11 = vmand %vm4401_vm7, %vm4417_vm10 }
 0x236   : > { %v4306_v45 = vadd.f32 %v12252_v18, %v4259_v51  ;;  %v4264_v40 = vmul.f32 %v12236_v41, %v4217_v52  ;;  %v4215_v11 = vadd.f32 %v4092_v60, %v14181_v26  ;;  %v8719_v20 = vcombine.low %v5532_v39, %v4834_v35  ;;  %v12555_v12 = vld [vmem:[#allocation2 + $0x18] sm:$0xff]   ;;  %vm12622_vm13 = vmand %vm4416_vm9, %vm4466_vm14 }
 0x237   : > { %9150 = vst [vmem:[#allocation2 + $0x28] sm:$0xff] %v9041_v43   ;;  %v9930_v62 = vpop.f32.mrf.mxu0  ;;  %v5554_v29 = vrot.slane %v12484_v61, 1  ;;  %v4985_v37 = vshll.u32 %v12523_v31, 16  ;;  %vm4418_vm0 = vcmp.ge.s32.totalorder %v12322_v8, 0  ;;  %v4601_v7 = vsel %vm12519_vm5, %v4345_v57, 0.0  ;;  %vm12635_vm9 = vmand %vm12591_vm2, %vm4467_vm6 }
 0x238   : > { %v4346_v25 = vmax.f32 %v4306_v45, 0.0  ;;  %v4311_v22 = vadd.f32 %v12252_v18, %v4264_v40  ;;  %v4262_v16 = vmul.f32 %v12236_v41, %v4215_v11  ;;  %v5553_v6 = vrot.slane %v8719_v20, 1  ;;  %vm12644_vm14 = vmand %vm12601_vm11, %vm4467_vm6 }
 0x239   : > { %v4095_v13 = vpop.f32.mrf.mxu0  ;;  %v4983_v28 = vshrl.u32 %v12523_v31, 16  ;;  %v4987_v2 = vrot.slane %v4985_v37, 1  ;;  %v4992_v5 = vrot.slane %v4990_v53, 1  ;;  %v5006_v15 = vshll.u32 %v12555_v12, 16 }
 0x23a   : > { %v4602_v23 = vsel %vm12549_vm12, %v4346_v25, 0.0  ;;  %v4351_v3 = vmax.f32 %v4311_v22, 0.0  ;;  %v4309_v1 = vadd.f32 %v12252_v18, %v4262_v16  ;;  %v4216_v51 = vadd.f32 %v4095_v13, %v12441_v14  ;;  %v14190_v25 = vld [vmem:[#allocation26_spill] sm:$0xff] }
 0x23b   : > { %v9037_v52 = vpack.c.bf16 %v4602_v23, %v4601_v7  ;;  %v5555_v35 = vsel %vm1131_vm3, %v5553_v6, %v5554_v29  ;;  %v9933_v43 = vpop.f32.mrf.mxu0  ;;  %v4988_v57 = vor.u32 %v4987_v2, %v4983_v28  ;;  %vm4468_vm5 = vcmp.lt.s32.totalorder %v12322_v8, 16  ;;  %v12616_v6 = vld [vmem:[%s14063_s2 + $0x130] sm:$0xff]  }
 0x23c   : > { %v4607_v60 = vsel %vm4487_vm15, %v4351_v3, 0.0  ;;  %v4349_v39 = vmax.f32 %v4309_v1, 0.0  ;;  %v4263_v53 = vmul.f32 %v12236_v41, %v4216_v51  ;;  %10067 = vmatprep.mubr.bf16.mxu0 %v5555_v35  ;;  %v4221_v14 = vadd.f32 %v9933_v43, %v12445_v24  ;;  %v10567_v20 = vld [vmem:[#allocation2 + $0x10] sm:$0xff]   ;;  %vm12665_vm15 = vmand %vm4417_vm10, %vm4467_vm6 }
 0x23d   : > { %9149 = vst [vmem:[#allocation2 + $0x20] sm:$0xff] %v9037_v52   ;;  %v9050_v40 = vpack.c.bf16 %v10759_v4, %v4607_v60  ;;  %v4108_v34 = vpop.f32.mrf.mxu0  ;;  %v4993_v26 = vsel %vm466_vm1, %v4988_v57, %v4992_v5  ;;  %v4994_v11 = vshrl.u32 %v12484_v61, 16  ;;  %v5558_v0 = vrot.slane %v12555_v12, 1  ;;  %vm12691_vm10 = vmand %vm4401_vm7, %vm4418_vm0 }
 0x23e   : > { %v4310_v62 = vadd.f32 %v12252_v18, %v4263_v53  ;;  %v4268_v37 = vmul.f32 %v12236_v41, %v4221_v14  ;;  %v4219_v22 = vadd.f32 %v4108_v34, %v14190_v25  ;;  %9971 = vmatprep.mubr.bf16.mxu1 %v4993_v26  ;;  %vm4419_vm12 = vcmp.ge.s32.totalorder %v12338_v46, 0  ;;  %v12626_v1 = vld [vmem:[#allocation2 + $0x28] sm:$0xff]   ;;  %v10571_v53 = vld [vmem:[%s14063_s2 + $0x30] sm:$0xff]   ;;  %vm12736_vm11 = vmand %vm12691_vm10, %vm4468_vm5 }
 0x23f   : > { %v5010_v16 = vshrl.u32 %v12555_v12, 16  ;;  %9152 = vst [vmem:[#allocation2 + $0x38] sm:$0xff] %v9050_v40   ;;  %v4996_v13 = vor.u32 %v4994_v11, %v4992_v5  ;;  %v9934_v28 = vpop.f32.mrf.mxu0  ;;  %v5556_v2 = vrot.slane %v10567_v20, 1  ;;  %v4998_v23 = vshll.u32 %v10567_v20, 16 }
 0x240   : > { %v5008_v3 = vrot.slane %v5006_v15, 1  ;;  %v4605_v51 = vsel %vm12577_vm8, %v4349_v39, 0.0  ;;  %v4350_v52 = vmax.f32 %v4310_v62, 0.0  ;;  %v4315_v35 = vadd.f32 %v12252_v18, %v4268_v37  ;;  %vm12673_vm8 = vmand %vm4407_vm4, %vm4418_vm0  ;;  %v10585_v62 = vld [vmem:[%s14063_s2 + $0x128] sm:$0xff]   ;;  %v14204_v28 = vld [vmem:[#allocation29_spill] sm:$0xff] }
 0x241   : > { %v4266_v5 = vmul.f32 %v12236_v41, %v4219_v22  ;;  %v4111_v43 = vpop.f32.mrf.mxu0  ;;  %v5557_v57 = vsel %vm1131_vm3, %v5554_v29, %v5556_v2  ;;  %v5559_v15 = vsel %vm1131_vm3, %v5556_v2, %v5558_v0  ;;  %v5000_v60 = vrot.slane %v4998_v23, 1  ;;  %vm12722_vm2 = vmand %vm12673_vm8, %vm4468_vm5 }
 0x242   : > { %v5002_v39 = vshrl.u32 %v10567_v20, 16  ;;  %v4606_v14 = vsel %vm12622_vm13, %v4350_v52, 0.0  ;;  %v4355_v45 = vmax.f32 %v4315_v35, 0.0  ;;  %v4220_v61 = vadd.f32 %v4111_v43, %v12459_v58  ;;  %10068 = vmatmul.mubr.bf16.vlgmr.msra.gmra.mxu0 %v5557_v57  ;;  %v14201_v20 = vld [vmem:[#allocation15_spill] sm:$0xff]  ;;  %v14206_v57 = vld [vmem:[#allocation28_spill] sm:$0xff]  ;;  %vm12747_vm13 = vmand %vm4407_vm4, %vm4419_vm12 }
 0x243   : > { %v4313_v40 = vadd.f32 %v12252_v18, %v4266_v5  ;;  %v9046_v34 = vpack.c.bf16 %v4606_v14, %v4605_v51  ;;  %v9937_v24 = vpop.f32.mrf.mxu0  ;;  %10071 = vmatprep.mubr.bf16.mxu0 %v5559_v15  ;;  %v5001_v58 = vsel %vm466_vm1, %v4996_v13, %v5000_v60  ;;  %v5022_v38 = vshll.u32 %v12626_v1, 16  ;;  %10148 = vmatpush3.bf16.msra.mxu0 %v14201_v20  ;;  %v14205_v51 = vld [vmem:[#allocation3_spill] sm:$0xff]  ;;  %vm12811_vm8 = vmand %vm4418_vm0, %vm4468_vm5 }
 0x244   : > { %v5004_v11 = vor.u32 %v5002_v39, %v5000_v60  ;;  %v4611_v37 = vsel %vm12635_vm9, %v4355_v45, 0.0  ;;  %v4267_v22 = vmul.f32 %v12236_v41, %v4220_v61  ;;  %v4225_v7 = vadd.f32 %v9937_v24, %v12463_v55  ;;  %9972 = vmatmul.mubr.bf16.vlgmr.msra.gmra.mxu1 %v5001_v58  ;;  %10149 = vmatprep.subr.bf16.mxu0 %v12616_v6  ;;  %v10570_v35 = vld [vmem:[#allocation2 + $0x20] sm:$0xff]   ;;  %v10574_v5 = vld [vmem:[%s14063_s2 + $0x28] sm:$0xff]  }
 0x245   : > { %v4353_v25 = vmax.f32 %v4313_v40, 0.0  ;;  %v12698_v2 = vadd.f32 %v12247_v50, %v14204_v28  ;;  %9151 = vst [vmem:[#allocation2 + $0x30] sm:$0xff] %v9046_v34   ;;  %v9059_v23 = vpack.c.bf16 %v10759_v4, %v4611_v37  ;;  %10004 = vmatpush3.bf16.msra.mxu1 %v14205_v51  ;;  %v4124_v55 = vpop.f32.mrf.mxu0  ;;  %vm4469_vm6 = vcmp.lt.s32.totalorder %v12338_v46, 16  ;;  %v12716_v39 = vld [vmem:[%s14063_s2 + $0x120] sm:$0xff]   ;;  %v10595_v46 = vld [vmem:[%s14063_s2 + $0x108] sm:$0xff]  }
 0x246   : > { %v5009_v52 = vsel %vm466_vm1, %v5004_v11, %v5008_v3  ;;  %v5012_v21 = vor.u32 %v5010_v16, %v5008_v3  ;;  %v4314_v43 = vadd.f32 %v12252_v18, %v4267_v22  ;;  %v4272_v50 = vmul.f32 %v12236_v41, %v4225_v7  ;;  %10005 = vmatprep.subr.bf16.mxu1 %v10571_v53  ;;  %v12759_v7 = vld [vmem:[#allocation2 + $0x38] sm:$0xff]   ;;  %v10577_v13 = vld [vmem:[%s14063_s2 + $0x20] sm:$0xff]   ;;  %vm12824_vm0 = vmand %vm12747_vm13, %vm4469_vm6 }
 0x247   : > { %v4223_v15 = vadd.f32 %v4124_v55, %v14206_v57  ;;  %9975 = vmatprep.mubr.bf16.mxu1 %v5009_v52  ;;  %v12711_v60 = vadd.s32 4294967295, %v12411_v42  ;;  %9154 = vst [vmem:[#allocation2 + $0x48] sm:$0xff] %v9059_v23   ;;  %v9938_v3 = vpop.f32.mrf.mxu0  ;;  %v5560_v14 = vrot.slane %v10570_v35, 1  ;;  %v5562_v45 = vrot.slane %v12626_v1, 1  ;;  %10150 = vmatpush3.bf16.msra.mxu0 %v12616_v6 }
 0x248   : > { %v5014_v42 = vshll.u32 %v10570_v35, 16  ;;  %v5024_v40 = vrot.slane %v5022_v38, 1  ;;  %v4609_v61 = vsel %vm12644_vm14, %v4353_v25, 0.0  ;;  %v4354_v34 = vmax.f32 %v4314_v43, 0.0  ;;  %10151 = vmatprep.subr.bf16.mxu0 %v10585_v62  ;;  %vm12777_vm14 = vmand %vm4401_vm7, %vm4419_vm12  ;;  %v10581_v3 = vld [vmem:[%s14063_s2 + $0x18] sm:$0xff]  }
 0x249   : > { %v4319_v24 = vadd.f32 %v12252_v18, %v4272_v50  ;;  %v4270_v26 = vmul.f32 %v12236_v41, %v4223_v15  ;;  %v4127_v11 = vpop.f32.mrf.mxu0  ;;  %v5561_v6 = vsel %vm1131_vm3, %v5558_v0, %v5560_v14  ;;  %v5563_v38 = vsel %vm1131_vm3, %v5560_v14, %v5562_v45  ;;  %10006 = vmatpush3.bf16.msra.mxu1 %v10571_v53  ;;  %vm12834_vm5 = vmand %vm12777_vm14, %vm4469_vm6 }
 0x24a   : > { %v5016_v20 = vrot.slane %v5014_v42, 1  ;;  %v5018_v37 = vshrl.u32 %v10570_v35, 16  ;;  %vm4420_vm9 = vcmp.ge.s32.totalorder %v12365_v19, 0  ;;  %v4610_v12 = vsel %vm12665_vm15, %v4354_v34, 0.0  ;;  %10072 = vmatmul.mubr.bf16.gmra.mxu0 %v5561_v6  ;;  %10007 = vmatprep.subr.bf16.mxu1 %v10574_v5 }
 0x24b   : > { %v4359_v0 = vmax.f32 %v4319_v24, 0.0  ;;  %v4317_v25 = vadd.f32 %v12252_v18, %v4270_v26  ;;  %v4224_v22 = vadd.f32 %v4127_v11, %v12469_v63  ;;  %v9055_v53 = vpack.c.bf16 %v4610_v12, %v4609_v61  ;;  %v9941_v28 = vpop.f32.mrf.mxu0  ;;  %10075 = vmatprep.mubr.bf16.mxu0 %v5563_v38  ;;  %10152 = vmatpush3.bf16.msra.mxu0 %v10585_v62  ;;  %v10590_v63 = vld [vmem:[%s14063_s2 + $0x118] sm:$0xff]  }
 0x24c   : > { %v5017_v23 = vsel %vm466_vm1, %v5012_v21, %v5016_v20  ;;  %v5020_v29 = vor.u32 %v5018_v37, %v5016_v20  ;;  %v5026_v51 = vshrl.u32 %v12626_v1, 16  ;;  %v4229_v43 = vadd.f32 %v9941_v28, %v12473_v10  ;;  %10153 = vmatprep.subr.bf16.mxu0 %v12716_v39  ;;  %v12788_v15 = vld [vmem:[#allocation2 + $0x30] sm:$0xff]  }
 0x24d   : > { %v4615_v55 = vsel %vm12722_vm2, %v4359_v0, 0.0  ;;  %v4357_v52 = vmax.f32 %v4317_v25, 0.0  ;;  %v4271_v35 = vmul.f32 %v12236_v41, %v4224_v22  ;;  %9976 = vmatmul.mubr.bf16.gmra.mxu1 %v5017_v23  ;;  %v12784_v62 = vadd.f32 %v12312_v56, %v12501_v33  ;;  %9153 = vst [vmem:[#allocation2 + $0x40] sm:$0xff] %v9055_v53   ;;  %v4140_v57 = vpop.f32.mrf.mxu0  ;;  %v14215_v56 = vld [vmem:[#allocation30_spill] sm:$0xff]  ;;  %vm12854_vm2 = vmand %vm4419_vm12, %vm4469_vm6 }
 0x24e   : > { %v9068_v50 = vpack.c.bf16 %v10759_v4, %v4615_v55  ;;  %v5025_v10 = vsel %vm466_vm1, %v5020_v29, %v5024_v40  ;;  %v5028_v16 = vor.u32 %v5026_v51, %v5024_v40  ;;  %10008 = vmatpush3.bf16.msra.mxu1 %v10574_v5  ;;  %v4276_v42 = vmul.f32 %v12236_v41, %v4229_v43  ;;  %v12798_v34 = vld [vmem:[#allocation2 + $0x48] sm:$0xff]   ;;  %v12803_v5 = vld [vmem:[%s14063_s2 + $0x110] sm:$0xff]   ;;  %vm12873_vm12 = vmand %vm4407_vm4, %vm4420_vm9 }
 0x24f   : > { %v4318_v14 = vadd.f32 %v12252_v18, %v4271_v35  ;;  %v4227_v33 = vadd.f32 %v4140_v57, %v14215_v56  ;;  %9979 = vmatprep.mubr.bf16.mxu1 %v5025_v10  ;;  %vm4470_vm15 = vcmp.lt.s32.totalorder %v12365_v19, 16  ;;  %v5566_v61 = vrot.slane %v12759_v7, 1  ;;  %10009 = vmatprep.subr.bf16.mxu1 %v10577_v13  ;;  %v9942_v26 = vpop.f32.mrf.mxu0  ;;  %v13002_v19 = vld [vmem:[%s14065_s4] ss:$0 sm:$0xff] }
 0x250   : > { %9156 = vst [vmem:[#allocation2 + $0x58] sm:$0xff] %v9068_v50   ;;  %v4613_v40 = vsel %vm12736_vm11, %v4357_v52, 0.0  ;;  %v5564_v11 = vrot.slane %v12788_v15, 1  ;;  %v5030_v6 = vshll.u32 %v12788_v15, 16  ;;  %v5038_v38 = vshll.u32 %v12759_v7, 16  ;;  %10154 = vmatpush3.bf16.msra.mxu0 %v12716_v39  ;;  %vm12900_vm11 = vmand %vm4401_vm7, %vm4420_vm9 }
 0x251   : > { %v4358_v20 = vmax.f32 %v4318_v14, 0.0  ;;  %v4323_v58 = vadd.f32 %v12252_v18, %v4276_v42  ;;  %v4274_v37 = vmul.f32 %v12236_v41, %v4227_v33  ;;  %v5034_v12 = vshrl.u32 %v12788_v15, 16  ;;  %10155 = vmatprep.subr.bf16.mxu0 %v10590_v63  ;;  %v4143_v0 = vpop.f32.mrf.mxu0  ;;  %v10591_v33 = vld [vmem:[%s14063_s2 + $0x8] sm:$0xff]   ;;  %vm12918_vm13 = vmand %vm12873_vm12, %vm4470_vm15 }
 0x252   : > { %v5565_v54 = vsel %vm1131_vm3, %v5562_v45, %v5564_v11  ;;  %v5567_v25 = vsel %vm1131_vm3, %v5564_v11, %v5566_v61  ;;  %v5032_v22 = vrot.slane %v5030_v6, 1  ;;  %vm4421_vm10 = vcmp.ge.s32.totalorder %v12405_v59, 0  ;;  %10010 = vmatpush3.bf16.msra.mxu1 %v10577_v13  ;;  %v10586_v13 = vld [vmem:[%s14063_s2 + $0x10] sm:$0xff]   ;;  %v12894_v6 = vld [vmem:[%s14063_s2 + $0x100] sm:$0xff]   ;;  %vm12936_vm14 = vmand %vm12900_vm11, %vm4470_vm15 }
 0x253   : > { %v5054_v53 = vshll.u32 %v12798_v34, 16  ;;  %v4614_v28 = vsel %vm12811_vm8, %v4358_v20, 0.0  ;;  %v4363_v23 = vmax.f32 %v4323_v58, 0.0  ;;  %v4321_v29 = vadd.f32 %v12252_v18, %v4274_v37  ;;  %10076 = vmatmul.mubr.bf16.gmra.mxu0 %v5565_v54  ;;  %10011 = vmatprep.subr.bf16.mxu1 %v10581_v3  ;;  %v9945_v55 = vpop.f32.mrf.mxu0  ;;  %v10596_v45 = vld [vmem:[%s14063_s2] sm:$0xff]  }
 0x254   : > { %v4228_v1 = vadd.f32 %v4143_v0, %v12504_v49  ;;  %v9064_v51 = vpack.c.bf16 %v4614_v28, %v4613_v40  ;;  %10079 = vmatprep.mubr.bf16.mxu0 %v5567_v25  ;;  %v5033_v52 = vsel %vm466_vm1, %v5028_v16, %v5032_v22  ;;  %v5036_v49 = vor.u32 %v5034_v12, %v5032_v22  ;;  %v12880_v42 = vld [vmem:[#allocation2 + $0x40] sm:$0xff]  }
 0x255   : > { %v5040_v35 = vrot.slane %v5038_v38, 1  ;;  %10156 = vmatpush3.bf16.msra.mxu0 %v10590_v63  ;;  %v4619_v43 = vsel %vm12824_vm0, %v4363_v23, 0.0  ;;  %v4361_v21 = vmax.f32 %v4321_v29, 0.0  ;;  %v4233_v57 = vadd.f32 %v9945_v55, %v12509_v17  ;;  %9980 = vmatmul.mubr.bf16.gmra.mxu1 %v5033_v52  ;;  %v4156_v16 = vpop.f32.mrf.mxu0  ;;  %vm12960_vm0 = vmand %vm4407_vm4, %vm4421_vm10 }
 0x256   : > { %v4275_v50 = vmul.f32 %v12236_v41, %v4228_v1  ;;  %10157 = vmatprep.subr.bf16.mxu0 %v12803_v5  ;;  %9155 = vst [vmem:[#allocation2 + $0x50] sm:$0xff] %v9064_v51   ;;  %v9077_v63 = vpack.c.bf16 %v10759_v4, %v4619_v43  ;;  %v5570_v17 = vrot.slane %v12798_v34, 1  ;;  %v5042_v56 = vshrl.u32 %v12759_v7, 16  ;;  %10012 = vmatpush3.bf16.msra.mxu1 %v10581_v3 }
 0x257   : > { %v5041_v14 = vsel %vm466_vm1, %v5036_v49, %v5040_v35  ;;  %v4280_v24 = vmul.f32 %v12236_v41, %v4233_v57  ;;  %v4231_v26 = vadd.f32 %v4156_v16, %v12209_v47  ;;  %vm4471_vm6 = vcmp.lt.s32.totalorder %v12405_v59, 16  ;;  %10013 = vmatprep.subr.bf16.mxu1 %v10586_v13  ;;  %v9946_v47 = vpop.f32.mrf.mxu0  ;;  %v12906_v8 = vld [vmem:[#allocation2 + $0x58] sm:$0xff]  }
 0x258   : > { %v4322_v40 = vadd.f32 %v12252_v18, %v4275_v50  ;;  %9983 = vmatprep.mubr.bf16.mxu1 %v5041_v14  ;;  %v5056_v11 = vrot.slane %v5054_v53, 1  ;;  %9158 = vst [vmem:[#allocation2 + $0x68] sm:$0xff] %v9077_v63   ;;  %v5568_v38 = vrot.slane %v12880_v42, 1  ;;  %v5044_v20 = vor.u32 %v5042_v56, %v5040_v35 }
 0x259   : > { %v5046_v58 = vshll.u32 %v12880_v42, 16  ;;  %v5058_v37 = vshrl.u32 %v12798_v34, 16  ;;  %10158 = vmatpush3.bf16.msra.mxu0 %v12803_v5  ;;  %v4617_v12 = vsel %vm12834_vm5, %v4361_v21, 0.0  ;;  %v4327_v54 = vadd.f32 %v12252_v18, %v4280_v24  ;;  %v4159_v53 = vpop.f32.mrf.mxu0  ;;  %v12975_v24 = vld [vmem:[%s14064_s3] ss:$0 sm:$0xff] }
 0x25a   : > { %v4362_v0 = vmax.f32 %v4322_v40, 0.0  ;;  %v4278_v25 = vmul.f32 %v12236_v41, %v4231_v26  ;;  %10159 = vmatprep.subr.bf16.mxu0 %v10595_v46  ;;  %v5569_v5 = vsel %vm1131_vm3, %v5566_v61, %v5568_v38  ;;  %v5571_v39 = vsel %vm1131_vm3, %v5568_v38, %v5570_v17  ;;  %10014 = vmatpush3.bf16.msra.mxu1 %v10586_v13 }
 0x25b   : > { %v5048_v28 = vrot.slane %v5046_v58, 1  ;;  %v5050_v23 = vshrl.u32 %v12880_v42, 16  ;;  %v4367_v1 = vmax.f32 %v4327_v54, 0.0  ;;  %v4232_v61 = vadd.f32 %v4159_v53, %v12543_v48  ;;  %10080 = vmatmul.mubr.bf16.gmra.mxu0 %v5569_v5  ;;  %10015 = vmatprep.subr.bf16.mxu1 %v10591_v33  ;;  %v9949_v55 = vpop.f32.mrf.mxu0  ;;  %v12950_v48 = vld [vmem:[%s14063_s2 + $0x1b8] sm:$0xff]  }
 0x25c   : > { %v4618_v29 = vsel %vm12854_vm2, %v4362_v0, 0.0  ;;  %v4325_v51 = vadd.f32 %v12252_v18, %v4278_v25  ;;  %10083 = vmatprep.mubr.bf16.mxu0 %v5571_v39  ;;  %vm4422_vm8 = vcmp.ge.s32.totalorder %v12711_v60, 0  ;;  %v5070_v35 = vshll.u32 %v12906_v8, 16  ;;  %vm12989_vm2 = vmand %vm4420_vm9, %vm4470_vm15  ;;  %v6165_v0 = vld [vmem:[#allocation2 + $0x10] sm:$0xf]  ;;  %v3848_v39 = vpop.f32.mrf.mxu1 }
 0x25d   : > { %v9073_v13 = vpack.c.bf16 %v4618_v29, %v4617_v12  ;;  %v5049_v52 = vsel %vm466_vm1, %v5044_v20, %v5048_v28  ;;  %v5052_v49 = vor.u32 %v5050_v23, %v5048_v28  ;;  %10160 = vmatpush3.bf16.msra.mxu0 %v10595_v46  ;;  %v4623_v43 = vsel %vm12918_vm13, %v4367_v1, 0.0  ;;  %v14234_v46 = vld [vmem:[#allocation33_spill] sm:$0xff]  ;;  %vm13011_vm9 = vmand %vm12960_vm0, %vm4471_vm6 }
 0x25e   : > { %v4365_v21 = vmax.f32 %v4325_v51, 0.0  ;;  %v4279_v50 = vmul.f32 %v12236_v41, %v4232_v61  ;;  %v4237_v57 = vadd.f32 %v9949_v55, %v12698_v2  ;;  %9984 = vmatmul.mubr.bf16.gmra.mxu1 %v5049_v52  ;;  %10161 = vmatprep.subr.bf16.mxu0 %v12894_v6  ;;  %v3898_v63 = vadd.f32 %v12336_v9, %v14234_v46  ;;  %v4172_v41 = vpop.f32.mrf.mxu0  ;;  %v12969_v14 = vld [vmem:[#allocation2 + $0x50] sm:$0xff]   ;;  %vm13029_vm15 = vmand %vm4401_vm7, %vm4421_vm10 }
 0x25f   : > { %9157 = vst [vmem:[#allocation2 + $0x60] sm:$0xff] %v9073_v13   ;;  %v9086_v16 = vpack.c.bf16 %v10759_v4, %v4623_v43  ;;  %v5057_v2 = vsel %vm466_vm1, %v5052_v49, %v5056_v11  ;;  %v5060_v56 = vor.u32 %v5058_v37, %v5056_v11  ;;  %10016 = vmatpush3.bf16.msra.mxu1 %v10591_v33  ;;  %vm4472_vm5 = vcmp.lt.s32.totalorder %v12711_v60, 16  ;;  %v12983_v11 = vld [vmem:[%s14063_s2 + $0xf8] sm:$0xff]   ;;  %v6166_v1 = vld [vmem:[#allocation2 + $0x14] sm:$0xf]  ;;  %v13036_v13 = vld [vmem:[#allocation2 + $0x68] sm:$0xff]  }
 0x260   : > { %v4326_v40 = vadd.f32 %v12252_v18, %v4279_v50  ;;  %v4284_v26 = vmul.f32 %v12975_v24, %v4237_v57  ;;  %v4235_v9 = vadd.f32 %v4172_v41, %v12279_v27  ;;  %9987 = vmatprep.mubr.bf16.mxu1 %v5057_v2  ;;  %10017 = vmatprep.subr.bf16.mxu1 %v10596_v45  ;;  %v9950_v33 = vpop.f32.mrf.mxu0  ;;  %v5572_v27 = vrot.slane %v12969_v14, 1  ;;  %vm13048_vm12 = vmand %vm13029_vm15, %vm4471_vm6 }
 0x261   : > { %9160 = vst [vmem:[#allocation2 + $0x78] sm:$0xff] %v9086_v16   ;;  %v5574_v3 = vrot.slane %v12906_v8, 1  ;;  %v5062_v47 = vshll.u32 %v12969_v14, 16  ;;  %v5072_v38 = vrot.slane %v5070_v35, 1  ;;  %10162 = vmatpush3.bf16.msra.mxu0 %v12894_v6  ;;  %v4621_v20 = vsel %vm12936_vm14, %v4365_v21, 0.0  ;;  %vm13063_vm11 = vmand %vm4407_vm4, %vm4422_vm8 }
 0x262   : > { %v4366_v58 = vmax.f32 %v4326_v40, 0.0  ;;  %v4331_v37 = vadd.f32 %v13002_v19, %v4284_v26  ;;  %v4282_v12 = vmul.f32 %v12975_v24, %v4235_v9  ;;  %10243 = vmatprep.subr.bf16.mxu0 %v12950_v48  ;;  %v4175_v54 = vpop.f32.mrf.mxu0  ;;  %v5573_v25 = vsel %vm1131_vm3, %v5570_v17, %v5572_v27  ;;  %vm13072_vm13 = vmand %vm4421_vm10, %vm4471_vm6 }
 0x263   : > { %v5575_v22 = vsel %vm1131_vm3, %v5572_v27, %v5574_v3  ;;  %v5064_v53 = vrot.slane %v5062_v47, 1  ;;  %v5066_v5 = vshrl.u32 %v12969_v14, 16  ;;  %10018 = vmatpush3.bf16.msra.mxu1 %v10596_v45  ;;  %v4236_v17 = vadd.f32 %v4175_v54, %v12784_v62  ;;  %10084 = vmatmul.mubr.bf16.gmra.mxu0 %v5573_v25  ;;  %vm13088_vm4 = vmand %vm13063_vm11, %vm4472_vm5 }
 0x264   : > { %v4622_v28 = vsel %vm12989_vm2, %v4366_v58, 0.0  ;;  %v4371_v23 = vmax.f32 %v4331_v37, 0.0  ;;  %v4329_v29 = vadd.f32 %v13002_v19, %v4282_v12  ;;  %10099 = vmatprep.subr.bf16.mxu1 %v12983_v11  ;;  %v9953_v7 = vpop.f32.mrf.mxu0  ;;  %10087 = vmatprep.mubr.bf16.mxu0 %v5575_v22  ;;  %v5074_v55 = vshrl.u32 %v12906_v8, 16  ;;  %vm13104_vm10 = vmand %vm4401_vm7, %vm4422_vm8 }
 0x265   : > { %v9082_v51 = vpack.c.bf16 %v4622_v28, %v4621_v20  ;;  %v5065_v61 = vsel %vm466_vm1, %v5060_v56, %v5064_v53  ;;  %v5068_v45 = vor.u32 %v5066_v5, %v5064_v53  ;;  %v4283_v62 = vmul.f32 %v12975_v24, %v4236_v17  ;;  %vm13123_vm7 = vmand %vm13104_vm10, %vm4472_vm5 }
 0x266   : > { %v4627_v52 = vsel %vm13011_vm9, %v4371_v23, 0.0  ;;  %v4369_v49 = vmax.f32 %v4329_v29, 0.0  ;;  %v4241_v35 = vadd.f32 %v9953_v7, %v3898_v63  ;;  %9988 = vmatmul.mubr.bf16.gmra.mxu1 %v5065_v61  ;;  %v3897_v43 = vadd.f32 %v3848_v39, %v12540_v44  ;;  %v4188_v57 = vpop.f32.mrf.mxu0  ;;  %v13053_v46 = vld [vmem:[#allocation2 + $0x60] sm:$0xff]   ;;  %vm4510_vm6 = vmand %vm4422_vm8, %vm4472_vm5  ;;  %v10618_v7 = vld [vmem:[%s14063_s2 + $0x1a8] sm:$0xff]  }
 0x267   : > { %9159 = vst [vmem:[#allocation2 + $0x70] sm:$0xff] %v9082_v51   ;;  %v9095_v21 = vpack.c.bf16 %v10759_v4, %v4627_v52  ;;  %v5073_v10 = vsel %vm466_vm1, %v5068_v45, %v5072_v38  ;;  %v13055_v63 = vcombine.low %v6165_v0, %v6166_v1  ;;  %v4330_v44 = vadd.f32 %v13002_v19, %v4283_v62  ;;  %v10598_v45 = vld [vmem:[#allocation2 + $0x18] sm:$0xff]  }
 0x268   : > { %v4288_v16 = vmul.f32 %v12975_v24, %v4241_v35  ;;  %v4239_v2 = vadd.f32 %v4188_v57, %v12370_v30  ;;  %9991 = vmatprep.mubr.bf16.mxu1 %v5073_v10  ;;  %v5076_v56 = vor.u32 %v5074_v55, %v5072_v38  ;;  %v9954_v26 = vpop.f32.mrf.mxu0  ;;  %v5576_v36 = vrot.slane %v13053_v46, 1  ;;  %v13109_v28 = vld [vmem:[#allocation2 + $0x78] sm:$0xff]  }
 0x269   : > { %9162 = vst [vmem:[#allocation2 + $0x88] sm:$0xff] %v9095_v21   ;;  %v5578_v9 = vrot.slane %v13036_v13, 1  ;;  %v5078_v18 = vshll.u32 %v13053_v46, 16  ;;  %v5086_v30 = vshll.u32 %v13036_v13, 16  ;;  %v4625_v33 = vsel %vm13048_vm12, %v4369_v49, 0.0  ;;  %v13138_v21 = vld [vmem:[#allocation2 + $0x20] sm:$0xff]  }
 0x26a   : > { %v4370_v27 = vmax.f32 %v4330_v44, 0.0  ;;  %v4335_v47 = vadd.f32 %v13002_v19, %v4288_v16  ;;  %v4286_v59 = vmul.f32 %v12975_v24, %v4239_v2  ;;  %v4191_v20 = vpop.f32.mrf.mxu0  ;;  %v5577_v58 = vsel %vm1131_vm3, %v5574_v3, %v5576_v36 }
 0x26b   : > { %v5579_v37 = vsel %vm1131_vm3, %v5576_v36, %v5578_v9  ;;  %v5080_v12 = vrot.slane %v5078_v18, 1  ;;  %v5082_v0 = vshrl.u32 %v13053_v46, 16  ;;  %v4240_v8 = vadd.f32 %v4191_v20, %v3897_v43  ;;  %10088 = vmatmul.mubr.bf16.gmra.mxu0 %v5577_v58  ;;  %v13150_v58 = vld [vmem:[#allocation2 + $0x28] sm:$0xff]  }
 0x26c   : > { %v4626_v6 = vsel %vm13072_vm13, %v4370_v27, 0.0  ;;  %v4375_v54 = vmax.f32 %v4335_v47, 0.0  ;;  %v4333_v25 = vadd.f32 %v13002_v19, %v4286_v59  ;;  %10091 = vmatprep.mubr.bf16.mxu0 %v5579_v37  ;;  %v5088_v39 = vrot.slane %v5086_v30, 1 }
 0x26d   : > { %v9091_v3 = vpack.c.bf16 %v4626_v6, %v4625_v33  ;;  %v5081_v53 = vsel %vm466_vm1, %v5076_v56, %v5080_v12  ;;  %v5084_v5 = vor.u32 %v5082_v0, %v5080_v12  ;;  %v4287_v29 = vmul.f32 %v12975_v24, %v4240_v8  ;;  %v10603_v6 = vld [vmem:[#allocation2 + $0x30] sm:$0xff]  }
 0x26e   : > { %v4631_v23 = vsel %vm13088_vm4, %v4375_v54, 0.0  ;;  %9992 = vmatmul.mubr.bf16.gmra.mxu1 %v5081_v53  ;;  %v6301_v32 = vshll.u32 %v13055_v63, 16  ;;  %v13117_v1 = vld [vmem:[#allocation2 + $0x70] sm:$0xff]   ;;  %v4373_v51 = vmax.f32 %v4333_v25, 0.0  ;;  %v5090_v61 = vshrl.u32 %v13036_v13, 16 }
 0x26f   : > { %9161 = vst [vmem:[#allocation2 + $0x80] sm:$0xff] %v9091_v3   ;;  %v9104_v34 = vpack.c.bf16 %v10759_v4, %v4631_v23  ;;  %v5089_v17 = vsel %vm466_vm1, %v5084_v5, %v5088_v39  ;;  %v4334_v24 = vadd.f32 %v13002_v19, %v4287_v29  ;;  %v5580_v4 = vrot.slane %v13117_v1, 1  ;;  %v10616_v5 = vld [vmem:[%s14063_s2 + $0x1b0] sm:$0xff]   ;;  %v13160_v23 = vld [vmem:[#allocation2 + $0x38] sm:$0xff]  }
 0x270   : > { %9995 = vmatprep.mubr.bf16.mxu1 %v5089_v17  ;;  %v5582_v55 = vrot.slane %v13109_v28, 1  ;;  %v5094_v52 = vshll.u32 %v13117_v1, 16  ;;  %v5102_v49 = vshll.u32 %v13109_v28, 16  ;;  %v5092_v19 = vor.u32 %v5090_v61, %v5088_v39 }
 0x271   : > { %9164 = vst [vmem:[#allocation2 + $0x98] sm:$0xff] %v9104_v34   ;;  %v4374_v62 = vmax.f32 %v4334_v24, 0.0  ;;  %v6299_v35 = vshrl.u32 %v13055_v63, 16  ;;  %v6303_v43 = vrot.slane %v6301_v32, 1  ;;  %v5581_v50 = vsel %vm1131_vm3, %v5578_v9, %v5580_v4  ;;  %v13163_v32 = vld [vmem:[#allocation2 + $0x40] sm:$0xff]   ;;  %v10709_v24 = vld [vmem:[#allocation2 + $0x8] sm:$0xff]  }
 0x272   : > { %v5583_v60 = vsel %vm1131_vm3, %v5580_v4, %v5582_v55  ;;  %v5096_v57 = vrot.slane %v5094_v52, 1  ;;  %v5098_v10 = vshrl.u32 %v13117_v1, 16  ;;  %v4629_v44 = vsel %vm13123_vm7, %v4373_v51, 0.0  ;;  %v10607_v4 = vld [vmem:[%s14063_s2 + $0xe8] sm:$0xff]  }
 0x273   : > { %v4630_v16 = vsel %vm4510_vm6, %v4374_v62, 0.0  ;;  %10092 = vmatmul.mubr.bf16.gmra.mxu0 %v5581_v50  ;;  %v5104_v56 = vrot.slane %v5102_v49, 1  ;;  %v6306_v26 = vshll.u32 %v10598_v45, 16  ;;  %v6304_v9 = vor.u32 %v6303_v43, %v6299_v35  ;;  %v13180_v52 = vld [vmem:[#allocation2 + $0x48] sm:$0xff]   ;;  %v13185_v43 = vld [vmem:[#allocation2 + $0x58] sm:$0xff]  }
 0x274   : > { %v9100_v41 = vpack.c.bf16 %v4630_v16, %v4629_v44  ;;  %10095 = vmatprep.mubr.bf16.mxu0 %v5583_v60  ;;  %v5097_v2 = vsel %vm466_vm1, %v5092_v19, %v5096_v57  ;;  %v5100_v63 = vor.u32 %v5098_v10, %v5096_v57  ;;  %v5106_v30 = vshrl.u32 %v13109_v28, 16  ;;  %v13182_v19 = vld [vmem:[#allocation2 + $0x50] sm:$0xff]   ;;  %v10621_v57 = vld [vmem:[%s14063_s2 + $0x1a0] sm:$0xff]  }
 0x275   : > { %v6314_v27 = vshll.u32 %v13138_v21, 16  ;;  %v6308_v59 = vrot.slane %v6306_v26, 1  ;;  %v6318_v54 = vshrl.u32 %v13138_v21, 16  ;;  %v6322_v25 = vshll.u32 %v13150_v58, 16  ;;  %v10610_v26 = vld [vmem:[%s14063_s2 + $0xe0] sm:$0xff]  }
 0x276   : > { %9996 = vmatmul.mubr.bf16.gmra.mxu1 %v5097_v2  ;;  %v10594_v40 = vld [vmem:[#allocation2 + $0x80] ss:$0 sps:$4 sm:$0x11]   ;;  %9163 = vst [vmem:[#allocation2 + $0x90] sm:$0xff] %v9100_v41   ;;  %v5105_v36 = vsel %vm466_vm1, %v5100_v63, %v5104_v56  ;;  %v5108_v38 = vor.u32 %v5106_v30, %v5104_v56  ;;  %v6310_v22 = vshrl.u32 %v10598_v45, 16  ;;  %v6330_v3 = vshll.u32 %v10603_v6, 16 }
 0x277   : > { %9999 = vmatprep.mubr.bf16.mxu1 %v5105_v36  ;;  %v5584_v18 = vrot.slane %v10594_v40, 1  ;;  %v5110_v33 = vshll.u32 %v10594_v40, 16  ;;  %v6309_v37 = vsel %vm466_vm1, %v6304_v9, %v6308_v59  ;;  %v6316_v0 = vrot.slane %v6314_v27, 1  ;;  %v13193_v41 = vld [vmem:[#allocation2 + $0x60] sm:$0xff]   ;;  %v13206_v36 = vld [vmem:[#allocation2 + $0x68] sm:$0xff]  }
 0x278   : > { %v6312_v53 = vor.u32 %v6310_v22, %v6308_v59  ;;  %v6324_v39 = vrot.slane %v6322_v25, 1  ;;  %v6332_v17 = vrot.slane %v6330_v3, 1  ;;  %v6326_v51 = vshrl.u32 %v13150_v58, 16 }
 0x279   : > { %v5585_v47 = vsel %vm1131_vm3, %v5582_v55, %v5584_v18  ;;  %v5112_v20 = vrot.slane %v5110_v33, 1  ;;  %v6320_v8 = vor.u32 %v6318_v54, %v6316_v0  ;;  %v6334_v61 = vshrl.u32 %v10603_v6, 16  ;;  %v10710_v55 = vld [vmem:[#allocation2 + $0x10] sm:$0xff]   ;;  %v10623_v33 = vld [vmem:[%s14063_s2 + $0x198] sm:$0xff]  }
 0x27a   : > { %v6317_v29 = vsel %vm466_vm1, %v6312_v53, %v6316_v0  ;;  %v6338_v45 = vshll.u32 %v13160_v23, 16  ;;  %v6328_v49 = vor.u32 %v6326_v51, %v6324_v39  ;;  %v14077_v35 = vrot.slane %v13138_v21, 1  ;;  %v13234_v54 = vld [vmem:[#allocation2 + $0x70] sm:$0xff]   ;;  %v13257_v51 = vld [vmem:[#allocation2 + $0x80] sm:$0xff]  }
 0x27b   : > { %10096 = vmatmul.mubr.bf16.gmra.mxu0 %v5585_v47  ;;  %v5113_v12 = vsel %vm466_vm1, %v5108_v38, %v5112_v20  ;;  %v6325_v34 = vsel %vm466_vm1, %v6320_v8, %v6324_v39  ;;  %v6336_v62 = vor.u32 %v6334_v61, %v6332_v17  ;;  %v6681_v50 = vrot.slane %v13150_v58, 1  ;;  %v10711_v38 = vld [vmem:[#allocation2 + $0x18] sm:$0xff]  }
 0x27c   : > { %10163 = vmatprep.mubr.bf16.mxu0 %v6309_v37  ;;  %v6340_v60 = vrot.slane %v6338_v45, 1  ;;  %v6683_v10 = vrot.slane %v10603_v6, 1  ;;  %v6685_v44 = vrot.slane %v13160_v23, 1  ;;  %v6687_v63 = vrot.slane %v13163_v32, 1  ;;  %v10614_v6 = vld [vmem:[%s14063_s2 + $0xd8] sm:$0xff]  }
 0x27d   : > { %v13198_v2 = vsel %vm1131_vm3, %v14077_v35, %v6681_v50  ;;  %v6689_v56 = vrot.slane %v13180_v52, 1  ;;  %v6691_v30 = vrot.slane %v13182_v19, 1  ;;  %v6693_v59 = vrot.slane %v13185_v43, 1  ;;  %v13242_v39 = vld [vmem:[#allocation2 + $0x78] sm:$0xff]  }
 0x27e   : > { %10000 = vmatmul.mubr.bf16.gmra.mxu1 %v5113_v12  ;;  %v6341_v40 = vsel %vm466_vm1, %v6336_v62, %v6340_v60  ;;  %v13209_v9 = vsel %vm1131_vm3, %v6681_v50, %v6683_v10  ;;  %v13212_v18 = vsel %vm1131_vm3, %v6683_v10, %v6685_v44  ;;  %v13219_v27 = vsel %vm1131_vm3, %v6685_v44, %v6687_v63  ;;  %v10712_v12 = vld [vmem:[#allocation2 + $0x20] sm:$0xff]   ;;  %v13278_v10 = vld [vmem:[#allocation2 + $0x90] ss:$0 sps:$4 sm:$0x11]  }
 0x27f   : > { %10019 = vmatprep.mubr.bf16.mxu1 %v12523_v31  ;;  %v10604_v31 = vld [vmem:[%s14063_s2 + $0xf0] sm:$0xff]   ;;  %v13222_v47 = vsel %vm1131_vm3, %v6687_v63, %v6689_v56  ;;  %v6350_v20 = vshrl.u32 %v13163_v32, 16  ;;  %v6354_v58 = vshll.u32 %v13180_v52, 16  ;;  %v13228_v37 = vsel %vm1131_vm3, %v6689_v56, %v6691_v30  ;;  %v10632_v56 = vld [vmem:[%s14063_s2 + $0x180] sm:$0xff]  }
 0x280   : > { %v6342_v0 = vshrl.u32 %v13160_v23, 16  ;;  %v13237_v25 = vsel %vm1131_vm3, %v6691_v30, %v6693_v59  ;;  %v6695_v22 = vrot.slane %v13193_v41, 1  ;;  %v6362_v3 = vshll.u32 %v13182_v19, 16 }
 0x281   : > { %v6697_v53 = vrot.slane %v13206_v36, 1  ;;  %v6358_v61 = vshrl.u32 %v13180_v52, 16  ;;  %v6701_v50 = vrot.slane %v13242_v39, 1  ;;  %v10713_v52 = vld [vmem:[#allocation2 + $0x28] sm:$0xff]   ;;  %v6386_v44 = vshll.u32 %v13206_v36, 16 }
 0x282   : > { %v13245_v23 = vsel %vm1131_vm3, %v6693_v59, %v6695_v22  ;;  %v6364_v45 = vrot.slane %v6362_v3, 1  ;;  %v6703_v63 = vrot.slane %v13257_v51, 1  ;;  %v6382_v59 = vshrl.u32 %v13193_v41, 16  ;;  %v13309_v3 = vld [vmem:[%s14063_s2 + $0x238] sm:$0xff]  }
 0x283   : > { %10164 = vmatmul.mubr.bf16.vlgmr.msra.gmra.mxu0 %v6317_v29  ;;  %v6356_v29 = vrot.slane %v6354_v58, 1 }
 0x284   : > { %10167 = vmatprep.mubr.bf16.mxu0 %v6325_v34  ;;  %10244 = vmatpush3.bf16.msra.mxu0 %v12950_v48  ;;  %v6346_v48 = vshll.u32 %v13163_v32, 16  ;;  %v10619_v32 = vld [vmem:[%s14063_s2 + $0xd0] sm:$0xff]  }
 0x285   : > { %10245 = vmatprep.subr.bf16.mxu0 %v10616_v5  ;;  %v10626_v34 = vld [vmem:[%s14063_s2 + $0x190] sm:$0xff]  }
 0x286   : > { %10020 = vmatmul.mubr.bf16.vlgmr.msra.gmra.mxu1 %v10709_v24  ;;  %v6348_v16 = vrot.slane %v6346_v48, 1  ;;  %v10628_v48 = vld [vmem:[%s14063_s2 + $0x188] sm:$0xff]  }
 0x287   : > { %10100 = vmatpush3.bf16.msra.mxu1 %v12983_v11  ;;  %10023 = vmatprep.mubr.bf16.mxu1 %v10710_v55  ;;  %v6333_v11 = vsel %vm466_vm1, %v6328_v49, %v6332_v17  ;;  %v13254_v17 = vsel %vm1131_vm3, %v6695_v22, %v6697_v53  ;;  %v13263_v55 = vld [vmem:[#allocation2 + $0x88] sm:$0xff]   ;;  %v6378_v49 = vshll.u32 %v13193_v41, 16 }
 0x288   : > { %10101 = vmatprep.subr.bf16.mxu1 %v10604_v31  ;;  %10246 = vmatpush3.bf16.msra.mxu0 %v10616_v5  ;;  %v6352_v8 = vor.u32 %v6350_v20, %v6348_v16  ;;  %v6344_v5 = vor.u32 %v6342_v0, %v6340_v60  ;;  %v6374_v60 = vshrl.u32 %v13185_v43, 16  ;;  %v10629_v20 = vld [vmem:[%s14063_s2 + $0xc0] sm:$0xff]   ;;  %v6388_v0 = vrot.slane %v6386_v44, 1 }
 0x289   : > { %10247 = vmatprep.subr.bf16.mxu0 %v10618_v7  ;;  %v6380_v30 = vrot.slane %v6378_v49, 1 }
 0x28a   : > { %v6357_v24 = vsel %vm466_vm1, %v6352_v8, %v6356_v29  ;;  %v6410_v8 = vshll.u32 %v13257_v51, 16 }
 0x28b   : > { %10102 = vmatpush3.bf16.msra.mxu1 %v10604_v31  ;;  %10168 = vmatmul.mubr.bf16.gmra.mxu0 %v6333_v11  ;;  %v6349_v31 = vsel %vm466_vm1, %v6344_v5, %v6348_v16  ;;  %v6366_v11 = vshrl.u32 %v13182_v19, 16  ;;  %v6707_v5 = vrot.slane %v13278_v10, 1 }
 0x28c   : > { %10103 = vmatprep.subr.bf16.mxu1 %v10607_v4  ;;  %10171 = vmatprep.mubr.bf16.mxu0 %v6341_v40  ;;  %v6705_v40 = vrot.slane %v13263_v55, 1 }
 0x28d   : > { %10248 = vmatpush3.bf16.msra.mxu0 %v10618_v7  ;;  %v6699_v7 = vrot.slane %v13234_v54, 1  ;;  %v6368_v19 = vor.u32 %v6366_v11, %v6364_v45  ;;  %v13333_v11 = vld [vmem:[#allocation2 + $0x40] sm:$0xff]  }
 0x28e   : > { %10024 = vmatmul.mubr.bf16.gmra.mxu1 %v10711_v38  ;;  %10249 = vmatprep.subr.bf16.mxu0 %v10621_v57  ;;  %v6402_v38 = vshll.u32 %v13242_v39, 16  ;;  %v13300_v58 = vsel %vm1131_vm3, %v6703_v63, %v6705_v40 }
 0x28f   : > { %10027 = vmatprep.mubr.bf16.mxu1 %v10712_v12  ;;  %10104 = vmatpush3.bf16.msra.mxu1 %v10607_v4  ;;  %v6370_v4 = vshll.u32 %v13185_v43, 16  ;;  %v13270_v62 = vsel %vm1131_vm3, %v6697_v53, %v6699_v7  ;;  %v13283_v16 = vsel %vm1131_vm3, %v6699_v7, %v6701_v50  ;;  %v6394_v43 = vshll.u32 %v13234_v54, 16  ;;  %v13311_v53 = vld [vmem:[#allocation2 + $0x28] sm:$0xff]  }
 0x290   : > { %10105 = vmatprep.subr.bf16.mxu1 %v10610_v26  ;;  %v6404_v7 = vrot.slane %v6402_v38, 1 }
 0x291   : > { %10250 = vmatpush3.bf16.msra.mxu0 %v10621_v57  ;;  %v10624_v57 = vld [vmem:[%s14063_s2 + $0xc8] sm:$0xff]   ;;  %v6396_v41 = vrot.slane %v6394_v43, 1 }
 0x292   : > { %10251 = vmatprep.subr.bf16.mxu0 %v10623_v33  ;;  %v13345_v43 = vld [vmem:[#allocation2 + $0x48] sm:$0xff]  }
 0x293   : > { %10106 = vmatpush3.bf16.msra.mxu1 %v10610_v26  ;;  %10172 = vmatmul.mubr.bf16.gmra.mxu0 %v6349_v31  ;;  %v6360_v26 = vor.u32 %v6358_v61, %v6356_v29  ;;  %v6384_v29 = vor.u32 %v6382_v59, %v6380_v30  ;;  %v13319_v61 = vsel %vm1131_vm3, %v6705_v40, %v6707_v5 }
 0x294   : > { %10107 = vmatprep.subr.bf16.mxu1 %v10614_v6  ;;  %10175 = vmatprep.mubr.bf16.mxu0 %v6357_v24  ;;  %v6418_v24 = vshll.u32 %v13263_v55, 16 }
 0x295   : > { %10252 = vmatpush3.bf16.msra.mxu0 %v10623_v33  ;;  %v13292_v33 = vsel %vm1131_vm3, %v6701_v50, %v6703_v63  ;;  %v6365_v12 = vsel %vm466_vm1, %v6360_v26, %v6364_v45  ;;  %v13326_v50 = vrot.slane %v6410_v8, 1  ;;  %v7433_v26 = vshrl.u32 %v13311_v53, 16 }
 0x296   : > { %10028 = vmatmul.mubr.bf16.gmra.mxu1 %v10713_v52  ;;  %10253 = vmatprep.subr.bf16.mxu0 %v10626_v34  ;;  %v13331_v52 = vld [vmem:[%s14063_s2 + $0x178] sm:$0xff]  }
 0x297   : > { %10031 = vmatprep.mubr.bf16.mxu1 %v12788_v15  ;;  %10108 = vmatpush3.bf16.msra.mxu1 %v10614_v6  ;;  %v6372_v15 = vrot.slane %v6370_v4, 1  ;;  %v6390_v6 = vshrl.u32 %v13206_v36, 16  ;;  %v6398_v36 = vshrl.u32 %v13234_v54, 16  ;;  %v6406_v4 = vshrl.u32 %v13242_v39, 16  ;;  %v13323_v54 = vld [vmem:[#allocation2 + $0x38] sm:$0xff]  }
 0x298   : > { %10109 = vmatprep.subr.bf16.mxu1 %v10619_v32  ;;  %v6389_v39 = vsel %vm466_vm1, %v6384_v29, %v6388_v0  ;;  %v7445_v59 = vshll.u32 %v13323_v54, 16  ;;  %v7449_v5 = vshrl.u32 %v13323_v54, 16  ;;  %v7457_v29 = vshrl.u32 %v13333_v11, 16 }
 0x299   : > { %10254 = vmatpush3.bf16.msra.mxu0 %v10626_v34  ;;  %v6373_v22 = vsel %vm466_vm1, %v6368_v19, %v6372_v15  ;;  %v10714_v34 = vld [vmem:[#allocation2 + $0x38] sm:$0xff]   ;;  %v6376_v31 = vor.u32 %v6374_v60, %v6372_v15  ;;  %v6392_v45 = vor.u32 %v6390_v6, %v6388_v0  ;;  %v6400_v49 = vor.u32 %v6398_v36, %v6396_v41  ;;  %v10715_v36 = vld [vmem:[#allocation2 + $0x48] sm:$0xff]  }
 0x29a   : > { %10255 = vmatprep.subr.bf16.mxu0 %v10628_v48  ;;  %v13340_v63 = vor.u32 %v6406_v4, %v6404_v7  ;;  %v13342_v19 = vrot.slane %v6418_v24, 1  ;;  %v13360_v0 = vld [vmem:[#allocation2 + $0x58] sm:$0xff]   ;;  %v7447_v8 = vrot.slane %v7445_v59, 1  ;;  %v7461_v24 = vshll.u32 %v13345_v43, 16  ;;  %v13376_v4 = vld [vmem:[#allocation2 + $0x70] sm:$0xff]  }
 0x29b   : > { %10110 = vmatpush3.bf16.msra.mxu1 %v10619_v32  ;;  %10176 = vmatmul.mubr.bf16.gmra.mxu0 %v6365_v12  ;;  %v13315_v32 = vld [vmem:[#allocation2 + $0x30] sm:$0xff]   ;;  %v6397_v60 = vsel %vm466_vm1, %v6392_v45, %v6396_v41  ;;  %v6405_v38 = vsel %vm466_vm1, %v6400_v49, %v6404_v7  ;;  %v7465_v45 = vshrl.u32 %v13345_v43, 16 }
 0x29c   : > { %10111 = vmatprep.subr.bf16.mxu1 %v10624_v57  ;;  %10179 = vmatprep.mubr.bf16.mxu0 %v6373_v22  ;;  %v7437_v44 = vshll.u32 %v13315_v32, 16  ;;  %v13364_v22 = vld [vmem:[#allocation2 + $0x60] sm:$0xff]   ;;  %v7451_v49 = vor.u32 %v7449_v5, %v7447_v8 }
 0x29d   : > { %10256 = vmatpush3.bf16.msra.mxu0 %v10628_v48  ;;  %v6381_v48 = vsel %vm466_vm1, %v6376_v31, %v6380_v30  ;;  %v13351_v30 = vld [vmem:[#allocation2 + $0x50] sm:$0xff]  }
 0x29e   : > { %10032 = vmatmul.mubr.bf16.gmra.mxu1 %v10714_v34  ;;  %10257 = vmatprep.subr.bf16.mxu0 %v10632_v56  ;;  %v13368_v34 = vld [vmem:[#allocation2 + $0x68] sm:$0xff]  }
 0x29f   : > { %10035 = vmatprep.mubr.bf16.mxu1 %v12880_v42  ;;  %10112 = vmatpush3.bf16.msra.mxu1 %v10624_v57  ;;  %v7429_v42 = vshll.u32 %v13311_v53, 16  ;;  %v6414_v57 = vshrl.u32 %v13257_v51, 16  ;;  %v7439_v51 = vrot.slane %v7437_v44, 1  ;;  %v7463_v44 = vrot.slane %v7461_v24, 1 }
 0x2a0   : > { %10113 = vmatprep.subr.bf16.mxu1 %v10629_v20  ;;  %v7497_v15 = vshrl.u32 %v13368_v34, 16 }
 0x2a1   : > { %10258 = vmatpush3.bf16.msra.mxu0 %v10632_v56  ;;  %v13347_v40 = vrot.slane %v7429_v42, 1  ;;  %v7441_v56 = vshrl.u32 %v13315_v32, 16  ;;  %v13357_v12 = vor.u32 %v6414_v57, %v13326_v50  ;;  %v7469_v42 = vshll.u32 %v13351_v30, 16 }
 0x2a2   : > { %10339 = vmatprep.subr.bf16.mxu0 %v13309_v3  ;;  %v7467_v5 = vor.u32 %v7465_v45, %v7463_v44  ;;  %v13406_v45 = vld [vmem:[#allocation2 + $0x90] sm:$0xff]  }
 0x2a3   : > { %10114 = vmatpush3.bf16.msra.mxu1 %v10629_v20  ;;  %10180 = vmatmul.mubr.bf16.gmra.mxu0 %v6381_v48  ;;  %v7435_v6 = vor.u32 %v7433_v26, %v13347_v40  ;;  %v7453_v20 = vshll.u32 %v13333_v11, 16  ;;  %v7443_v41 = vor.u32 %v7441_v56, %v7439_v51  ;;  %v7477_v26 = vshll.u32 %v13360_v0, 16  ;;  %v13385_v56 = vld [vmem:[#allocation2 + $0x78] sm:$0xff]  }
 0x2a4   : > { %10195 = vmatprep.subr.bf16.mxu1 %v13331_v52  ;;  %10183 = vmatprep.mubr.bf16.mxu0 %v6389_v39  ;;  %v7473_v39 = vshrl.u32 %v13351_v30, 16  ;;  %v7471_v59 = vrot.slane %v7469_v42, 1 }
 0x2a5   : > { %v13371_v31 = vsel %vm466_vm1, %v7435_v6, %v7439_v51  ;;  %v7455_v7 = vrot.slane %v7453_v20, 1  ;;  %v13379_v48 = vsel %vm466_vm1, %v7443_v41, %v7447_v8  ;;  %v7481_v51 = vshrl.u32 %v13360_v0, 16  ;;  %v13392_v41 = vld [vmem:[#allocation2 + $0x80] sm:$0xff]  }
 0x2a6   : > { %10036 = vmatmul.mubr.bf16.gmra.mxu1 %v10715_v36  ;;  %14253 = vst [vmem:[#allocation11_spill] sm:$0xff] %v13379_v48  ;;  %v7485_v6 = vshll.u32 %v13364_v22, 16  ;;  %v7489_v20 = vshrl.u32 %v13364_v22, 16  ;;  %v7493_v36 = vshll.u32 %v13368_v34, 16  ;;  %v7475_v24 = vor.u32 %v7473_v39, %v7471_v59 }
 0x2a7   : > { %10039 = vmatprep.mubr.bf16.mxu1 %v12969_v14  ;;  %v7459_v57 = vor.u32 %v7457_v29, %v7455_v7  ;;  %v13388_v14 = vsel %vm466_vm1, %v7451_v49, %v7455_v7  ;;  %v7479_v29 = vrot.slane %v7477_v26, 1  ;;  %v7501_v7 = vshll.u32 %v13376_v4, 16  ;;  %v13400_v49 = vld [vmem:[#allocation2 + $0x88] sm:$0xff]  }
 0x2a8   : > { %14254 = vst [vmem:[#allocation13_spill] sm:$0xff] %v13388_v14  ;;  %v7487_v35 = vrot.slane %v7485_v6, 1  ;;  %v13403_v42 = vsel %vm466_vm1, %v7467_v5, %v7471_v59  ;;  %v7495_v48 = vrot.slane %v7493_v36, 1  ;;  %v7509_v6 = vshll.u32 %v13385_v56, 16 }
 0x2a9   : > { %v13395_v8 = vsel %vm466_vm1, %v7459_v57, %v7463_v44  ;;  %v7483_v14 = vor.u32 %v7481_v51, %v7479_v29  ;;  %v7505_v57 = vshrl.u32 %v13376_v4, 16  ;;  %v13409_v39 = vsel %vm466_vm1, %v7475_v24, %v7479_v29  ;;  %v13415_v51 = vld [vmem:[#allocation2 + $0x98] sm:$0xff]  }
 0x2aa   : > { %v7491_v44 = vor.u32 %v7489_v20, %v7487_v35  ;;  %v7503_v26 = vrot.slane %v7501_v7, 1  ;;  %v6413_v59 = vsel %vm466_vm1, %v13340_v63, %v13326_v50  ;;  %v7517_v36 = vshll.u32 %v13392_v41, 16 }
 0x2ab   : > { %10184 = vmatmul.mubr.bf16.gmra.mxu0 %v6397_v60  ;;  %v10716_v60 = vld [vmem:[#allocation2 + $0x58] sm:$0xff]   ;;  %v13418_v5 = vsel %vm466_vm1, %v7483_v14, %v7487_v35  ;;  %v7511_v24 = vrot.slane %v7509_v6, 1  ;;  %v7513_v7 = vshrl.u32 %v13385_v56, 16  ;;  %v7521_v63 = vshrl.u32 %v13392_v41, 16 }
 0x2ac   : > { %10187 = vmatprep.mubr.bf16.mxu0 %v6405_v38  ;;  %v7499_v38 = vor.u32 %v7497_v15, %v7495_v48  ;;  %v13423_v20 = vsel %vm466_vm1, %v7491_v44, %v7495_v48  ;;  %v7507_v29 = vor.u32 %v7505_v57, %v7503_v26  ;;  %v7519_v50 = vrot.slane %v7517_v36, 1 }
 0x2ad   : > { %14255 = vst [vmem:[#allocation8_spill] sm:$0xff] %v13423_v20  ;;  %v7525_v35 = vshll.u32 %v13400_v49, 16  ;;  %v6421_v15 = vsel %vm466_vm1, %v13357_v12, %v13342_v19  ;;  %v7515_v14 = vor.u32 %v7513_v7, %v7511_v24  ;;  %v7533_v57 = vshll.u32 %v13406_v45, 16 }
 0x2ae   : > { %10040 = vmatmul.mubr.bf16.gmra.mxu1 %v10716_v60  ;;  %v13427_v60 = vsel %vm466_vm1, %v7499_v38, %v7503_v26  ;;  %v13437_v48 = vsel %vm466_vm1, %v7507_v29, %v7511_v24  ;;  %v7523_v44 = vor.u32 %v7521_v63, %v7519_v50  ;;  %v7529_v6 = vshrl.u32 %v13400_v49, 16 }
 0x2af   : > { %10043 = vmatprep.mubr.bf16.mxu1 %v13053_v46  ;;  %14256 = vst [vmem:[#allocation16_spill] sm:$0xff] %v13427_v60  ;;  %v13434_v46 = vld [vmem:[#allocation2 + $0xa0] ss:$0 sps:$4 sm:$0x11]   ;;  %14257 = vst [vmem:[#allocation5_spill] sm:$0xff] %v13437_v48  ;;  %v7527_v26 = vrot.slane %v7525_v35, 1  ;;  %v13443_v36 = vsel %vm466_vm1, %v7515_v14, %v7519_v50 }
 0x2b0   : > { %v7541_v38 = vshll.u32 %v13415_v51, 16  ;;  %v7535_v60 = vrot.slane %v7533_v57, 1  ;;  %v7537_v12 = vshrl.u32 %v13406_v45, 16  ;;  %v7549_v20 = vshll.u32 %v13434_v46, 16 }
 0x2b1   : > { %v13448_v29 = vsel %vm466_vm1, %v7523_v44, %v7527_v26  ;;  %v7531_v24 = vor.u32 %v7529_v6, %v7527_v26  ;;  %v7545_v63 = vshrl.u32 %v13415_v51, 16  ;;  %v14258_v57 = vshll.u32 %v13278_v10, 16  ;;  %v10631_v6 = vld [vmem:[#allocation2 + $0x10] sm:$0xff]  }
 0x2b2   : > { %v7543_v7 = vrot.slane %v7541_v38, 1  ;;  %v7539_v35 = vor.u32 %v7537_v12, %v7535_v60  ;;  %v7551_v48 = vrot.slane %v7549_v20, 1  ;;  %v10635_v10 = vld [vmem:[#allocation2 + $0x30] sm:$0xff]   ;;  %v10637_v38 = vld [vmem:[#allocation2 + $0x20] sm:$0xff]   ;;  %v10644_v12 = vld [vmem:[%s14063_s2 + $0x168] sm:$0xff]  }
 0x2b3   : > { %10188 = vmatmul.mubr.bf16.gmra.mxu0 %v6413_v59  ;;  %v13453_v50 = vsel %vm466_vm1, %v7531_v24, %v7535_v60  ;;  %v6422_v59 = vshrl.u32 %v13263_v55, 16  ;;  %v6428_v44 = vrot.slane %v14258_v57, 1  ;;  %v10630_v60 = vld [vmem:[#allocation2 + $0x20] sm:$0xff]   ;;  %v10659_v55 = vld [vmem:[%s14063_s2 + $0x230] sm:$0xff]   ;;  %v10638_v24 = vld [vmem:[#allocation2 + $0x38] sm:$0xff]  }
 0x2b4   : > { %10191 = vmatprep.mubr.bf16.mxu0 %v6421_v15  ;;  %v7547_v14 = vor.u32 %v7545_v63, %v7543_v7  ;;  %v13460_v26 = vsel %vm466_vm1, %v7539_v35, %v7543_v7  ;;  %v10640_v7 = vld [vmem:[#allocation2 + $0x40] sm:$0xff]   ;;  %v10641_v63 = vld [vmem:[#allocation2 + $0x28] sm:$0xff]   ;;  %v10642_v35 = vld [vmem:[#allocation2 + $0x30] sm:$0xff]  }
 0x2b5   : > { %v6424_v20 = vor.u32 %v6422_v59, %v13342_v19  ;;  %v10639_v19 = vld [vmem:[%s14063_s2 + $0x170] sm:$0xff]   ;;  %v10655_v59 = vld [vmem:[%s14063_s2 + $0x158] sm:$0xff]   ;;  %v10643_v57 = vld [vmem:[#allocation2 + $0x48] sm:$0xff]  }
 0x2b6   : > { %10044 = vmatmul.mubr.bf16.gmra.mxu1 %v13036_v13  ;;  %v13463_v15 = vsel %vm466_vm1, %v7547_v14, %v7551_v48  ;;  %v10636_v48 = vld [vmem:[#allocation2 + $0x18] sm:$0xff]  }
 0x2b7   : > { %10047 = vmatprep.mubr.bf16.mxu1 %v13117_v1  ;;  %v6429_v13 = vsel %vm466_vm1, %v6424_v20, %v6428_v44  ;;  %v10633_v1 = vld [vmem:[#allocation2 + $0x28] sm:$0xff]   ;;  %v10668_v14 = vld [vmem:[%s14063_s2 + $0x218] sm:$0xff]   ;;  %v10673_v44 = vld [vmem:[%s14063_s2 + $0x210] sm:$0xff]  }
 0x2b8   : > { %v10645_v20 = vld [vmem:[#allocation2 + $0x50] sm:$0xff]  }
 0x2bb   : > { %10192 = vmatmul.mubr.bf16.gmra.mxu0 %v6429_v13  ;;  %v10646_v13 = vld [vmem:[#allocation2 + $0x38] sm:$0xff]  }
 0x2bc   : > { %10259 = vmatprep.mubr.bf16.mxu0 %v10630_v60  ;;  %v10662_v60 = vld [vmem:[%s14063_s2 + $0x150] sm:$0xff]  }
 0x2be   : > { %10048 = vmatmul.mubr.bf16.gmra.mxu1 %v13109_v28  ;;  %v10661_v28 = vld [vmem:[%s14063_s2 + $0x228] sm:$0xff]  }
 0x2bf   : > { %10115 = vmatprep.mubr.bf16.mxu1 %v10631_v6  ;;  %v10647_v6 = vld [vmem:[#allocation2 + $0x40] sm:$0xff]  }
 0x2c3   : > { %10260 = vmatmul.mubr.bf16.vlgmr.msra.gmra.mxu0 %v10633_v1  ;;  %v10675_v1 = vld [vmem:[%s14063_s2 + $0x208] sm:$0xff]  }
 0x2c4   : > { %10263 = vmatprep.mubr.bf16.mxu0 %v10635_v10  ;;  %10340 = vmatpush3.bf16.msra.mxu0 %v13309_v3  ;;  %v10666_v3 = vld [vmem:[%s14063_s2 + $0x220] sm:$0xff]   ;;  %v10648_v10 = vld [vmem:[#allocation2 + $0x58] sm:$0xff]  }
 0x2c5   : > { %10341 = vmatprep.subr.bf16.mxu0 %v10659_v55 }
 0x2c6   : > { %10116 = vmatmul.mubr.bf16.vlgmr.msra.gmra.mxu1 %v10636_v48  ;;  %v10682_v48 = vld [vmem:[%s14063_s2 + $0x200] sm:$0xff]  }
 0x2c7   : > { %10196 = vmatpush3.bf16.msra.mxu1 %v13331_v52  ;;  %10119 = vmatprep.mubr.bf16.mxu1 %v10637_v38  ;;  %v10649_v52 = vld [vmem:[%s14063_s2 + $0x160] sm:$0xff]   ;;  %v10651_v38 = vld [vmem:[#allocation2 + $0x48] sm:$0xff]  }
 0x2c8   : > { %10197 = vmatprep.subr.bf16.mxu1 %v10639_v19  ;;  %10342 = vmatpush3.bf16.msra.mxu0 %v10659_v55  ;;  %v10669_v55 = vld [vmem:[%s14063_s2 + $0x148] sm:$0xff]  }
 0x2c9   : > { %10343 = vmatprep.subr.bf16.mxu0 %v10661_v28 }
 0x2cb   : > { %10198 = vmatpush3.bf16.msra.mxu1 %v10639_v19  ;;  %10264 = vmatmul.mubr.bf16.gmra.mxu0 %v10638_v24  ;;  %v10650_v19 = vld [vmem:[#allocation2 + $0x60] sm:$0xff]   ;;  %v10684_v24 = vld [vmem:[%s14063_s2 + $0x1f8] sm:$0xff]  }
 0x2cc   : > { %10199 = vmatprep.subr.bf16.mxu1 %v10644_v12  ;;  %10267 = vmatprep.mubr.bf16.mxu0 %v10640_v7  ;;  %v10656_v7 = vld [vmem:[#allocation2 + $0x70] sm:$0xff]  }
 0x2cd   : > { %10344 = vmatpush3.bf16.msra.mxu0 %v10661_v28  ;;  %v10676_v28 = vld [vmem:[%s14063_s2 + $0x140] sm:$0xff]  }
 0x2ce   : > { %10120 = vmatmul.mubr.bf16.gmra.mxu1 %v10641_v63  ;;  %10345 = vmatprep.subr.bf16.mxu0 %v10666_v3  ;;  %v10657_v63 = vld [vmem:[#allocation2 + $0x58] sm:$0xff]  }
 0x2cf   : > { %10123 = vmatprep.mubr.bf16.mxu1 %v10642_v35  ;;  %10200 = vmatpush3.bf16.msra.mxu1 %v10644_v12  ;;  %v10652_v12 = vld [vmem:[#allocation2 + $0x50] sm:$0xff]   ;;  %v10660_v35 = vld [vmem:[#allocation2 + $0x78] sm:$0xff]  }
 0x2d0   : > { %10201 = vmatprep.subr.bf16.mxu1 %v10649_v52 }
 0x2d1   : > { %10346 = vmatpush3.bf16.msra.mxu0 %v10666_v3  ;;  %v10653_v3 = vld [vmem:[#allocation2 + $0x68] sm:$0xff]  }
 0x2d2   : > { %10347 = vmatprep.subr.bf16.mxu0 %v10668_v14 }
 0x2d3   : > { %10202 = vmatpush3.bf16.msra.mxu1 %v10649_v52  ;;  %10268 = vmatmul.mubr.bf16.gmra.mxu0 %v10643_v57  ;;  %v10658_v52 = vld [vmem:[#allocation2 + $0x60] sm:$0xff]   ;;  %v10665_v57 = vld [vmem:[#allocation2 + $0x70] sm:$0xff]  }
 0x2d4   : > { %10203 = vmatprep.subr.bf16.mxu1 %v10655_v59  ;;  %10271 = vmatprep.mubr.bf16.mxu0 %v10645_v20  ;;  %v7778_v20 = vld [vmem:[#allocation2 + $0x20] sm:$0xe] }
 0x2d5   : > { %10348 = vmatpush3.bf16.msra.mxu0 %v10668_v14  ;;  %v10663_v14 = vld [vmem:[#allocation2 + $0x80] sm:$0xff]  }
 0x2d6   : > { %10124 = vmatmul.mubr.bf16.gmra.mxu1 %v10646_v13  ;;  %10349 = vmatprep.subr.bf16.mxu0 %v10673_v44  ;;  %v10667_v13 = vld [vmem:[#allocation2 + $0x88] sm:$0xff]  }
 0x2d7   : > { %10127 = vmatprep.mubr.bf16.mxu1 %v10647_v6  ;;  %10204 = vmatpush3.bf16.msra.mxu1 %v10655_v59  ;;  %v10664_v59 = vld [vmem:[#allocation2 + $0x68] sm:$0xff]   ;;  %v6655_v6 = vld [vmem:[#allocation2 + $0x10] sm:$0xe] }
 0x2d8   : > { %10205 = vmatprep.subr.bf16.mxu1 %v10662_v60 }
 0x2d9   : > { %10350 = vmatpush3.bf16.msra.mxu0 %v10673_v44  ;;  %v13515_v44 = vld [vmem:[#allocation2 + $0x24] sm:$0xf] }
 0x2da   : > { %10351 = vmatprep.subr.bf16.mxu0 %v10675_v1 }
 0x2db   : > { %10206 = vmatpush3.bf16.msra.mxu1 %v10662_v60  ;;  %10272 = vmatmul.mubr.bf16.gmra.mxu0 %v10648_v10  ;;  %v10670_v60 = vld [vmem:[#allocation2 + $0x90] sm:$0xff]   ;;  %v10672_v10 = vld [vmem:[#allocation2 + $0x80] sm:$0xff]  }
 0x2dc   : > { %10207 = vmatprep.subr.bf16.mxu1 %v10669_v55  ;;  %10275 = vmatprep.mubr.bf16.mxu0 %v10650_v19 }
 0x2dd   : > { %10352 = vmatpush3.bf16.msra.mxu0 %v10675_v1  ;;  %v10671_v1 = vld [vmem:[#allocation2 + $0x78] sm:$0xff]  }
 0x2de   : > { %10128 = vmatmul.mubr.bf16.gmra.mxu1 %v10651_v38  ;;  %10353 = vmatprep.subr.bf16.mxu0 %v10682_v48 }
 0x2df   : > { %10131 = vmatprep.mubr.bf16.mxu1 %v10652_v12  ;;  %10208 = vmatpush3.bf16.msra.mxu1 %v10669_v55  ;;  %v8931_v55 = vcombine.low %v7778_v20, %v13515_v44  ;;  %v7800_v12 = vrot.slane %v13311_v53, 1 }
 0x2e0   : > { %10209 = vmatprep.subr.bf16.mxu1 %v10676_v28 }
 0x2e1   : > { %10354 = vmatpush3.bf16.msra.mxu0 %v10682_v48  ;;  %v10717_v48 = vld [vmem:[#allocation2 + $0x14] sm:$0xf]  ;;  %v7799_v38 = vrot.slane %v8931_v55, 1 }
 0x2e2   : > { %v8825_v19 = vcombine.low %v6655_v6, %v10717_v48  ;;  %v14259_v6 = vrot.slane %v13138_v21, 1 }
 0x2e3   : > { %10210 = vmatpush3.bf16.msra.mxu1 %v10676_v28  ;;  %10276 = vmatmul.mubr.bf16.gmra.mxu0 %v10653_v3  ;;  %v10674_v28 = vld [vmem:[#allocation2 + $0x98] sm:$0xff]  }
 0x2e4   : > { %10291 = vmatprep.subr.bf16.mxu1 %v10684_v24  ;;  %10279 = vmatprep.mubr.bf16.mxu0 %v10656_v7  ;;  %v6676_v3 = vrot.slane %v8825_v19, 1  ;;  %v7801_v7 = vsel %vm1131_vm3, %v7799_v38, %v7800_v12  ;;  %v10690_v19 = vld [vmem:[%s14063_s2 + $0x1e8] sm:$0xff]  }
 0x2e6   : > { %10132 = vmatmul.mubr.bf16.gmra.mxu1 %v10657_v63  ;;  %v10680_v63 = vld [vmem:[#allocation2 + $0x88] sm:$0xff]  }
 0x2e7   : > { %10135 = vmatprep.mubr.bf16.mxu1 %v10658_v52  ;;  %v10718_v52 = vld [vmem:[#allocation2 + $0x18] sm:$0xff]  }
 0x2eb   : > { %10280 = vmatmul.mubr.bf16.gmra.mxu0 %v10660_v35  ;;  %v6677_v35 = vrot.slane %v10718_v52, 1 }
 0x2ec   : > { %10283 = vmatprep.mubr.bf16.mxu0 %v10663_v14 }
 0x2ed   : > { %v6678_v14 = vsel %vm1131_vm3, %v6676_v3, %v6677_v35  ;;  %v10693_v3 = vld [vmem:[%s14063_s2 + $0x1e0] sm:$0xff]  }
 0x2ee   : > { %10136 = vmatmul.mubr.bf16.gmra.mxu1 %v10664_v59  ;;  %v7802_v59 = vrot.slane %v13315_v32, 1  ;;  %v7806_v32 = vrot.slane %v13333_v11, 1 }
 0x2ef   : > { %10139 = vmatprep.mubr.bf16.mxu1 %v10665_v57  ;;  %v7804_v57 = vrot.slane %v13323_v54, 1 }
 0x2f0   : > { %v7803_v20 = vsel %vm1131_vm3, %v7800_v12, %v7802_v59 }
 0x2f1   : > { %v7805_v53 = vsel %vm1131_vm3, %v7802_v59, %v7804_v57  ;;  %v7807_v12 = vsel %vm1131_vm3, %v7804_v57, %v7806_v32 }
 0x2f3   : > { %10284 = vmatmul.mubr.bf16.gmra.mxu0 %v10667_v13 }
 0x2f4   : > { %10287 = vmatprep.mubr.bf16.mxu0 %v10670_v60  ;;  %v10687_v60 = vld [vmem:[%s14063_s2 + $0x1f0] sm:$0xff]  }
 0x2f6   : > { %10140 = vmatmul.mubr.bf16.gmra.mxu1 %v10671_v1  ;;  %v6680_v1 = vsel %vm1131_vm3, %v6677_v35, %v14259_v6 }
 0x2f7   : > { %10143 = vmatprep.mubr.bf16.mxu1 %v10672_v10 }
 0x2fb   : > { %10288 = vmatmul.mubr.bf16.gmra.mxu0 %v10674_v28  ;;  %v7808_v28 = vrot.slane %v13345_v43, 1  ;;  %v7810_v43 = vrot.slane %v13351_v30, 1 }
 0x2fc   : > { %10355 = vmatprep.mubr.bf16.mxu0 %v7801_v7 }
 0x2fd   : > { %v7809_v11 = vsel %vm1131_vm3, %v7806_v32, %v7808_v28  ;;  %v10702_v32 = vld [vmem:[%s14063_s2 + $0x1c8] sm:$0xff]  }
 0x2fe   : > { %10144 = vmatmul.mubr.bf16.gmra.mxu1 %v10680_v63 }
 0x2ff   : > { %10211 = vmatprep.mubr.bf16.mxu1 %v6678_v14  ;;  %v10696_v14 = vld [vmem:[%s14063_s2 + $0x1d8] sm:$0xff]  }
 0x302   : > { %v10069_v13 = vpop.f32.mrf.mxu0 }
 0x303   : > { %10356 = vmatmul.mubr.bf16.vlgmr.msra.gmra.mxu0 %v7803_v20  ;;  %v7812_v20 = vrot.slane %v13360_v0, 1  ;;  %v7814_v0 = vrot.slane %v13364_v22, 1 }
 0x304   : > { %10359 = vmatprep.mubr.bf16.mxu0 %v7805_v53  ;;  %v9973_v55 = vpop.f32.mrf.mxu1  ;;  %v13531_v10 = vpop.f32.mrf.mxu0  ;;  %v10699_v53 = vld [vmem:[%s14063_s2 + $0x1d0] sm:$0xff]  }
 0x305   : > { %v7813_v13 = vsel %vm1131_vm3, %v7810_v43, %v7812_v20 }
 0x306   : > { %10212 = vmatmul.mubr.bf16.vlgmr.msra.gmra.mxu1 %v6680_v1  ;;  %v13535_v54 = vpop.f32.mrf.mxu1  ;;  %v10070_v48 = vpop.f32.mrf.mxu0 }
 0x307   : > { %10292 = vmatpush3.bf16.msra.mxu1 %v10684_v24  ;;  %10215 = vmatprep.mubr.bf16.mxu1 %v13198_v2 }
 0x308   : > { %10293 = vmatprep.subr.bf16.mxu1 %v10687_v60  ;;  %v9974_v21 = vpop.f32.mrf.mxu1  ;;  %v13540_v38 = vpop.f32.mrf.mxu0 }
 0x309   : > { %v7816_v21 = vrot.slane %v13368_v34, 1  ;;  %v7818_v34 = vrot.slane %v13376_v4, 1 }
 0x30a   : > { %v13544_v24 = vpop.f32.mrf.mxu1  ;;  %v10073_v2 = vpop.f32.mrf.mxu0 }
 0x30b   : > { %10294 = vmatpush3.bf16.msra.mxu1 %v10687_v60  ;;  %10360 = vmatmul.mubr.bf16.gmra.mxu0 %v7807_v12  ;;  %v10705_v12 = vld [vmem:[%s14063_s2 + $0x1c0] sm:$0xff]  }
 0x30c   : > { %10295 = vmatprep.subr.bf16.mxu1 %v10690_v19  ;;  %10363 = vmatprep.mubr.bf16.mxu0 %v7809_v11  ;;  %v13550_v63 = vpop.f32.mrf.mxu0 }
 0x30d   : > { %v9977_v7 = vpop.f32.mrf.mxu1 }
 0x30e   : > { %10216 = vmatmul.mubr.bf16.gmra.mxu1 %v13209_v9  ;;  %v10074_v35 = vpop.f32.mrf.mxu0  ;;  %v7811_v9 = vsel %vm1131_vm3, %v7808_v28, %v7810_v43  ;;  %v7817_v28 = vsel %vm1131_vm3, %v7814_v0, %v7816_v21 }
 0x30f   : > { %10219 = vmatprep.mubr.bf16.mxu1 %v13212_v18  ;;  %10296 = vmatpush3.bf16.msra.mxu1 %v10690_v19  ;;  %v13555_v52 = vpop.f32.mrf.mxu1 }
 0x310   : > { %10297 = vmatprep.subr.bf16.mxu1 %v10693_v3  ;;  %v13560_v57 = vpop.f32.mrf.mxu0 }
 0x311   : > { %v9978_v59 = vpop.f32.mrf.mxu1 }
 0x312   : > { %v7819_v59 = vsel %vm1131_vm3, %v7816_v21, %v7818_v34 }
 0x313   : > { %10298 = vmatpush3.bf16.msra.mxu1 %v10693_v3  ;;  %v13564_v18 = vpop.f32.mrf.mxu1  ;;  %v10077_v30 = vpop.f32.mrf.mxu0  ;;  %10364 = vmatmul.mubr.bf16.gmra.mxu0 %v7811_v9 }
 0x314   : > { %10299 = vmatprep.subr.bf16.mxu1 %v10696_v14  ;;  %10367 = vmatprep.mubr.bf16.mxu0 %v7813_v13  ;;  %v7822_v30 = vrot.slane %v13392_v41, 1 }
 0x315   : > { %v9981_v60 = vpop.f32.mrf.mxu1  ;;  %v13570_v6 = vpop.f32.mrf.mxu0 }
 0x316   : > { %10220 = vmatmul.mubr.bf16.gmra.mxu1 %v13219_v27  ;;  %v7815_v27 = vsel %vm1131_vm3, %v7812_v20, %v7814_v0  ;;  %v7824_v0 = vrot.slane %v13400_v49, 1  ;;  %v7826_v49 = vrot.slane %v13406_v45, 1 }
 0x317   : > { %10223 = vmatprep.mubr.bf16.mxu1 %v13222_v47  ;;  %10300 = vmatpush3.bf16.msra.mxu1 %v10696_v14  ;;  %v13575_v1 = vpop.f32.mrf.mxu1  ;;  %v10078_v55 = vpop.f32.mrf.mxu0  ;;  %v7820_v14 = vrot.slane %v13385_v56, 1 }
 0x318   : > { %10301 = vmatprep.subr.bf16.mxu1 %v10699_v53  ;;  %v7288_v55 = vld [vmem:[#allocation2 + $0x20] sm:$0xf] }
 0x319   : > { %v9982_v48 = vpop.f32.mrf.mxu1  ;;  %v13580_v19 = vpop.f32.mrf.mxu0 }
 0x31b   : > { %10302 = vmatpush3.bf16.msra.mxu1 %v10699_v53  ;;  %v13584_v47 = vpop.f32.mrf.mxu1  ;;  %v10081_v22 = vpop.f32.mrf.mxu0  ;;  %10368 = vmatmul.mubr.bf16.gmra.mxu0 %v7815_v27 }
 0x31c   : > { %10303 = vmatprep.subr.bf16.mxu1 %v10702_v32  ;;  %10371 = vmatprep.mubr.bf16.mxu0 %v7817_v28 }
 0x31d   : > { %v13590_v11 = vpop.f32.mrf.mxu0 }
 0x31e   : > { %v9985_v2 = vpop.f32.mrf.mxu1  ;;  %10224 = vmatmul.mubr.bf16.gmra.mxu1 %v13228_v37 }
 0x31f   : > { %10227 = vmatprep.mubr.bf16.mxu1 %v13237_v25  ;;  %10304 = vmatpush3.bf16.msra.mxu1 %v10702_v32  ;;  %v10082_v7 = vpop.f32.mrf.mxu0  ;;  %v7821_v25 = vsel %vm1131_vm3, %v7818_v34, %v7820_v14  ;;  %v7823_v32 = vsel %vm1131_vm3, %v7820_v14, %v7822_v30  ;;  %v7828_v34 = vrot.slane %v13415_v51, 1  ;;  %v7830_v51 = vrot.slane %v13434_v46, 1 }
 0x320   : > { %v13595_v3 = vpop.f32.mrf.mxu1  ;;  %10305 = vmatprep.subr.bf16.mxu1 %v10705_v12 }
 0x321   : > { %v13597_v35 = vpop.f32.mrf.mxu0 }
 0x322   : > { %v9986_v43 = vpop.f32.mrf.mxu1 }
 0x323   : > { %10306 = vmatpush3.bf16.msra.mxu1 %v10705_v12  ;;  %v10085_v37 = vpop.f32.mrf.mxu0  ;;  %10372 = vmatmul.mubr.bf16.gmra.mxu0 %v7819_v59 }
 0x324   : > { %v13601_v20 = vpop.f32.mrf.mxu1  ;;  %10375 = vmatprep.mubr.bf16.mxu0 %v7821_v25 }
 0x325   : > { %v13604_v9 = vpop.f32.mrf.mxu0 }
 0x326   : > { %v9989_v4 = vpop.f32.mrf.mxu1  ;;  %10228 = vmatmul.mubr.bf16.gmra.mxu1 %v13245_v23  ;;  %v7825_v23 = vsel %vm1131_vm3, %v7822_v30, %v7824_v0 }
 0x327   : > { %10231 = vmatprep.mubr.bf16.mxu1 %v13254_v17  ;;  %v10086_v13 = vpop.f32.mrf.mxu0  ;;  %v8890_v17 = vcombine.low %v7288_v55, %v13515_v44  ;;  %v7827_v44 = vsel %vm1131_vm3, %v7824_v0, %v7826_v49  ;;  %v7831_v0 = vsel %vm1131_vm3, %v7828_v34, %v7830_v51 }
 0x328   : > { %v13609_v56 = vpop.f32.mrf.mxu1 }
 0x329   : > { %v13611_v60 = vpop.f32.mrf.mxu0  ;;  %v7424_v7 = vshll.u32 %v8890_v17, 16  ;;  %v7422_v4 = vshrl.u32 %v8890_v17, 16 }
 0x32a   : > { %v9990_v53 = vpop.f32.mrf.mxu1 }
 0x32b   : > { %v10089_v21 = vpop.f32.mrf.mxu0  ;;  %10376 = vmatmul.mubr.bf16.gmra.mxu0 %v7823_v32  ;;  %v7426_v59 = vrot.slane %v7424_v7, 1  ;;  %v14260_v7 = vld [vmem:[#allocation11_spill] sm:$0xff] }
 0x32c   : > { %v13615_v48 = vpop.f32.mrf.mxu1  ;;  %10379 = vmatprep.mubr.bf16.mxu0 %v7825_v23 }
 0x32d   : > { %v13619_v27 = vpop.f32.mrf.mxu0  ;;  %v7427_v53 = vor.u32 %v7426_v59, %v7422_v4 }
 0x32e   : > { %v9993_v41 = vpop.f32.mrf.mxu1  ;;  %10232 = vmatmul.mubr.bf16.gmra.mxu1 %v13270_v62  ;;  %v7829_v62 = vsel %vm1131_vm3, %v7826_v49, %v7828_v34 }
 0x32f   : > { %10235 = vmatprep.mubr.bf16.mxu1 %v13283_v16  ;;  %v10090_v28 = vpop.f32.mrf.mxu0 }
 0x330   : > { %v13624_v22 = vpop.f32.mrf.mxu1 }
 0x331   : > { %v13626_v2 = vpop.f32.mrf.mxu0 }
 0x332   : > { %v9994_v12 = vpop.f32.mrf.mxu1 }
 0x333   : > { %v10093_v14 = vpop.f32.mrf.mxu0  ;;  %10380 = vmatmul.mubr.bf16.gmra.mxu0 %v7827_v44 }
 0x334   : > { %v13630_v43 = vpop.f32.mrf.mxu1  ;;  %10383 = vmatprep.mubr.bf16.mxu0 %v7829_v62 }
 0x335   : > { %v13633_v45 = vpop.f32.mrf.mxu0 }
 0x336   : > { %v9997_v16 = vpop.f32.mrf.mxu1  ;;  %10236 = vmatmul.mubr.bf16.gmra.mxu1 %v13292_v33 }
 0x337   : > { %10239 = vmatprep.mubr.bf16.mxu1 %v13300_v58  ;;  %v10094_v25 = vpop.f32.mrf.mxu0  ;;  %v7432_v58 = vsel %vm466_vm1, %v7427_v53, %v13347_v40 }
 0x338   : > { %v13638_v37 = vpop.f32.mrf.mxu1 }
 0x339   : > { %v13640_v13 = vpop.f32.mrf.mxu0 }
 0x33a   : > { %v9998_v30 = vpop.f32.mrf.mxu1 }
 0x33b   : > { %v10097_v32 = vpop.f32.mrf.mxu0  ;;  %10384 = vmatmul.mubr.bf16.gmra.mxu0 %v7831_v0  ;;  %v14261_v30 = vld [vmem:[#allocation13_spill] sm:$0xff] }
 0x33c   : > { %v13643_v55 = vpop.f32.mrf.mxu1 }
 0x33d   : > { %v13645_v21 = vpop.f32.mrf.mxu0 }
 0x33e   : > { %v10001_v33 = vpop.f32.mrf.mxu1  ;;  %10240 = vmatmul.mubr.bf16.gmra.mxu1 %v13319_v61 }
 0x33f   : > { %10307 = vmatprep.mubr.bf16.mxu1 %v7432_v58  ;;  %v10098_v23 = vpop.f32.mrf.mxu0 }
 0x340   : > { %v13650_v46 = vpop.f32.mrf.mxu1 }
 0x341   : > { %v13652_v41 = vpop.f32.mrf.mxu0 }
 0x342   : > { %v10002_v17 = vpop.f32.mrf.mxu1 }
 0x343   : > { %v10165_v28 = vpop.f32.mrf.mxu0 }
 0x344   : > { %v13654_v49 = vpop.f32.mrf.mxu1 }
 0x345   : > { %v13656_v34 = vpop.f32.mrf.mxu0 }
 0x346   : > { %v10021_v12 = vpop.f32.mrf.mxu1  ;;  %10308 = vmatmul.mubr.bf16.vlgmr.msra.gmra.mxu1 %v13371_v31 }
 0x347   : > { %10311 = vmatprep.mubr.bf16.mxu1 %v14260_v7  ;;  %v10166_v44 = vpop.f32.mrf.mxu0 }
 0x348   : > { %v5421_v61 = vpop.f32.mrf.mxu1 }
 0x349   : > { %v13661_v40 = vadd.f32 %v5421_v61, %v13535_v54  ;;  %v13663_v62 = vpop.f32.mrf.mxu0 }
 0x34a   : > { %v10022_v14 = vpop.f32.mrf.mxu1 }
 0x34b   : > { %v10169_v59 = vpop.f32.mrf.mxu0 }
 0x34c   : > { %v5424_v16 = vpop.f32.mrf.mxu1 }
 0x34d   : > { %v13666_v51 = vadd.f32 %v5424_v16, %v13544_v24  ;;  %v13668_v4 = vpop.f32.mrf.mxu0 }
 0x34e   : > { %v10025_v25 = vpop.f32.mrf.mxu1  ;;  %10312 = vmatmul.mubr.bf16.gmra.mxu1 %v14261_v30 }
 0x34f   : > { %10315 = vmatprep.mubr.bf16.mxu1 %v13395_v8  ;;  %v10170_v53 = vpop.f32.mrf.mxu0 }
 0x350   : > { %v5435_v31 = vpop.f32.mrf.mxu1 }
 0x351   : > { %v13673_v54 = vadd.f32 %v5435_v31, %v13555_v52  ;;  %v13675_v32 = vpop.f32.mrf.mxu0 }
 0x352   : > { %v10026_v0 = vpop.f32.mrf.mxu1 }
 0x353   : > { %v10173_v58 = vpop.f32.mrf.mxu0 }
 0x354   : > { %v5438_v33 = vpop.f32.mrf.mxu1  ;;  %v14263_v58 = vld [vmem:[#allocation16_spill] sm:$0xff] }
 0x355   : > { %v13678_v24 = vadd.f32 %v5438_v33, %v13564_v18  ;;  %v13680_v17 = vpop.f32.mrf.mxu0 }
 0x356   : > { %v10029_v23 = vpop.f32.mrf.mxu1  ;;  %10316 = vmatmul.mubr.bf16.gmra.mxu1 %v13403_v42  ;;  %v14262_v42 = vld [vmem:[#allocation8_spill] sm:$0xff] }
 0x357   : > { %10319 = vmatprep.mubr.bf16.mxu1 %v13409_v39  ;;  %v10174_v28 = vpop.f32.mrf.mxu0 }
 0x358   : > { %v5449_v8 = vpop.f32.mrf.mxu1 }
 0x359   : > { %v13685_v52 = vadd.f32 %v5449_v8, %v13575_v1  ;;  %v13687_v7 = vpop.f32.mrf.mxu0 }
 0x35a   : > { %v10030_v12 = vpop.f32.mrf.mxu1 }
 0x35b   : > { %v10177_v44 = vpop.f32.mrf.mxu0 }
 0x35c   : > { %v5452_v61 = vpop.f32.mrf.mxu1 }
 0x35d   : > { %v13690_v18 = vadd.f32 %v5452_v61, %v13584_v47  ;;  %v13692_v16 = vpop.f32.mrf.mxu0 }
 0x35e   : > { %v10033_v14 = vpop.f32.mrf.mxu1  ;;  %10320 = vmatmul.mubr.bf16.gmra.mxu1 %v13418_v5  ;;  %v14264_v5 = vld [vmem:[#allocation5_spill] sm:$0xff] }
 0x35f   : > { %10323 = vmatprep.mubr.bf16.mxu1 %v14262_v42  ;;  %v10178_v59 = vpop.f32.mrf.mxu0 }
 0x360   : > { %v5463_v39 = vpop.f32.mrf.mxu1 }
 0x361   : > { %v13697_v1 = vadd.f32 %v5463_v39, %v13595_v3  ;;  %v13699_v30 = vpop.f32.mrf.mxu0 }
 0x362   : > { %v10034_v25 = vpop.f32.mrf.mxu1 }
 0x363   : > { %v10181_v53 = vpop.f32.mrf.mxu0 }
 0x364   : > { %v5466_v31 = vpop.f32.mrf.mxu1 }
 0x365   : > { %v13702_v47 = vadd.f32 %v5466_v31, %v13601_v20  ;;  %v13704_v33 = vpop.f32.mrf.mxu0 }
 0x366   : > { %v10037_v0 = vpop.f32.mrf.mxu1  ;;  %10324 = vmatmul.mubr.bf16.gmra.mxu1 %v14263_v58 }
 0x367   : > { %10327 = vmatprep.mubr.bf16.mxu1 %v14264_v5  ;;  %v10182_v8 = vpop.f32.mrf.mxu0 }
 0x368   : > { %v5477_v23 = vpop.f32.mrf.mxu1 }
 0x369   : > { %v13709_v3 = vadd.f32 %v5477_v23, %v13609_v56  ;;  %v13711_v12 = vpop.f32.mrf.mxu0 }
 0x36a   : > { %v10038_v28 = vpop.f32.mrf.mxu1 }
 0x36b   : > { %v10185_v44 = vpop.f32.mrf.mxu0 }
 0x36c   : > { %v5480_v61 = vpop.f32.mrf.mxu1 }
 0x36d   : > { %v13714_v20 = vadd.f32 %v5480_v61, %v13615_v48  ;;  %v13716_v42 = vpop.f32.mrf.mxu0 }
 0x36e   : > { %v10041_v14 = vpop.f32.mrf.mxu1  ;;  %10328 = vmatmul.mubr.bf16.gmra.mxu1 %v13443_v36 }
 0x36f   : > { %10331 = vmatprep.mubr.bf16.mxu1 %v13448_v29  ;;  %v10186_v59 = vpop.f32.mrf.mxu0 }
 0x370   : > { %v5491_v39 = vpop.f32.mrf.mxu1 }
 0x371   : > { %v13721_v56 = vadd.f32 %v5491_v39, %v13624_v22  ;;  %v13723_v31 = vpop.f32.mrf.mxu0 }
 0x372   : > { %v10042_v25 = vpop.f32.mrf.mxu1 }
 0x373   : > { %v10189_v0 = vpop.f32.mrf.mxu0 }
 0x374   : > { %v5494_v53 = vpop.f32.mrf.mxu1 }
 0x375   : > { %v13726_v48 = vadd.f32 %v5494_v53, %v13630_v43  ;;  %v13728_v5 = vpop.f32.mrf.mxu0 }
 0x376   : > { %v10045_v58 = vpop.f32.mrf.mxu1  ;;  %10332 = vmatmul.mubr.bf16.gmra.mxu1 %v13453_v50 }
 0x377   : > { %10335 = vmatprep.mubr.bf16.mxu1 %v13460_v26  ;;  %v10190_v29 = vpop.f32.mrf.mxu0 }
 0x378   : > { %v5505_v36 = vpop.f32.mrf.mxu1 }
 0x379   : > { %v13733_v22 = vadd.f32 %v5505_v36, %v13638_v37  ;;  %v13735_v8 = vpop.f32.mrf.mxu0  ;;  %v5795_v36 = vadd.f32 %v13531_v10, %v13661_v40  ;;  %v5797_v10 = vadd.f32 %v13550_v63, %v13673_v54  ;;  %v5799_v63 = vadd.f32 %v13570_v6, %v13685_v52 }
 0x37a   : > { %v10046_v23 = vpop.f32.mrf.mxu1  ;;  %14265 = vst [vmem:[#allocation6_spill] sm:$0xff] %v13735_v8  ;;  %v5801_v6 = vadd.f32 %v13590_v11, %v13697_v1  ;;  %v5803_v11 = vadd.f32 %v13604_v9, %v13709_v3  ;;  %v5805_v9 = vadd.f32 %v13619_v27, %v13721_v56 }
 0x37b   : > { %v10193_v61 = vpop.f32.mrf.mxu0  ;;  %v5807_v27 = vadd.f32 %v13633_v45, %v13733_v22 }
 0x37c   : > { %v5508_v28 = vpop.f32.mrf.mxu1  ;;  %v5796_v61 = vadd.f32 %v13540_v38, %v13666_v51  ;;  %v5798_v38 = vadd.f32 %v13560_v57, %v13678_v24  ;;  %v5800_v57 = vadd.f32 %v13580_v19, %v13690_v18  ;;  %v5802_v19 = vadd.f32 %v13597_v35, %v13702_v47 }
 0x37d   : > { %v13738_v43 = vadd.f32 %v5508_v28, %v13643_v55  ;;  %v13740_v14 = vpop.f32.mrf.mxu0  ;;  %v5804_v35 = vadd.f32 %v13611_v60, %v13714_v20  ;;  %v5806_v60 = vadd.f32 %v13626_v2, %v13726_v48 }
 0x37e   : > { %v10049_v44 = vpop.f32.mrf.mxu1  ;;  %10336 = vmatmul.mubr.bf16.gmra.mxu1 %v13463_v15 }
 0x37f   : > { %v10194_v26 = vpop.f32.mrf.mxu0  ;;  %v5808_v2 = vadd.f32 %v13640_v13, %v13738_v43 }
 0x380   : > { %v5519_v50 = vpop.f32.mrf.mxu1 }
 0x381   : > { %v13744_v39 = vadd.f32 %v5519_v50, %v13650_v46  ;;  %v13746_v59 = vpop.f32.mrf.mxu0 }
 0x382   : > { %v10050_v37 = vpop.f32.mrf.mxu1  ;;  %14266 = vst [vmem:[#allocation7_spill] sm:$0xff] %v13746_v59 }
 0x383   : > { %v10261_v53 = vpop.f32.mrf.mxu0  ;;  %v5809_v45 = vadd.f32 %v13645_v21, %v13744_v39 }
 0x384   : > { %v5522_v25 = vpop.f32.mrf.mxu1 }
 0x385   : > { %v13749_v0 = vadd.f32 %v5522_v25, %v13654_v49  ;;  %v13751_v58 = vpop.f32.mrf.mxu0 }
 0x386   : > { %v10117_v55 = vpop.f32.mrf.mxu1 }
 0x387   : > { %v10262_v29 = vpop.f32.mrf.mxu0  ;;  %v5810_v13 = vadd.f32 %v13652_v41, %v13749_v0 }
 0x388   : > { %v6038_v15 = vpop.f32.mrf.mxu1 }
 0x389   : > { %v13755_v23 = vadd.f32 %v6038_v15, %v5795_v36  ;;  %v13757_v28 = vpop.f32.mrf.mxu0 }
 0x38a   : > { %v10118_v46 = vpop.f32.mrf.mxu1 }
 0x38b   : > { %v10265_v50 = vpop.f32.mrf.mxu0  ;;  %v6639_v21 = vadd.f32 %v13656_v34, %v13755_v23 }
 0x38c   : > { %v6041_v44 = vpop.f32.mrf.mxu1 }
 0x38d   : > { %v13761_v49 = vadd.f32 %v6041_v44, %v5796_v61  ;;  %v13763_v37 = vpop.f32.mrf.mxu0 }
 0x38e   : > { %v10121_v26 = vpop.f32.mrf.mxu1 }
 0x38f   : > { %v10266_v25 = vpop.f32.mrf.mxu0 }
 0x390   : > { %v6052_v40 = vpop.f32.mrf.mxu1 }
 0x391   : > { %v13767_v53 = vadd.f32 %v6052_v40, %v5797_v10  ;;  %v13769_v36 = vpop.f32.mrf.mxu0 }
 0x392   : > { %v10122_v55 = vpop.f32.mrf.mxu1 }
 0x393   : > { %v10269_v15 = vpop.f32.mrf.mxu0 }
 0x394   : > { %v6055_v51 = vpop.f32.mrf.mxu1 }
 0x395   : > { %v13773_v29 = vadd.f32 %v6055_v51, %v5798_v38  ;;  %v13775_v61 = vpop.f32.mrf.mxu0 }
 0x396   : > { %v10125_v46 = vpop.f32.mrf.mxu1 }
 0x397   : > { %v10270_v44 = vpop.f32.mrf.mxu0 }
 0x398   : > { %v6066_v54 = vpop.f32.mrf.mxu1 }
 0x399   : > { %v13779_v50 = vadd.f32 %v6066_v54, %v5799_v63  ;;  %v13781_v10 = vpop.f32.mrf.mxu0 }
 0x39a   : > { %v10126_v26 = vpop.f32.mrf.mxu1 }
 0x39b   : > { %v10273_v40 = vpop.f32.mrf.mxu0 }
 0x39c   : > { %v6069_v24 = vpop.f32.mrf.mxu1 }
 0x39d   : > { %v13785_v25 = vadd.f32 %v6069_v24, %v5800_v57  ;;  %v13787_v38 = vpop.f32.mrf.mxu0 }
 0x39e   : > { %v10129_v55 = vpop.f32.mrf.mxu1 }
 0x39f   : > { %v10274_v51 = vpop.f32.mrf.mxu0 }
 0x3a0   : > { %v6080_v52 = vpop.f32.mrf.mxu1 }
 0x3a1   : > { %v13791_v15 = vadd.f32 %v6080_v52, %v5801_v6  ;;  %v13793_v63 = vpop.f32.mrf.mxu0 }
 0x3a2   : > { %v10130_v46 = vpop.f32.mrf.mxu1 }
 0x3a3   : > { %v10277_v54 = vpop.f32.mrf.mxu0 }
 0x3a4   : > { %v6083_v18 = vpop.f32.mrf.mxu1 }
 0x3a5   : > { %v13797_v44 = vadd.f32 %v6083_v18, %v5802_v19  ;;  %v13799_v57 = vpop.f32.mrf.mxu0 }
 0x3a6   : > { %v10133_v26 = vpop.f32.mrf.mxu1 }
 0x3a7   : > { %v10278_v24 = vpop.f32.mrf.mxu0 }
 0x3a8   : > { %v6094_v1 = vpop.f32.mrf.mxu1 }
 0x3a9   : > { %v13803_v40 = vadd.f32 %v6094_v1, %v5803_v11  ;;  %v13805_v6 = vpop.f32.mrf.mxu0 }
 0x3aa   : > { %v10134_v55 = vpop.f32.mrf.mxu1 }
 0x3ab   : > { %v10281_v52 = vpop.f32.mrf.mxu0 }
 0x3ac   : > { %v6097_v47 = vpop.f32.mrf.mxu1 }
 0x3ad   : > { %v13809_v51 = vadd.f32 %v6097_v47, %v5804_v35  ;;  %v13811_v19 = vpop.f32.mrf.mxu0 }
 0x3ae   : > { %v10137_v46 = vpop.f32.mrf.mxu1 }
 0x3af   : > { %v10282_v18 = vpop.f32.mrf.mxu0 }
 0x3b0   : > { %v6108_v3 = vpop.f32.mrf.mxu1 }
 0x3b1   : > { %v13815_v54 = vadd.f32 %v6108_v3, %v5805_v9  ;;  %v13817_v11 = vpop.f32.mrf.mxu0 }
 0x3b2   : > { %v10138_v26 = vpop.f32.mrf.mxu1 }
 0x3b3   : > { %v10285_v1 = vpop.f32.mrf.mxu0 }
 0x3b4   : > { %v6111_v20 = vpop.f32.mrf.mxu1 }
 0x3b5   : > { %v13821_v24 = vadd.f32 %v6111_v20, %v5806_v60  ;;  %v13823_v35 = vpop.f32.mrf.mxu0 }
 0x3b6   : > { %v10141_v55 = vpop.f32.mrf.mxu1  ;;  %14267 = vst [vmem:[#allocation9_spill] sm:$0xff] %v13823_v35 }
 0x3b7   : > { %v10286_v47 = vpop.f32.mrf.mxu0 }
 0x3b8   : > { %v6122_v56 = vpop.f32.mrf.mxu1 }
 0x3b9   : > { %v13827_v52 = vadd.f32 %v6122_v56, %v5807_v27  ;;  %v13829_v9 = vpop.f32.mrf.mxu0 }
 0x3ba   : > { %v10142_v46 = vpop.f32.mrf.mxu1  ;;  %14268 = vst [vmem:[#allocation10_spill] sm:$0xff] %v13829_v9 }
 0x3bb   : > { %v10289_v3 = vpop.f32.mrf.mxu0 }
 0x3bc   : > { %v6125_v48 = vpop.f32.mrf.mxu1 }
 0x3bd   : > { %v13833_v18 = vadd.f32 %v6125_v48, %v5808_v2  ;;  %v13835_v60 = vpop.f32.mrf.mxu0 }
 0x3be   : > { %v10145_v26 = vpop.f32.mrf.mxu1  ;;  %14270 = vst [vmem:[#allocation12_spill] sm:$0xff] %v13835_v60 }
 0x3bf   : > { %14269 = vst [vmem:[#allocation4_spill] sm:$0xff] %v13833_v18  ;;  %v10290_v20 = vpop.f32.mrf.mxu0 }
 0x3c0   : > { %v6136_v22 = vpop.f32.mrf.mxu1 }
 0x3c1   : > { %v13839_v1 = vadd.f32 %v6136_v22, %v5809_v45  ;;  %v13841_v27 = vpop.f32.mrf.mxu0 }
 0x3c2   : > { %v10146_v55 = vpop.f32.mrf.mxu1  ;;  %14271 = vst [vmem:[#allocation19_spill] sm:$0xff] %v13841_v27 }
 0x3c3   : > { %v10357_v56 = vpop.f32.mrf.mxu0  ;;  %v6641_v55 = vadd.f32 %v13668_v4, %v13767_v53 }
 0x3c4   : > { %v6139_v43 = vpop.f32.mrf.mxu1 }
 0x3c5   : > { %v13845_v47 = vadd.f32 %v6139_v43, %v5810_v13  ;;  %v13847_v2 = vpop.f32.mrf.mxu0 }
 0x3c6   : > { %v10213_v46 = vpop.f32.mrf.mxu1 }
 0x3c7   : > { %14272 = vst [vmem:[#allocation17_spill] sm:$0xff] %v13845_v47  ;;  %v10358_v48 = vpop.f32.mrf.mxu0 }
 0x3c8   : > { %v6807_v39 = vpop.f32.mrf.mxu1 }
 0x3c9   : > { %v13851_v3 = vadd.f32 %v6807_v39, %v6639_v21  ;;  %v13853_v45 = vpop.f32.mrf.mxu0 }
 0x3ca   : > { %v10214_v26 = vpop.f32.mrf.mxu1 }
 0x3cb   : > { %v10361_v41 = vpop.f32.mrf.mxu0  ;;  %v6643_v26 = vadd.f32 %v13680_v17, %v13779_v50 }
 0x3cc   : > { %v13855_v22 = vpop.f32.mrf.mxu1 }
 0x3cd   : > { %v13857_v20 = vpop.f32.mrf.mxu0 }
 0x3ce   : > { %v10217_v0 = vpop.f32.mrf.mxu1 }
 0x3cf   : > { %v10362_v43 = vpop.f32.mrf.mxu0 }
 0x3d0   : > { %v6821_v13 = vpop.f32.mrf.mxu1 }
 0x3d1   : > { %v13861_v56 = vadd.f32 %v6821_v13, %v6641_v55  ;;  %v13863_v23 = vpop.f32.mrf.mxu0 }
 0x3d2   : > { %v10218_v34 = vpop.f32.mrf.mxu1 }
 0x3d3   : > { %v10365_v21 = vpop.f32.mrf.mxu0 }
 0x3d4   : > { %v13865_v46 = vpop.f32.mrf.mxu1  ;;  %v6645_v21 = vadd.f32 %v13692_v16, %v13791_v15 }
 0x3d5   : > { %v13867_v48 = vpop.f32.mrf.mxu0 }
 0x3d6   : > { %v10221_v39 = vpop.f32.mrf.mxu1 }
 0x3d7   : > { %v10366_v0 = vpop.f32.mrf.mxu0 }
 0x3d8   : > { %v6835_v41 = vpop.f32.mrf.mxu1 }
 0x3d9   : > { %v13871_v27 = vadd.f32 %v6835_v41, %v6643_v26  ;;  %v13873_v53 = vpop.f32.mrf.mxu0 }
 0x3da   : > { %v10222_v4 = vpop.f32.mrf.mxu1 }
 0x3db   : > { %v10369_v13 = vpop.f32.mrf.mxu0 }
 0x3dc   : > { %v13875_v55 = vpop.f32.mrf.mxu1  ;;  %v6647_v13 = vadd.f32 %v13704_v33, %v13803_v40 }
 0x3dd   : > { %v13877_v34 = vpop.f32.mrf.mxu0 }
 0x3de   : > { %v10225_v43 = vpop.f32.mrf.mxu1 }
 0x3df   : > { %v10370_v60 = vpop.f32.mrf.mxu0 }
 0x3e0   : > { %v6849_v39 = vpop.f32.mrf.mxu1 }
 0x3e1   : > { %v13881_v59 = vadd.f32 %v6849_v39, %v6645_v21  ;;  %v13883_v50 = vpop.f32.mrf.mxu0 }
 0x3e2   : > { %v10226_v17 = vpop.f32.mrf.mxu1 }
 0x3e3   : > { %v10373_v41 = vpop.f32.mrf.mxu0 }
 0x3e4   : > { %v13885_v26 = vpop.f32.mrf.mxu1  ;;  %v6649_v41 = vadd.f32 %v13716_v42, %v13815_v54 }
 0x3e5   : > { %v13887_v4 = vpop.f32.mrf.mxu0 }
 0x3e6   : > { %v10229_v0 = vpop.f32.mrf.mxu1 }
 0x3e7   : > { %v10374_v47 = vpop.f32.mrf.mxu0 }
 0x3e8   : > { %v6863_v43 = vpop.f32.mrf.mxu1 }
 0x3e9   : > { %v13891_v9 = vadd.f32 %v6863_v43, %v6647_v13  ;;  %v13893_v15 = vpop.f32.mrf.mxu0 }
 0x3ea   : > { %v10230_v16 = vpop.f32.mrf.mxu1 }
 0x3eb   : > { %v10377_v21 = vpop.f32.mrf.mxu0 }
 0x3ec   : > { %v13895_v60 = vpop.f32.mrf.mxu1  ;;  %v6651_v21 = vadd.f32 %v13728_v5, %v13827_v52 }
 0x3ed   : > { %v13897_v17 = vpop.f32.mrf.mxu0 }
 0x3ee   : > { %v10233_v39 = vpop.f32.mrf.mxu1 }
 0x3ef   : > { %v10378_v35 = vpop.f32.mrf.mxu0 }
 0x3f0   : > { %v6877_v0 = vpop.f32.mrf.mxu1 }
 0x3f1   : > { %v13901_v8 = vadd.f32 %v6877_v0, %v6649_v41  ;;  %v13903_v40 = vpop.f32.mrf.mxu0 }
 0x3f2   : > { %v10234_v33 = vpop.f32.mrf.mxu1 }
 0x3f3   : > { %v10381_v13 = vpop.f32.mrf.mxu0 }
 0x3f4   : > { %v13905_v47 = vpop.f32.mrf.mxu1 }
 0x3f5   : > { %v13907_v16 = vpop.f32.mrf.mxu0 }
 0x3f6   : > { %v10237_v43 = vpop.f32.mrf.mxu1  ;;  %14273 = vst [vmem:[#allocation14_spill] sm:$0xff] %v13907_v16 }
 0x3f7   : > { %v10382_v18 = vpop.f32.mrf.mxu0  ;;  %v6653_v43 = vadd.f32 %v13740_v14, %v13839_v1  ;;  %v13935_v1 = vld [vmem:[%s14066_s5] ss:$0 sm:$0xff] }
 0x3f8   : > { %v6891_v39 = vpop.f32.mrf.mxu1 }
 0x3f9   : > { %v13911_v42 = vadd.f32 %v6891_v39, %v6651_v21  ;;  %v13913_v35 = vpop.f32.mrf.mxu0  ;;  %v6640_v39 = vadd.f32 %v13663_v62, %v13761_v49 }
 0x3fa   : > { %v10238_v54 = vpop.f32.mrf.mxu1 }
 0x3fb   : > { %v10385_v0 = vpop.f32.mrf.mxu0 }
 0x3fc   : > { %v13915_v41 = vpop.f32.mrf.mxu1  ;;  %v6919_v0 = vadd.f32 %v13855_v22, %v6640_v39  ;;  %v6642_v22 = vadd.f32 %v13675_v32, %v13773_v29 }
 0x3fd   : > { %v13917_v13 = vpop.f32.mrf.mxu0 }
 0x3fe   : > { %v10241_v33 = vpop.f32.mrf.mxu1  ;;  %14274 = vst [vmem:[#allocation22_spill] sm:$0xff] %v13917_v13  ;;  %v7273_v62 = vadd.f32 %v13757_v28, %v6919_v0  ;;  %v7274_v28 = vadd.f32 %v13763_v37, %v13861_v56 }
 0x3ff   : > { %v10386_v5 = vpop.f32.mrf.mxu0  ;;  %v7272_v33 = vadd.f32 %v13751_v58, %v13851_v3  ;;  %v13946_v3 = vld [vmem:[%s14067_s6] ss:$0 sm:$0xff] }
 0x400   : > { %v6905_v16 = vpop.f32.mrf.mxu1 }
 0x401   : > { %v13921_v52 = vadd.f32 %v6905_v16, %v6653_v43 }
 0x402   : > { %v10242_v18 = vpop.f32.mrf.mxu1 }
 0x403   : > { %v6921_v18 = vadd.f32 %v13865_v46, %v6642_v22 }
 0x404   : > { %v13923_v21 = vpop.f32.mrf.mxu1 }
 0x405   : > { %v7275_v46 = vadd.f32 %v13769_v36, %v6921_v18 }
 0x406   : > { %v10309_v54 = vpop.f32.mrf.mxu1 }
 0x408   : > { %v7651_v13 = vpop.f32.mrf.mxu1 }
 0x409   : > { %v7762_v14 = vadd.f32 %v7651_v13, %v7272_v33 }
 0x40a   : > { %v10310_v16 = vpop.f32.mrf.mxu1 }
 0x40b   : > { %v8041_v43 = vadd.f32 %v13847_v2, %v7762_v14 }
 0x40c   : > { %v7654_v49 = vpop.f32.mrf.mxu1 }
 0x40d   : > { %v8064_v5 = vmul.f32 %v13935_v1, %v8041_v43  ;;  %v7763_v58 = vadd.f32 %v7654_v49, %v7273_v62 }
 0x40e   : > { %v10313_v13 = vpop.f32.mrf.mxu1 }
 0x40f   : > { %v8042_v2 = vadd.f32 %v13853_v45, %v7763_v58  ;;  %v8087_v29 = vadd.f32 %v13946_v3, %v8064_v5  ;;  %v6644_v45 = vadd.f32 %v13687_v7, %v13785_v25  ;;  %v7276_v7 = vadd.f32 %v13775_v61, %v13871_v27 }
 0x410   : > { %v7665_v32 = vpop.f32.mrf.mxu1 }
 0x411   : > { %v8065_v39 = vmul.f32 %v13935_v1, %v8042_v2  ;;  %v7764_v54 = vadd.f32 %v7665_v32, %v7274_v28  ;;  %v8103_v37 = vmax.f32 %v8087_v29, 0.0 }
 0x412   : > { %v10314_v0 = vpop.f32.mrf.mxu1 }
 0x413   : > { %v8088_v33 = vadd.f32 %v13946_v3, %v8065_v39  ;;  %v8043_v14 = vadd.f32 %v13857_v20, %v7764_v54  ;;  %v6923_v20 = vadd.f32 %v13875_v55, %v6644_v45 }
 0x414   : > { %v7668_v16 = vpop.f32.mrf.mxu1 }
 0x415   : > { %v8104_v56 = vmax.f32 %v8088_v33, 0.0  ;;  %v8066_v43 = vmul.f32 %v13935_v1, %v8043_v14  ;;  %v7765_v62 = vadd.f32 %v7668_v16, %v7275_v46  ;;  %v7277_v55 = vadd.f32 %v13781_v10, %v6923_v20 }
 0x416   : > { %v10317_v49 = vpop.f32.mrf.mxu1 }
 0x417   : > { %v9109_v22 = vpack.c.bf16 %v8104_v56, %v8103_v37  ;;  %v8044_v36 = vadd.f32 %v13863_v23, %v7765_v62  ;;  %v8089_v5 = vadd.f32 %v13946_v3, %v8066_v43  ;;  %v6646_v23 = vadd.f32 %v13699_v30, %v13797_v44 }
 0x418   : > { %v7679_v25 = vpop.f32.mrf.mxu1 }
 0x419   : > { %9110 = vst [vmem:[%s13963_s18] sm:$0xff] %v9109_v22   ;;  %v8067_v58 = vmul.f32 %v13935_v1, %v8044_v36  ;;  %v7766_v13 = vadd.f32 %v7679_v25, %v7276_v7  ;;  %v8105_v61 = vmax.f32 %v8089_v5, 0.0  ;;  %v6925_v0 = vadd.f32 %v13885_v26, %v6646_v23 }
 0x41a   : > { %v10318_v18 = vpop.f32.mrf.mxu1 }
 0x41b   : > { %v8090_v2 = vadd.f32 %v13946_v3, %v8067_v58  ;;  %v8045_v28 = vadd.f32 %v13867_v48, %v7766_v13  ;;  %v7278_v48 = vadd.f32 %v13787_v38, %v13881_v59  ;;  %v7279_v26 = vadd.f32 %v13793_v63, %v6925_v0 }
 0x41c   : > { %v7682_v32 = vpop.f32.mrf.mxu1 }
 0x41d   : > { %v8106_v27 = vmax.f32 %v8090_v2, 0.0  ;;  %v8068_v29 = vmul.f32 %v13935_v1, %v8045_v28  ;;  %v7767_v39 = vadd.f32 %v7682_v32, %v7277_v55 }
 0x41e   : > { %v10321_v54 = vpop.f32.mrf.mxu1 }
 0x41f   : > { %v9114_v33 = vpack.c.bf16 %v8106_v27, %v8105_v61  ;;  %v8046_v14 = vadd.f32 %v13873_v53, %v7767_v39  ;;  %v8091_v10 = vadd.f32 %v13946_v3, %v8068_v29  ;;  %v6648_v53 = vadd.f32 %v13711_v12, %v13809_v51  ;;  %v14275_v54 = vld [vmem:[#allocation4_spill] sm:$0xff] }
 0x420   : > { %v7693_v46 = vpop.f32.mrf.mxu1 }
 0x421   : > { %9165 = vst [vmem:[%s13963_s18 + $0x8] sm:$0xff] %v9114_v33   ;;  %v8069_v30 = vmul.f32 %v13935_v1, %v8046_v14  ;;  %v7768_v44 = vadd.f32 %v7693_v46, %v7278_v48  ;;  %v8107_v59 = vmax.f32 %v8091_v10, 0.0  ;;  %v6927_v20 = vadd.f32 %v13895_v60, %v6648_v53 }
 0x422   : > { %v10322_v45 = vpop.f32.mrf.mxu1 }
 0x423   : > { %v8092_v16 = vadd.f32 %v13946_v3, %v8069_v30  ;;  %v8047_v37 = vadd.f32 %v13877_v34, %v7768_v44  ;;  %v7280_v34 = vadd.f32 %v13799_v57, %v13891_v9  ;;  %v7281_v60 = vadd.f32 %v13805_v6, %v6927_v20  ;;  %v14277_v45 = vld [vmem:[#allocation9_spill] sm:$0xff] }
 0x424   : > { %v7696_v56 = vpop.f32.mrf.mxu1 }
 0x425   : > { %v8108_v38 = vmax.f32 %v8092_v16, 0.0  ;;  %v8070_v43 = vmul.f32 %v13935_v1, %v8047_v37  ;;  %v7769_v62 = vadd.f32 %v7696_v56, %v7279_v26 }
 0x426   : > { %v10325_v49 = vpop.f32.mrf.mxu1 }
 0x427   : > { %v9119_v22 = vpack.c.bf16 %v8108_v38, %v8107_v59  ;;  %v8048_v36 = vadd.f32 %v13883_v50, %v7769_v62  ;;  %v8093_v63 = vadd.f32 %v13946_v3, %v8070_v43  ;;  %v6650_v50 = vadd.f32 %v13723_v31, %v13821_v24  ;;  %v14278_v59 = vld [vmem:[#allocation14_spill] sm:$0xff]  ;;  %v14280_v62 = vld [vmem:[#allocation17_spill] sm:$0xff] }
 0x428   : > { %v7707_v7 = vpop.f32.mrf.mxu1 }
 0x429   : > { %9166 = vst [vmem:[%s13963_s18 + $0x10] sm:$0xff] %v9119_v22   ;;  %v8071_v12 = vmul.f32 %v13935_v1, %v8048_v36  ;;  %v7770_v51 = vadd.f32 %v7707_v7, %v7280_v34  ;;  %v8109_v57 = vmax.f32 %v8093_v63, 0.0  ;;  %v6929_v55 = vadd.f32 %v13905_v47, %v6650_v50 }
 0x42a   : > { %v10326_v25 = vpop.f32.mrf.mxu1 }
 0x42b   : > { %v8094_v5 = vadd.f32 %v13946_v3, %v8071_v12  ;;  %v8049_v58 = vadd.f32 %v13887_v4, %v7770_v51  ;;  %v7282_v4 = vadd.f32 %v13811_v19, %v13901_v8  ;;  %v7283_v47 = vadd.f32 %v13817_v11, %v6929_v55  ;;  %v14282_v25 = vld [vmem:[#allocation12_spill] sm:$0xff] }
 0x42c   : > { %v7710_v13 = vpop.f32.mrf.mxu1 }
 0x42d   : > { %v8110_v9 = vmax.f32 %v8094_v5, 0.0  ;;  %v8072_v18 = vmul.f32 %v13935_v1, %v8049_v58  ;;  %v7771_v2 = vadd.f32 %v7710_v13, %v7281_v60  ;;  %v7286_v5 = vadd.f32 %v14282_v25, %v13921_v52 }
 0x42e   : > { %v10329_v28 = vpop.f32.mrf.mxu1 }
 0x42f   : > { %v9124_v23 = vpack.c.bf16 %v8110_v9, %v8109_v57  ;;  %v8050_v32 = vadd.f32 %v13893_v15, %v7771_v2  ;;  %v8095_v6 = vadd.f32 %v13946_v3, %v8072_v18  ;;  %v14276_v15 = vld [vmem:[#allocation6_spill] sm:$0xff] }
 0x430   : > { %v7721_v61 = vpop.f32.mrf.mxu1  ;;  %v6652_v0 = vadd.f32 %v14276_v15, %v14275_v54  ;;  %v14283_v18 = vld [vmem:[#allocation22_spill] sm:$0xff] }
 0x431   : > { %9167 = vst [vmem:[%s13963_s18 + $0x18] sm:$0xff] %v9124_v23   ;;  %v8073_v31 = vmul.f32 %v13935_v1, %v8050_v32  ;;  %v7772_v24 = vadd.f32 %v7721_v61, %v7282_v4  ;;  %v8111_v8 = vmax.f32 %v8095_v6, 0.0  ;;  %v8031_v4 = vpop.f32.mrf.mxu0 }
 0x432   : > { %v10330_v27 = vpop.f32.mrf.mxu1  ;;  %v6931_v10 = vadd.f32 %v13915_v41, %v6652_v0  ;;  %v14279_v41 = vld [vmem:[#allocation10_spill] sm:$0xff] }
 0x433   : > { %v8096_v29 = vadd.f32 %v13946_v3, %v8073_v31  ;;  %v8051_v39 = vadd.f32 %v13897_v17, %v7772_v24  ;;  %v7284_v17 = vadd.f32 %v14277_v45, %v13911_v42 }
 0x434   : > { %v7724_v33 = vpop.f32.mrf.mxu1  ;;  %v7285_v43 = vadd.f32 %v14279_v41, %v6931_v10 }
 0x435   : > { %v8112_v19 = vmax.f32 %v8096_v29, 0.0  ;;  %v8074_v14 = vmul.f32 %v13935_v1, %v8051_v39  ;;  %v7773_v48 = vadd.f32 %v7724_v33, %v7283_v47 }
 0x436   : > { %v10333_v46 = vpop.f32.mrf.mxu1 }
 0x437   : > { %v9129_v30 = vpack.c.bf16 %v8112_v19, %v8111_v8  ;;  %v8052_v44 = vadd.f32 %v13903_v40, %v7773_v48  ;;  %v8097_v11 = vadd.f32 %v13946_v3, %v8074_v14  ;;  %v14281_v40 = vld [vmem:[#allocation7_spill] sm:$0xff] }
 0x438   : > { %v7735_v16 = vpop.f32.mrf.mxu1  ;;  %v6654_v49 = vadd.f32 %v14281_v40, %v14280_v62 }
 0x439   : > { %9168 = vst [vmem:[%s13963_s18 + $0x20] sm:$0xff] %v9129_v30   ;;  %v8075_v37 = vmul.f32 %v13935_v1, %v8052_v44  ;;  %v7774_v26 = vadd.f32 %v7735_v16, %v7284_v17  ;;  %v8113_v42 = vmax.f32 %v8097_v11, 0.0 }
 0x43a   : > { %v10334_v53 = vpop.f32.mrf.mxu1  ;;  %v6933_v63 = vadd.f32 %v13923_v21, %v6654_v49  ;;  %v14284_v21 = vld [vmem:[#allocation19_spill] sm:$0xff] }
 0x43b   : > { %v8098_v56 = vadd.f32 %v13946_v3, %v8075_v37  ;;  %v8053_v38 = vadd.f32 %v14278_v59, %v7774_v26 }
 0x43c   : > { %v7738_v20 = vpop.f32.mrf.mxu1  ;;  %v7287_v28 = vadd.f32 %v14284_v21, %v6933_v63 }
 0x43d   : > { %v8114_v22 = vmax.f32 %v8098_v56, 0.0  ;;  %v8076_v36 = vmul.f32 %v13935_v1, %v8053_v38  ;;  %v7775_v34 = vadd.f32 %v7738_v20, %v7285_v43 }
 0x43e   : > { %v10337_v7 = vpop.f32.mrf.mxu1 }
 0x43f   : > { %v9134_v12 = vpack.c.bf16 %v8114_v22, %v8113_v42  ;;  %v8054_v51 = vadd.f32 %v13913_v35, %v7775_v34  ;;  %v8099_v60 = vadd.f32 %v13946_v3, %v8076_v36 }
 0x440   : > { %v7749_v58 = vpop.f32.mrf.mxu1 }
 0x441   : > { %9169 = vst [vmem:[%s13963_s18 + $0x28] sm:$0xff] %v9134_v12   ;;  %v8077_v50 = vmul.f32 %v13935_v1, %v8054_v51  ;;  %v7776_v13 = vadd.f32 %v7749_v58, %v7286_v5  ;;  %v8115_v55 = vmax.f32 %v8099_v60, 0.0 }
 0x442   : > { %v10338_v57 = vpop.f32.mrf.mxu1 }
 0x443   : > { %v8100_v9 = vadd.f32 %v13946_v3, %v8077_v50  ;;  %v8055_v2 = vadd.f32 %v14283_v18, %v7776_v13 }
 0x444   : > { %v7752_v35 = vpop.f32.mrf.mxu1 }
 0x445   : > { %v8116_v23 = vmax.f32 %v8100_v9, 0.0  ;;  %v8078_v52 = vmul.f32 %v13935_v1, %v8055_v2  ;;  %v7777_v32 = vadd.f32 %v7752_v35, %v7287_v28 }
 0x447   : > { %v9139_v61 = vpack.c.bf16 %v8116_v23, %v8115_v55  ;;  %v8056_v6 = vadd.f32 %v8031_v4, %v7777_v32  ;;  %v8101_v31 = vadd.f32 %v13946_v3, %v8078_v52 }
 0x449   : > { %9170 = vst [vmem:[%s13963_s18 + $0x30] sm:$0xff] %v9139_v61   ;;  %v8079_v24 = vmul.f32 %v13935_v1, %v8056_v6  ;;  %v8117_v29 = vmax.f32 %v8101_v31, 0.0 }
 0x44b   : > { %v8102_v27 = vadd.f32 %v13946_v3, %v8079_v24 }
 0x44d   : > { %v8118_v39 = vmax.f32 %v8102_v27, 0.0 }
 0x44f   : > { %v9144_v47 = vpack.c.bf16 %v8118_v39, %v8117_v29 }
 0x451   : > { %9171 = vst [vmem:[%s13963_s18 + $0x38] sm:$0xff] %v9144_v47  }
 0x452 PF: > { %s17_s28 = sadd.s32 1, %s10757_s28   ;;  %s14285_s24 = smov %s10749_s26 }
 0x453   : > { %p14_p8 = scmp.ge.s32.totalorder %s17_s28, 6   ;;  %s14286_s25 = smov %s10753_s27 }
 0x454   : > { %s14287_s26 = smov %s14290_s29  ;;  %s14288_s27 = smov %s14294_s30 }
 0x455   :  { %16 = sbr.rel (!%p14_p8) target bundleno = 3 (0x3), region = 94 }

</bundles_post_ra>
